<compile_context>
chip_gen: v5e
topology: v5e:2x2
jax: 0.10.0
libtpu: 0.0.40
codegen_flags: <defaults>
</compile_context>

<pallas_src>
import math

import jax
import jax.numpy as jnp
from jax import lax
from jax.experimental import pallas as pl
from jax.experimental.pallas import tpu as pltpu

# RReLU in eval mode is a deterministic leaky-relu with slope (lower+upper)/2.
_RRELU_SLOPE = (1.0 / 8.0 + 1.0 / 3.0) / 2.0

# MXU operand dtype (f32 accumulation everywhere).
MXU_DTYPE = jnp.bfloat16

_LANE = 128
_DN_NT = (((1,), (1,)), ((), ()))  # contract last dims of both (A @ B.T, MXU-native)
_DN_NN = (((1,), (0,)), ((), ()))  # ordinary matmul


def _round_up(x, m):
    return ((x + m - 1) // m) * m


def _pick_tile(n_pad, cap=1024):
    """Largest power-of-two tile in [128, cap] dividing n_pad (n_pad is 128-aligned)."""
    t = _LANE
    while t * 2 <= cap and n_pad % (t * 2) == 0:
        t *= 2
    return t


def _pick_row_tile(n_pad, n_graphs, cap=1024):
    """Row tile; shrink so the parallel grid has >= 4 tiles (v7x megacore balance)."""
    tm = _pick_tile(n_pad, cap)
    while tm > _LANE and n_graphs * (n_pad // tm) < 4:
        tm //= 2
    return tm


# ---------------------------------------------------------------------------
# Kernel 1: batched TopK scorer (layer 0 only): scores[j] = scorer_n @ X[j].T
#   lane-dense (T, 1, N_pad) output; scorer pre-normalized in the wrapper.
# ---------------------------------------------------------------------------
def _score_kernel(scorer_ref, x_ref, out_ref):
    # scorer_ref: (1, F) bf16, x_ref: (tn, F) bf16 -> out (1, tn) f32
    out_ref[...] = lax.dot_general(
        scorer_ref[...], x_ref[...], _DN_NT, preferred_element_type=jnp.float32
    )


def topk_scores_batched(feats_bf, scorer_n):
    t, n_pad, f = feats_bf.shape
    tn = _pick_tile(n_pad)
    return pl.pallas_call(
        _score_kernel,
        out_shape=jax.ShapeDtypeStruct((t, 1, n_pad), jnp.float32),
        grid=(t, n_pad // tn),
        in_specs=[
            pl.BlockSpec((1, f), lambda j, nb: (0, 0)),
            pl.BlockSpec((None, tn, f), lambda j, nb: (j, nb, 0)),
        ],
        out_specs=pl.BlockSpec((None, 1, tn), lambda j, nb: (j, 0, nb)),
        compiler_params=pltpu.CompilerParams(
            dimension_semantics=("parallel", "parallel")
        ),
    )(scorer_n.astype(MXU_DTYPE), feats_bf)


# ---------------------------------------------------------------------------
# Kernel 2: MatGRUCell, batched over the T timesteps with the evolving weight
#           carried in f32 VMEM scratch across the sequential ("arbitrary") grid.
#   z        = X_sel * tanh(s_sel)                       (K, F), K == H
#   [u;r;~]  = [Wu;Wr;Wh] @ z.T   (one fused A@B.T matmul -> (3F, H))
#   [u;r]   += [Uu;Ur]    @ h     (one fused matmul)
#   u = sigmoid(.. + bu), r = sigmoid(.. + br)
#   ht = tanh(Wh z.T + Uh (r*h) + bh)
#   h <- (1-u)*h + u*ht            (also written to out[j] in bf16)
# ---------------------------------------------------------------------------
def _matgru_kernel(w0_ref, wall_ref, uur_ref, uh_ref, ball_ref,
                   xsel_ref, ssel_ref, out_ref, w_carry):
    f = w_carry.shape[0]

    @pl.when(pl.program_id(0) == 0)
    def _():
        w_carry[...] = w0_ref[...]

    h = w_carry[...]                                  # (F, H) f32
    h_bf = h.astype(wall_ref.dtype)

    # x_sel arrives bf16; gate element-wise math stays f32.
    z = (xsel_ref[...].astype(jnp.float32) * jnp.tanh(ssel_ref[...]))
    z = z.astype(wall_ref.dtype)                      # (K, F) bf16

    wx = lax.dot_general(wall_ref[...], z, _DN_NT,
                         preferred_element_type=jnp.float32)     # (3F, K=H)
    u_ur = lax.dot_general(uur_ref[...], h_bf, _DN_NN,
                           preferred_element_type=jnp.float32)   # (2F, H)
    b = ball_ref[...]                                            # (3F, H) f32

    upd = jax.nn.sigmoid(wx[0:f] + u_ur[0:f] + b[0:f])
    rst = jax.nn.sigmoid(wx[f:2 * f] + u_ur[f:2 * f] + b[f:2 * f])

    h_cap = (rst * h).astype(wall_ref.dtype)
    uh_c = lax.dot_general(uh_ref[...], h_cap, _DN_NN,
                           preferred_element_type=jnp.float32)   # (F, H)
    h_til = jnp.tanh(wx[2 * f:3 * f] + uh_c + b[2 * f:3 * f])

    w_new = (1.0 - upd) * h + upd * h_til
    w_carry[...] = w_new
    out_ref[...] = w_new.astype(out_ref.dtype)


def matgru_evolve(w0, lp, x_sel, s_sel):
    t, k, f = x_sel.shape
    h = w0.shape[1]
    # Constant-index weights: single buffer (no benefit from double buffering,
    # halves their VMEM footprint - matters on v7x's 64 MiB VMEM at larger F).
    const1 = pl.Buffered(1)
    return pl.pallas_call(
        _matgru_kernel,
        out_shape=jax.ShapeDtypeStruct((t, f, h), MXU_DTYPE),
        grid=(t,),
        in_specs=[
            pl.BlockSpec((f, h), lambda j: (0, 0), pipeline_mode=const1),      # w0
            pl.BlockSpec((3 * f, f), lambda j: (0, 0), pipeline_mode=const1),  # [Wu;Wr;Wh]
            pl.BlockSpec((2 * f, f), lambda j: (0, 0), pipeline_mode=const1),  # [Uu;Ur]
            pl.BlockSpec((f, f), lambda j: (0, 0), pipeline_mode=const1),      # Uh
            pl.BlockSpec((3 * f, h), lambda j: (0, 0), pipeline_mode=const1),  # [bu;br;bh]
            pl.BlockSpec((None, k, f), lambda j: (j, 0, 0)),                   # X_sel[j]
            pl.BlockSpec((None, k, 1), lambda j: (j, 0, 0)),                   # s_sel[j]
        ],
        out_specs=pl.BlockSpec((None, f, h), lambda j: (j, 0, 0)),
        scratch_shapes=[pltpu.VMEM((f, h), jnp.float32)],
        compiler_params=pltpu.CompilerParams(
            dimension_semantics=("arbitrary",)
        ),
    )(w0.astype(jnp.float32),
      lp["W_all"].astype(MXU_DTYPE),
      lp["U_ur"].astype(MXU_DTYPE),
      lp["U_h"].astype(MXU_DTYPE),
      lp["b_all"].astype(jnp.float32),
      x_sel.astype(MXU_DTYPE),
      s_sel.astype(jnp.float32))


# ---------------------------------------------------------------------------
# Kernel 3: Y = X @ W_seq   (hoisted out of the GCN contraction loop), bf16 out
# ---------------------------------------------------------------------------
def _xw_kernel(x_ref, w_ref, out_ref):
    out_ref[...] = jnp.dot(
        x_ref[...], w_ref[...], preferred_element_type=jnp.float32
    ).astype(out_ref.dtype)


def xw_batched(feats_bf, w_seq_bf):
    t, n_pad, f = feats_bf.shape
    h = w_seq_bf.shape[-1]
    tm = _pick_row_tile(n_pad, t)
    return pl.pallas_call(
        _xw_kernel,
        out_shape=jax.ShapeDtypeStruct((t, n_pad, h), MXU_DTYPE),
        grid=(t, n_pad // tm),
        in_specs=[
            pl.BlockSpec((None, tm, f), lambda j, i: (j, i, 0)),
            pl.BlockSpec((None, f, h), lambda j, i: (j, 0, 0)),
        ],
        out_specs=pl.BlockSpec((None, tm, h), lambda j, i: (j, i, 0)),
        compiler_params=pltpu.CompilerParams(
            dimension_semantics=("parallel", "parallel")
        ),
    )(feats_bf, w_seq_bf)


# ---------------------------------------------------------------------------
# Kernel 4: batched, tiled GraphConv aggregation + RReLU(eval)
#   out[j] = rrelu( A_hat[j] @ Y[j] )     with Y = X @ W precomputed (bf16)
#   grid = (graphs, row-tiles, contraction-tiles), f32 accumulator scratch.
#   Intermediate layers additionally fuse the next layer's TopK scoring into
#   the epilogue (lane-dense (T, 1, N_pad) score output).
# ---------------------------------------------------------------------------
def _rrelu(x):
    return jnp.where(x >= 0.0, x, _RRELU_SLOPE * x)


def _gcn_kernel(a_ref, y_ref, out_ref, acc_ref):
    k = pl.program_id(2)

    @pl.when(k == 0)
    def _():
        acc_ref[...] = jnp.zeros_like(acc_ref)

    acc_ref[...] += jnp.dot(a_ref[...], y_ref[...],
                            preferred_element_type=jnp.float32)

    @pl.when(k == pl.num_programs(2) - 1)
    def _():
        out_ref[...] = _rrelu(acc_ref[...]).astype(out_ref.dtype)


def _gcn_score_kernel(scorer_ref, a_ref, y_ref, out_ref, score_ref, acc_ref):
    k = pl.program_id(2)

    @pl.when(k == 0)
    def _():
        acc_ref[...] = jnp.zeros_like(acc_ref)

    acc_ref[...] += jnp.dot(a_ref[...], y_ref[...],
                            preferred_element_type=jnp.float32)

    @pl.when(k == pl.num_programs(2) - 1)
    def _():
        act = _rrelu(acc_ref[...])
        out_ref[...] = act.astype(out_ref.dtype)
        # Fused next-layer TopK scores: (1,H) x (tm,H) contracted on H -> (1,tm)
        score_ref[...] = lax.dot_general(
            scorer_ref[...], act.astype(scorer_ref.dtype), _DN_NT,
            preferred_element_type=jnp.float32)


def graph_conv_batched(a_bf, y_bf, next_scorer_n=None, out_dtype=jnp.float32):
    t, n_pad, _ = a_bf.shape
    h = y_bf.shape[-1]
    tm = _pick_row_tile(n_pad, t)
    tk = _pick_tile(n_pad)

    # Explicit scoped-VMEM limit (v5e default is only 16 MiB); capped at 64 MiB.
    out_isize = jnp.dtype(out_dtype).itemsize
    est = (2 * tm * tk * 2      # A tiles, double buffered, bf16
           + 2 * tk * h * 2     # Y tiles
           + 2 * tm * h * out_isize   # out tiles
           + tm * h * 4         # f32 accumulator
           + 2 * tm * 4 + 2 * h * 2)  # score out + scorer
    vmem_limit = min(max(2 * est + (4 << 20), 32 << 20), 64 << 20)

    cparams = pltpu.CompilerParams(
        dimension_semantics=("parallel", "parallel", "arbitrary"),
        vmem_limit_bytes=vmem_limit)
    grid = (t, n_pad // tm, n_pad // tk)
    a_spec = pl.BlockSpec((None, tm, tk), lambda j, i, k: (j, i, k))
    y_spec = pl.BlockSpec((None, tk, h), lambda j, i, k: (j, k, 0))
    out_spec = pl.BlockSpec((None, tm, h), lambda j, i, k: (j, i, 0))
    scratch = [pltpu.VMEM((tm, h), jnp.float32)]

    if next_scorer_n is None:
        return pl.pallas_call(
            _gcn_kernel,
            out_shape=jax.ShapeDtypeStruct((t, n_pad, h), out_dtype),
            grid=grid,
            in_specs=[a_spec, y_spec],
            out_specs=out_spec,
            scratch_shapes=scratch,
            compiler_params=cparams,
        )(a_bf, y_bf)

    return pl.pallas_call(
        _gcn_score_kernel,
        out_shape=(jax.ShapeDtypeStruct((t, n_pad, h), out_dtype),
                   jax.ShapeDtypeStruct((t, 1, n_pad), jnp.float32)),
        grid=grid,
        in_specs=[pl.BlockSpec((1, h), lambda j, i, k: (0, 0)),
                  a_spec, y_spec],
        out_specs=(out_spec,
                   pl.BlockSpec((None, 1, tm), lambda j, i, k: (j, 0, i))),
        scratch_shapes=scratch,
        compiler_params=cparams,
    )(next_scorer_n.astype(MXU_DTYPE), a_bf, y_bf)


# ---------------------------------------------------------------------------
# Parameter construction (deterministic, mirrors __init__ shapes; gate weights
# and biases are stored pre-fused as [update; reset; htilda] row-stacks).
# ---------------------------------------------------------------------------
def _xavier_uniform(key, shape):
    fan_out, fan_in = shape[0], shape[1]
    limit = math.sqrt(6.0 / (fan_in + fan_out))
    return jax.random.uniform(key, shape, jnp.float32, -limit, limit)


def init_evolvegcnh_params(key, in_feats, n_hidden, num_layers):
    params = {"gcn_w": [], "layers": []}
    for i in range(num_layers):
        f = in_feats if i == 0 else n_hidden
        keys = jax.random.split(key, 9)
        key = keys[0]
        layer = {
            "scorer": _xavier_uniform(keys[1], (f, 1)),
            # rows stacked as [update; reset; htilda]
            "W_all": jnp.concatenate([_xavier_uniform(keys[2], (f, f)),
                                      _xavier_uniform(keys[3], (f, f)),
                                      _xavier_uniform(keys[4], (f, f))], axis=0),
            "U_ur": jnp.concatenate([_xavier_uniform(keys[5], (f, f)),
                                     _xavier_uniform(keys[6], (f, f))], axis=0),
            "U_h": _xavier_uniform(keys[7], (f, f)),
            # bias is a full (rows, cols) matrix, as in the PyTorch reference
            "b_all": jnp.zeros((3 * f, n_hidden), jnp.float32),
        }
        params["layers"].append(layer)
        params["gcn_w"].append(_xavier_uniform(keys[8], (f, n_hidden)))
    return params


# ---------------------------------------------------------------------------
# EvolveGCN-H forward (batched over the T timestep graphs)
#   a_stack:    (T, N, N)  'both'-normalized dense adjacencies (with self loops)
#   feat_stack: (T, N, F)  node features
# ---------------------------------------------------------------------------
def evolvegcnh_forward(a_stack, feat_stack, params, num_layers, n_hidden):
    t, n, _ = feat_stack.shape
    n_pad = _round_up(n, _LANE)
    if n_pad != n:
        a_stack = jnp.pad(a_stack, ((0, 0), (0, n_pad - n), (0, n_pad - n)))
        feat_stack = jnp.pad(feat_stack, ((0, 0), (0, n_pad - n), (0, 0)))

    a_bf = a_stack.astype(MXU_DTYPE)       # MXU operands are bf16; acc is f32
    feats = feat_stack.astype(MXU_DTYPE)   # intermediate layers stay bf16

    def norm_scorer(sc):
        # NOTE: matches PyTorch (no epsilon); xavier init makes the norm > 0.
        return (sc / jnp.linalg.norm(sc)).T   # (1, F)

    scores_all = None
    for i in range(num_layers):
        lp = params["layers"][i]

        # --- TopK scores: standalone kernel for layer 0, fused into the
        #     previous layer's GCN epilogue for layers > 0.
        if i == 0:
            scores_all = topk_scores_batched(feats, norm_scorer(lp["scorer"]))
        scores_real = scores_all[:, 0, :n]                        # drop pad nodes

        # top-k selection + gather (JAX glue; tie-break order may differ from
        # torch.topk when scores tie).
        _, idx = lax.top_k(scores_real, n_hidden)                 # (T, K)
        x_sel = jnp.take_along_axis(feats, idx[:, :, None], axis=1)        # (T,K,F) bf16
        s_sel = jnp.take_along_axis(scores_real, idx, axis=1)[..., None]   # (T,K,1) f32

        # --- recurrent weight evolution (single grid-carried MatGRU call)
        w_seq = matgru_evolve(params["gcn_w"][i], lp, x_sel, s_sel)   # (T, F, H) bf16

        # --- Y = X @ W_seq (hoisted), then graph convolutions A_hat @ Y
        y = xw_batched(feats, w_seq)                                  # (T, N_pad, H) bf16

        if i + 1 < num_layers:
            nxt_scorer_n = norm_scorer(params["layers"][i + 1]["scorer"])   # (1, H)
            feats, scores_all = graph_conv_batched(
                a_bf, y, nxt_scorer_n, out_dtype=MXU_DTYPE)
        else:
            feats = graph_conv_batched(a_bf, y, None, out_dtype=jnp.float32)

    return feats[-1, :n, :]


# ---------------------------------------------------------------------------
# Demo
# ---------------------------------------------------------------------------
def _make_graph(key, n):
    """Random symmetric adjacency with self-loops, 'both'-normalized."""
    a = (jax.random.uniform(key, (n, n)) < 0.2).astype(jnp.float32)
    a = jnp.maximum(a, a.T)
    a = jnp.maximum(a, jnp.eye(n, dtype=jnp.float32))
    deg = jnp.sum(a, axis=1)
    d_inv_sqrt = 1.0 / jnp.sqrt(deg)
    return d_inv_sqrt[:, None] * a * d_inv_sqrt[None, :]


if __name__ == "__main__":
    # Aligned feature/hidden sizes (multiples of 128) so the MXU and lane-dense
    # store paths are actually exercised; N=200 exercises the padding path.
    in_feats, n_hidden, num_layers = 128, 128, 2
    num_graphs, n_nodes = 3, 200

    root = jax.random.PRNGKey(0)
    k_params, k_graphs, k_feats = jax.random.split(root, 3)

    params = init_evolvegcnh_params(k_params, in_feats, n_hidden, num_layers)

    gkeys = jax.random.split(k_graphs, num_graphs)
    fkeys = jax.random.split(k_feats, num_graphs)
    a_stack = jnp.stack([_make_graph(gkeys[t], n_nodes) for t in range(num_graphs)])
    feat_stack = jnp.stack(
        [jax.random.normal(fkeys[t], (n_nodes, in_feats), jnp.float32)
         for t in range(num_graphs)])

    fwd = jax.jit(evolvegcnh_forward, static_argnums=(3, 4))
    out = fwd(a_stack, feat_stack, params, num_layers, n_hidden)
    out = jax.block_until_ready(out)

    assert out.shape == (n_nodes, n_hidden)
    assert bool(jnp.all(jnp.isfinite(out)))
    print("KERNEL_OK")
</pallas_src>

<mosaic_0001>
module attributes {stable_mosaic.version = 11 : i64} {
  func.func @_score_kernel(%arg0: i32, %arg1: i32, %arg2: memref<1x128xbf16, #tpu.memory_space<vmem>>, %arg3: memref<1x256x128xbf16, #tpu.memory_space<vmem>>, %arg4: memref<1x1x256xf32, #tpu.memory_space<vmem>>) attributes {dimension_semantics = [#tpu.dimension_semantics<parallel>, #tpu.dimension_semantics<parallel>], iteration_bounds = array<i64: 3, 1>, scalar_prefetch = 0 : i64, scratch_operands = 0 : i64, tpu.core_type = #tpu.core_type<tc>, window_params = [{pipeline_mode = #tpu.pipeline_mode<synchronous>, transform_indices = @transform_0, window_bounds = array<i64: 1, 128>}, {transform_indices = @transform_1, window_bounds = array<i64: 1, 256, 128>}, {transform_indices = @transform_2, window_bounds = array<i64: 1, 1, 256>}]} {
    %c0 = arith.constant 0 : index
    %c0_0 = arith.constant 0 : index
    %0 = vector.load %arg2[%c0, %c0_0] : memref<1x128xbf16, #tpu.memory_space<vmem>>, vector<1x128xbf16>
    %c0_1 = arith.constant 0 : index
    %c0_2 = arith.constant 0 : index
    %c0_3 = arith.constant 0 : index
    %1 = vector.load %arg3[%c0_1, %c0_2, %c0_3] : memref<1x256x128xbf16, #tpu.memory_space<vmem>>, vector<1x256x128xbf16>
    %2 = vector.shape_cast %1 : vector<1x256x128xbf16> to vector<256x128xbf16>
    %cst = arith.constant dense<0.000000e+00> : vector<1x256xf32>
    %3 = tpu.matmul %0, %2, %cst {dimension_numbers = #tpu.dot_dimension_numbers<[1], [1], [0], [0], [0, 0, 1, 0], [], []>} : vector<1x128xbf16>, vector<256x128xbf16>, vector<1x256xf32> -> vector<1x256xf32>
    %c0_4 = arith.constant 0 : index
    %c0_5 = arith.constant 0 : index
    %c0_6 = arith.constant 0 : index
    %4 = vector.load %arg4[%c0_4, %c0_5, %c0_6] : memref<1x1x256xf32, #tpu.memory_space<vmem>>, vector<1x1x256xf32>
    %5 = vector.shape_cast %4 : vector<1x1x256xf32> to vector<1x256xf32>
    %6 = vector.shape_cast %3 : vector<1x256xf32> to vector<1x1x256xf32>
    tpu.vector_store %arg4[%c0_4, %c0_5, %c0_6], %6 {strides = array<i32>} : memref<1x1x256xf32, #tpu.memory_space<vmem>>, vector<1x1x256xf32>,
    return
  }
  func.func @transform_0(%arg0: i32, %arg1: i32) -> (i32, i32) {
    %c0_i32 = arith.constant 0 : i32
    %c0_i32_0 = arith.constant 0 : i32
    %c0_i32_1 = arith.constant 0 : i32
    return %c0_i32, %c0_i32_0 : i32, i32
  }
  func.func @transform_1(%arg0: i32, %arg1: i32) -> (i32, i32, i32) {
    %c0_i32 = arith.constant 0 : i32
    %c0_i32_0 = arith.constant 0 : i32
    return %arg0, %arg1, %c0_i32 : i32, i32, i32
  }
  func.func @transform_2(%arg0: i32, %arg1: i32) -> (i32, i32, i32) {
    %c0_i32 = arith.constant 0 : i32
    %c0_i32_0 = arith.constant 0 : i32
    return %arg0, %c0_i32, %arg1 : i32, i32, i32
  }
}

module attributes {stable_mosaic.version = 11 : i64} {
  func.func @_xw_kernel(%arg0: i32, %arg1: i32, %arg2: memref<1x128x128xbf16, #tpu.memory_space<vmem>>, %arg3: memref<1x128x128xbf16, #tpu.memory_space<vmem>>, %arg4: memref<1x128x128xbf16, #tpu.memory_space<vmem>>) attributes {dimension_semantics = [#tpu.dimension_semantics<parallel>, #tpu.dimension_semantics<parallel>], iteration_bounds = array<i64: 3, 2>, scalar_prefetch = 0 : i64, scratch_operands = 0 : i64, tpu.core_type = #tpu.core_type<tc>, window_params = [{transform_indices = @transform_0, window_bounds = array<i64: 1, 128, 128>}, {transform_indices = @transform_1, window_bounds = array<i64: 1, 128, 128>}, {transform_indices = @transform_2, window_bounds = array<i64: 1, 128, 128>}]} {
    %c0 = arith.constant 0 : index
    %c0_0 = arith.constant 0 : index
    %c0_1 = arith.constant 0 : index
    %0 = vector.load %arg2[%c0, %c0_0, %c0_1] : memref<1x128x128xbf16, #tpu.memory_space<vmem>>, vector<1x128x128xbf16>
    %1 = vector.shape_cast %0 : vector<1x128x128xbf16> to vector<128x128xbf16>
    %c0_2 = arith.constant 0 : index
    %c0_3 = arith.constant 0 : index
    %c0_4 = arith.constant 0 : index
    %2 = vector.load %arg3[%c0_2, %c0_3, %c0_4] : memref<1x128x128xbf16, #tpu.memory_space<vmem>>, vector<1x128x128xbf16>
    %3 = vector.shape_cast %2 : vector<1x128x128xbf16> to vector<128x128xbf16>
    %cst = arith.constant dense<0.000000e+00> : vector<128x128xf32>
    %4 = tpu.matmul %1, %3, %cst {dimension_numbers = #tpu.dot_dimension_numbers<[1], [0], [0], [1], [0, 0, 1, 1], [], []>} : vector<128x128xbf16>, vector<128x128xbf16>, vector<128x128xf32> -> vector<128x128xf32>
    %5 = arith.truncf %4 : vector<128x128xf32> to vector<128x128xbf16>
    %c0_5 = arith.constant 0 : index
    %c0_6 = arith.constant 0 : index
    %c0_7 = arith.constant 0 : index
    %6 = vector.load %arg4[%c0_5, %c0_6, %c0_7] : memref<1x128x128xbf16, #tpu.memory_space<vmem>>, vector<1x128x128xbf16>
    %7 = vector.shape_cast %6 : vector<1x128x128xbf16> to vector<128x128xbf16>
    %8 = vector.shape_cast %5 : vector<128x128xbf16> to vector<1x128x128xbf16>
    tpu.vector_store %arg4[%c0_5, %c0_6, %c0_7], %8 {strides = array<i32>} : memref<1x128x128xbf16, #tpu.memory_space<vmem>>, vector<1x128x128xbf16>,
    return
  }
  func.func @transform_0(%arg0: i32, %arg1: i32) -> (i32, i32, i32) {
    %c0_i32 = arith.constant 0 : i32
    %c0_i32_0 = arith.constant 0 : i32
    return %arg0, %arg1, %c0_i32 : i32, i32, i32
  }
  func.func @transform_1(%arg0: i32, %arg1: i32) -> (i32, i32, i32) {
    %c0_i32 = arith.constant 0 : i32
    %c0_i32_0 = arith.constant 0 : i32
    %c0_i32_1 = arith.constant 0 : i32
    return %arg0, %c0_i32, %c0_i32_0 : i32, i32, i32
  }
  func.func @transform_2(%arg0: i32, %arg1: i32) -> (i32, i32, i32) {
    %c0_i32 = arith.constant 0 : i32
    %c0_i32_0 = arith.constant 0 : i32
    return %arg0, %arg1, %c0_i32 : i32, i32, i32
  }
}

module attributes {stable_mosaic.version = 11 : i64} {
  func.func @_matgru_kernel(%arg0: i32, %arg1: memref<128x128xf32, #tpu.memory_space<vmem>>, %arg2: memref<384x128xbf16, #tpu.memory_space<vmem>>, %arg3: memref<256x128xbf16, #tpu.memory_space<vmem>>, %arg4: memref<128x128xbf16, #tpu.memory_space<vmem>>, %arg5: memref<384x128xf32, #tpu.memory_space<vmem>>, %arg6: memref<1x128x128xbf16, #tpu.memory_space<vmem>>, %arg7: memref<1x128x1xf32, #tpu.memory_space<vmem>>, %arg8: memref<1x128x128xbf16, #tpu.memory_space<vmem>>, %arg9: memref<128x128xf32, #tpu.memory_space<vmem>>) attributes {dimension_semantics = [#tpu.dimension_semantics<arbitrary>], iteration_bounds = array<i64: 3>, scalar_prefetch = 0 : i64, scratch_operands = 1 : i64, tpu.core_type = #tpu.core_type<tc>, window_params = [{pipeline_mode = #tpu.pipeline_mode<synchronous>, transform_indices = @transform_0, window_bounds = array<i64: 128, 128>}, {pipeline_mode = #tpu.pipeline_mode<synchronous>, transform_indices = @transform_1, window_bounds = array<i64: 384, 128>}, {pipeline_mode = #tpu.pipeline_mode<synchronous>, transform_indices = @transform_2, window_bounds = array<i64: 256, 128>}, {pipeline_mode = #tpu.pipeline_mode<synchronous>, transform_indices = @transform_3, window_bounds = array<i64: 128, 128>}, {pipeline_mode = #tpu.pipeline_mode<synchronous>, transform_indices = @transform_4, window_bounds = array<i64: 384, 128>}, {transform_indices = @transform_5, window_bounds = array<i64: 1, 128, 128>}, {transform_indices = @transform_6, window_bounds = array<i64: 1, 128, 1>}, {transform_indices = @transform_7, window_bounds = array<i64: 1, 128, 128>}]} {
    %c0_i32 = arith.constant 0 : i32
    %0 = arith.cmpi eq, %arg0, %c0_i32 : i32
    %1 = arith.extui %0 : i1 to i32
    %c0_i32_0 = arith.constant 0 : i32
    %2 = arith.cmpi ne, %1, %c0_i32_0 : i32
    scf.if %2 {
      %c0_26 = arith.constant 0 : index
      %c0_27 = arith.constant 0 : index
      %58 = vector.load %arg1[%c0_26, %c0_27] : memref<128x128xf32, #tpu.memory_space<vmem>>, vector<128x128xf32>
      %c0_28 = arith.constant 0 : index
      %c0_29 = arith.constant 0 : index
      %59 = vector.load %arg9[%c0_28, %c0_29] : memref<128x128xf32, #tpu.memory_space<vmem>>, vector<128x128xf32>
      tpu.vector_store %arg9[%c0_28, %c0_29], %58 {strides = array<i32>} : memref<128x128xf32, #tpu.memory_space<vmem>>, vector<128x128xf32>,
    } else {
    }
    %c0 = arith.constant 0 : index
    %c0_1 = arith.constant 0 : index
    %3 = vector.load %arg9[%c0, %c0_1] : memref<128x128xf32, #tpu.memory_space<vmem>>, vector<128x128xf32>
    %4 = arith.truncf %3 : vector<128x128xf32> to vector<128x128xbf16>
    %c0_2 = arith.constant 0 : index
    %c0_3 = arith.constant 0 : index
    %c0_4 = arith.constant 0 : index
    %5 = vector.load %arg6[%c0_2, %c0_3, %c0_4] : memref<1x128x128xbf16, #tpu.memory_space<vmem>>, vector<1x128x128xbf16>
    %6 = vector.shape_cast %5 : vector<1x128x128xbf16> to vector<128x128xbf16>
    %7 = arith.extf %6 : vector<128x128xbf16> to vector<128x128xf32>
    %c0_5 = arith.constant 0 : index
    %c0_6 = arith.constant 0 : index
    %c0_7 = arith.constant 0 : index
    %8 = vector.load %arg7[%c0_5, %c0_6, %c0_7] : memref<1x128x1xf32, #tpu.memory_space<vmem>>, vector<1x128x1xf32>
    %9 = vector.shape_cast %8 : vector<1x128x1xf32> to vector<128x1xf32>
    %10 = math.tanh %9 : vector<128x1xf32>
    %11 = vector.broadcast %10 : vector<128x1xf32> to vector<128x128xf32>
    %12 = arith.mulf %7, %11 : vector<128x128xf32>
    %13 = arith.truncf %12 : vector<128x128xf32> to vector<128x128xbf16>
    %c0_8 = arith.constant 0 : index
    %c0_9 = arith.constant 0 : index
    %14 = vector.load %arg2[%c0_8, %c0_9] : memref<384x128xbf16, #tpu.memory_space<vmem>>, vector<384x128xbf16>
    %cst = arith.constant dense<0.000000e+00> : vector<384x128xf32>
    %15 = tpu.matmul %14, %13, %cst {dimension_numbers = #tpu.dot_dimension_numbers<[1], [1], [0], [0], [0, 0, 1, 0], [], []>} : vector<384x128xbf16>, vector<128x128xbf16>, vector<384x128xf32> -> vector<384x128xf32>
    %c0_10 = arith.constant 0 : index
    %c0_11 = arith.constant 0 : index
    %16 = vector.load %arg3[%c0_10, %c0_11] : memref<256x128xbf16, #tpu.memory_space<vmem>>, vector<256x128xbf16>
    %cst_12 = arith.constant dense<0.000000e+00> : vector<256x128xf32>
    %17 = tpu.matmul %16, %4, %cst_12 {dimension_numbers = #tpu.dot_dimension_numbers<[1], [0], [0], [1], [0, 0, 1, 1], [], []>} : vector<256x128xbf16>, vector<128x128xbf16>, vector<256x128xf32> -> vector<256x128xf32>
    %c0_13 = arith.constant 0 : index
    %c0_14 = arith.constant 0 : index
    %18 = vector.load %arg5[%c0_13, %c0_14] : memref<384x128xf32, #tpu.memory_space<vmem>>, vector<384x128xf32>
    %19 = vector.extract_strided_slice %15 {offsets = [0, 0], sizes = [128, 128], strides = [1, 1]} : vector<384x128xf32> to vector<128x128xf32>
    %20 = vector.extract_strided_slice %17 {offsets = [0, 0], sizes = [128, 128], strides = [1, 1]} : vector<256x128xf32> to vector<128x128xf32>
    %21 = arith.addf %19, %20 : vector<128x128xf32>
    %22 = vector.extract_strided_slice %18 {offsets = [0, 0], sizes = [128, 128], strides = [1, 1]} : vector<384x128xf32> to vector<128x128xf32>
    %23 = arith.addf %21, %22 : vector<128x128xf32>
    %24 = arith.negf %23 : vector<128x128xf32>
    %25 = math.exp %24 : vector<128x128xf32>
    %cst_15 = arith.constant 1.000000e+00 : f32
    %26 = vector.broadcast %cst_15 : f32 to vector<128x128xf32>
    %27 = arith.addf %26, %25 : vector<128x128xf32>
    %28 = arith.divf %26, %27 : vector<128x128xf32>
    %29 = vector.extract_strided_slice %15 {offsets = [128, 0], sizes = [128, 128], strides = [1, 1]} : vector<384x128xf32> to vector<128x128xf32>
    %30 = vector.extract_strided_slice %17 {offsets = [128, 0], sizes = [128, 128], strides = [1, 1]} : vector<256x128xf32> to vector<128x128xf32>
    %31 = arith.addf %29, %30 : vector<128x128xf32>
    %32 = vector.extract_strided_slice %18 {offsets = [128, 0], sizes = [128, 128], strides = [1, 1]} : vector<384x128xf32> to vector<128x128xf32>
    %33 = arith.addf %31, %32 : vector<128x128xf32>
    %34 = arith.negf %33 : vector<128x128xf32>
    %35 = math.exp %34 : vector<128x128xf32>
    %cst_16 = arith.constant 1.000000e+00 : f32
    %36 = vector.broadcast %cst_16 : f32 to vector<128x128xf32>
    %37 = arith.addf %36, %35 : vector<128x128xf32>
    %38 = arith.divf %36, %37 : vector<128x128xf32>
    %39 = arith.mulf %38, %3 : vector<128x128xf32>
    %40 = arith.truncf %39 : vector<128x128xf32> to vector<128x128xbf16>
    %c0_17 = arith.constant 0 : index
    %c0_18 = arith.constant 0 : index
    %41 = vector.load %arg4[%c0_17, %c0_18] : memref<128x128xbf16, #tpu.memory_space<vmem>>, vector<128x128xbf16>
    %cst_19 = arith.constant dense<0.000000e+00> : vector<128x128xf32>
    %42 = tpu.matmul %41, %40, %cst_19 {dimension_numbers = #tpu.dot_dimension_numbers<[1], [0], [0], [1], [0, 0, 1, 1], [], []>} : vector<128x128xbf16>, vector<128x128xbf16>, vector<128x128xf32> -> vector<128x128xf32>
    %43 = vector.extract_strided_slice %15 {offsets = [256, 0], sizes = [128, 128], strides = [1, 1]} : vector<384x128xf32> to vector<128x128xf32>
    %44 = arith.addf %43, %42 : vector<128x128xf32>
    %45 = vector.extract_strided_slice %18 {offsets = [256, 0], sizes = [128, 128], strides = [1, 1]} : vector<384x128xf32> to vector<128x128xf32>
    %46 = arith.addf %44, %45 : vector<128x128xf32>
    %47 = math.tanh %46 : vector<128x128xf32>
    %cst_20 = arith.constant 1.000000e+00 : f32
    %48 = vector.broadcast %cst_20 : f32 to vector<128x128xf32>
    %49 = arith.subf %48, %28 : vector<128x128xf32>
    %50 = arith.mulf %49, %3 : vector<128x128xf32>
    %51 = arith.mulf %28, %47 : vector<128x128xf32>
    %52 = arith.addf %50, %51 : vector<128x128xf32>
    %c0_21 = arith.constant 0 : index
    %c0_22 = arith.constant 0 : index
    %53 = vector.load %arg9[%c0_21, %c0_22] : memref<128x128xf32, #tpu.memory_space<vmem>>, vector<128x128xf32>
    tpu.vector_store %arg9[%c0_21, %c0_22], %52 {strides = array<i32>} : memref<128x128xf32, #tpu.memory_space<vmem>>, vector<128x128xf32>,
    %54 = arith.truncf %52 : vector<128x128xf32> to vector<128x128xbf16>
    %c0_23 = arith.constant 0 : index
    %c0_24 = arith.constant 0 : index
    %c0_25 = arith.constant 0 : index
    %55 = vector.load %arg8[%c0_23, %c0_24, %c0_25] : memref<1x128x128xbf16, #tpu.memory_space<vmem>>, vector<1x128x128xbf16>
    %56 = vector.shape_cast %55 : vector<1x128x128xbf16> to vector<128x128xbf16>
    %57 = vector.shape_cast %54 : vector<128x128xbf16> to vector<1x128x128xbf16>
    tpu.vector_store %arg8[%c0_23, %c0_24, %c0_25], %57 {strides = array<i32>} : memref<1x128x128xbf16, #tpu.memory_space<vmem>>, vector<1x128x128xbf16>,
    return
  }
  func.func @transform_0(%arg0: i32) -> (i32, i32) {
    %c0_i32 = arith.constant 0 : i32
    %c0_i32_0 = arith.constant 0 : i32
    %c0_i32_1 = arith.constant 0 : i32
    return %c0_i32, %c0_i32_0 : i32, i32
  }
  func.func @transform_1(%arg0: i32) -> (i32, i32) {
    %c0_i32 = arith.constant 0 : i32
    %c0_i32_0 = arith.constant 0 : i32
    %c0_i32_1 = arith.constant 0 : i32
    return %c0_i32, %c0_i32_0 : i32, i32
  }
  func.func @transform_2(%arg0: i32) -> (i32, i32) {
    %c0_i32 = arith.constant 0 : i32
    %c0_i32_0 = arith.constant 0 : i32
    %c0_i32_1 = arith.constant 0 : i32
    return %c0_i32, %c0_i32_0 : i32, i32
  }
  func.func @transform_3(%arg0: i32) -> (i32, i32) {
    %c0_i32 = arith.constant 0 : i32
    %c0_i32_0 = arith.constant 0 : i32
    %c0_i32_1 = arith.constant 0 : i32
    return %c0_i32, %c0_i32_0 : i32, i32
  }
  func.func @transform_4(%arg0: i32) -> (i32, i32) {
    %c0_i32 = arith.constant 0 : i32
    %c0_i32_0 = arith.constant 0 : i32
    %c0_i32_1 = arith.constant 0 : i32
    return %c0_i32, %c0_i32_0 : i32, i32
  }
  func.func @transform_5(%arg0: i32) -> (i32, i32, i32) {
    %c0_i32 = arith.constant 0 : i32
    %c0_i32_0 = arith.constant 0 : i32
    %c0_i32_1 = arith.constant 0 : i32
    return %arg0, %c0_i32, %c0_i32_0 : i32, i32, i32
  }
  func.func @transform_6(%arg0: i32) -> (i32, i32, i32) {
    %c0_i32 = arith.constant 0 : i32
    %c0_i32_0 = arith.constant 0 : i32
    %c0_i32_1 = arith.constant 0 : i32
    return %arg0, %c0_i32, %c0_i32_0 : i32, i32, i32
  }
  func.func @transform_7(%arg0: i32) -> (i32, i32, i32) {
    %c0_i32 = arith.constant 0 : i32
    %c0_i32_0 = arith.constant 0 : i32
    %c0_i32_1 = arith.constant 0 : i32
    return %arg0, %c0_i32, %c0_i32_0 : i32, i32, i32
  }
}

module attributes {stable_mosaic.version = 11 : i64} {
  func.func @_gcn_score_kernel(%arg0: i32, %arg1: i32, %arg2: i32, %arg3: memref<1x128xbf16, #tpu.memory_space<vmem>>, %arg4: memref<1x128x256xbf16, #tpu.memory_space<vmem>>, %arg5: memref<1x256x128xbf16, #tpu.memory_space<vmem>>, %arg6: memref<1x128x128xbf16, #tpu.memory_space<vmem>>, %arg7: memref<1x1x128xf32, #tpu.memory_space<vmem>>, %arg8: memref<128x128xf32, #tpu.memory_space<vmem>>) attributes {dimension_semantics = [#tpu.dimension_semantics<parallel>, #tpu.dimension_semantics<parallel>, #tpu.dimension_semantics<arbitrary>], iteration_bounds = array<i64: 3, 2, 1>, scalar_prefetch = 0 : i64, scratch_operands = 1 : i64, tpu.core_type = #tpu.core_type<tc>, window_params = [{pipeline_mode = #tpu.pipeline_mode<synchronous>, transform_indices = @transform_0, window_bounds = array<i64: 1, 128>}, {transform_indices = @transform_1, window_bounds = array<i64: 1, 128, 256>}, {transform_indices = @transform_2, window_bounds = array<i64: 1, 256, 128>}, {transform_indices = @transform_3, window_bounds = array<i64: 1, 128, 128>}, {transform_indices = @transform_4, window_bounds = array<i64: 1, 1, 128>}]} {
    %c0_i32 = arith.constant 0 : i32
    %0 = arith.cmpi eq, %arg2, %c0_i32 : i32
    %1 = arith.extui %0 : i1 to i32
    %c0_i32_0 = arith.constant 0 : i32
    %2 = arith.cmpi ne, %1, %c0_i32_0 : i32
    scf.if %2 {
      %cst_12 = arith.constant 0.000000e+00 : f32
      %14 = vector.broadcast %cst_12 : f32 to vector<128x128xf32>
      %c0_13 = arith.constant 0 : index
      %c0_14 = arith.constant 0 : index
      %15 = vector.load %arg8[%c0_13, %c0_14] : memref<128x128xf32, #tpu.memory_space<vmem>>, vector<128x128xf32>
      tpu.vector_store %arg8[%c0_13, %c0_14], %14 {strides = array<i32>} : memref<128x128xf32, #tpu.memory_space<vmem>>, vector<128x128xf32>,
    } else {
    }
    %c0 = arith.constant 0 : index
    %c0_1 = arith.constant 0 : index
    %3 = vector.load %arg8[%c0, %c0_1] : memref<128x128xf32, #tpu.memory_space<vmem>>, vector<128x128xf32>
    %c0_2 = arith.constant 0 : index
    %c0_3 = arith.constant 0 : index
    %c0_4 = arith.constant 0 : index
    %4 = vector.load %arg4[%c0_2, %c0_3, %c0_4] : memref<1x128x256xbf16, #tpu.memory_space<vmem>>, vector<1x128x256xbf16>
    %5 = vector.shape_cast %4 : vector<1x128x256xbf16> to vector<128x256xbf16>
    %c0_5 = arith.constant 0 : index
    %c0_6 = arith.constant 0 : index
    %c0_7 = arith.constant 0 : index
    %6 = vector.load %arg5[%c0_5, %c0_6, %c0_7] : memref<1x256x128xbf16, #tpu.memory_space<vmem>>, vector<1x256x128xbf16>
    %7 = vector.shape_cast %6 : vector<1x256x128xbf16> to vector<256x128xbf16>
    %cst = arith.constant dense<0.000000e+00> : vector<128x128xf32>
    %8 = tpu.matmul %5, %7, %cst {dimension_numbers = #tpu.dot_dimension_numbers<[1], [0], [0], [1], [0, 0, 1, 1], [], []>} : vector<128x256xbf16>, vector<256x128xbf16>, vector<128x128xf32> -> vector<128x128xf32>
    %9 = arith.addf %3, %8 : vector<128x128xf32>
    %c0_8 = arith.constant 0 : index
    %c0_9 = arith.constant 0 : index
    %10 = vector.load %arg8[%c0_8, %c0_9] : memref<128x128xf32, #tpu.memory_space<vmem>>, vector<128x128xf32>
    tpu.vector_store %arg8[%c0_8, %c0_9], %9 {strides = array<i32>} : memref<128x128xf32, #tpu.memory_space<vmem>>, vector<128x128xf32>,
    %c0_i32_10 = arith.constant 0 : i32
    %11 = arith.cmpi eq, %arg2, %c0_i32_10 : i32
    %12 = arith.extui %11 : i1 to i32
    %c0_i32_11 = arith.constant 0 : i32
    %13 = arith.cmpi ne, %12, %c0_i32_11 : i32
    scf.if %13 {
      %c0_12 = arith.constant 0 : index
      %c0_13 = arith.constant 0 : index
      %14 = vector.load %arg8[%c0_12, %c0_13] : memref<128x128xf32, #tpu.memory_space<vmem>>, vector<128x128xf32>
      %cst_14 = arith.constant 0.000000e+00 : f32
      %15 = vector.broadcast %cst_14 : f32 to vector<128x128xf32>
      %16 = arith.cmpf oge, %14, %15 : vector<128x128xf32>
      %cst_15 = arith.constant 0.229166672 : f32
      %17 = vector.broadcast %cst_15 : f32 to vector<128x128xf32>
      %18 = arith.mulf %17, %14 : vector<128x128xf32>
      %19 = arith.select %16, %14, %18 : vector<128x128xi1>, vector<128x128xf32>
      %20 = arith.truncf %19 : vector<128x128xf32> to vector<128x128xbf16>
      %c0_16 = arith.constant 0 : index
      %c0_17 = arith.constant 0 : index
      %c0_18 = arith.constant 0 : index
      %21 = vector.load %arg6[%c0_16, %c0_17, %c0_18] : memref<1x128x128xbf16, #tpu.memory_space<vmem>>, vector<1x128x128xbf16>
      %22 = vector.shape_cast %21 : vector<1x128x128xbf16> to vector<128x128xbf16>
      %23 = vector.shape_cast %20 : vector<128x128xbf16> to vector<1x128x128xbf16>
      tpu.vector_store %arg6[%c0_16, %c0_17, %c0_18], %23 {strides = array<i32>} : memref<1x128x128xbf16, #tpu.memory_space<vmem>>, vector<1x128x128xbf16>,
      %c0_19 = arith.constant 0 : index
      %c0_20 = arith.constant 0 : index
      %24 = vector.load %arg3[%c0_19, %c0_20] : memref<1x128xbf16, #tpu.memory_space<vmem>>, vector<1x128xbf16>
      %25 = arith.truncf %19 : vector<128x128xf32> to vector<128x128xbf16>
      %cst_21 = arith.constant dense<0.000000e+00> : vector<1x128xf32>
      %26 = tpu.matmul %24, %25, %cst_21 {dimension_numbers = #tpu.dot_dimension_numbers<[1], [1], [0], [0], [0, 0, 1, 0], [], []>} : vector<1x128xbf16>, vector<128x128xbf16>, vector<1x128xf32> -> vector<1x128xf32>
      %c0_22 = arith.constant 0 : index
      %c0_23 = arith.constant 0 : index
      %c0_24 = arith.constant 0 : index
      %27 = vector.load %arg7[%c0_22, %c0_23, %c0_24] : memref<1x1x128xf32, #tpu.memory_space<vmem>>, vector<1x1x128xf32>
      %28 = vector.shape_cast %27 : vector<1x1x128xf32> to vector<1x128xf32>
      %29 = vector.shape_cast %26 : vector<1x128xf32> to vector<1x1x128xf32>
      tpu.vector_store %arg7[%c0_22, %c0_23, %c0_24], %29 {strides = array<i32>} : memref<1x1x128xf32, #tpu.memory_space<vmem>>, vector<1x1x128xf32>,
    } else {
    }
    return
  }
  func.func @transform_0(%arg0: i32, %arg1: i32, %arg2: i32) -> (i32, i32) {
    %c0_i32 = arith.constant 0 : i32
    %c0_i32_0 = arith.constant 0 : i32
    %c0_i32_1 = arith.constant 0 : i32
    return %c0_i32, %c0_i32_0 : i32, i32
  }
  func.func @transform_1(%arg0: i32, %arg1: i32, %arg2: i32) -> (i32, i32, i32) {
    %c0_i32 = arith.constant 0 : i32
    return %arg0, %arg1, %arg2 : i32, i32, i32
  }
  func.func @transform_2(%arg0: i32, %arg1: i32, %arg2: i32) -> (i32, i32, i32) {
    %c0_i32 = arith.constant 0 : i32
    %c0_i32_0 = arith.constant 0 : i32
    return %arg0, %arg2, %c0_i32 : i32, i32, i32
  }
  func.func @transform_3(%arg0: i32, %arg1: i32, %arg2: i32) -> (i32, i32, i32) {
    %c0_i32 = arith.constant 0 : i32
    %c0_i32_0 = arith.constant 0 : i32
    return %arg0, %arg1, %c0_i32 : i32, i32, i32
  }
  func.func @transform_4(%arg0: i32, %arg1: i32, %arg2: i32) -> (i32, i32, i32) {
    %c0_i32 = arith.constant 0 : i32
    %c0_i32_0 = arith.constant 0 : i32
    return %arg0, %c0_i32, %arg1 : i32, i32, i32
  }
}

module attributes {stable_mosaic.version = 11 : i64} {
  func.func @_gcn_kernel(%arg0: i32, %arg1: i32, %arg2: i32, %arg3: memref<1x128x256xbf16, #tpu.memory_space<vmem>>, %arg4: memref<1x256x128xbf16, #tpu.memory_space<vmem>>, %arg5: memref<1x128x128xf32, #tpu.memory_space<vmem>>, %arg6: memref<128x128xf32, #tpu.memory_space<vmem>>) attributes {dimension_semantics = [#tpu.dimension_semantics<parallel>, #tpu.dimension_semantics<parallel>, #tpu.dimension_semantics<arbitrary>], iteration_bounds = array<i64: 3, 2, 1>, scalar_prefetch = 0 : i64, scratch_operands = 1 : i64, tpu.core_type = #tpu.core_type<tc>, window_params = [{transform_indices = @transform_0, window_bounds = array<i64: 1, 128, 256>}, {transform_indices = @transform_1, window_bounds = array<i64: 1, 256, 128>}, {transform_indices = @transform_2, window_bounds = array<i64: 1, 128, 128>}]} {
    %c0_i32 = arith.constant 0 : i32
    %0 = arith.cmpi eq, %arg2, %c0_i32 : i32
    %1 = arith.extui %0 : i1 to i32
    %c0_i32_0 = arith.constant 0 : i32
    %2 = arith.cmpi ne, %1, %c0_i32_0 : i32
    scf.if %2 {
      %cst_12 = arith.constant 0.000000e+00 : f32
      %14 = vector.broadcast %cst_12 : f32 to vector<128x128xf32>
      %c0_13 = arith.constant 0 : index
      %c0_14 = arith.constant 0 : index
      %15 = vector.load %arg6[%c0_13, %c0_14] : memref<128x128xf32, #tpu.memory_space<vmem>>, vector<128x128xf32>
      tpu.vector_store %arg6[%c0_13, %c0_14], %14 {strides = array<i32>} : memref<128x128xf32, #tpu.memory_space<vmem>>, vector<128x128xf32>,
    } else {
    }
    %c0 = arith.constant 0 : index
    %c0_1 = arith.constant 0 : index
    %3 = vector.load %arg6[%c0, %c0_1] : memref<128x128xf32, #tpu.memory_space<vmem>>, vector<128x128xf32>
    %c0_2 = arith.constant 0 : index
    %c0_3 = arith.constant 0 : index
    %c0_4 = arith.constant 0 : index
    %4 = vector.load %arg3[%c0_2, %c0_3, %c0_4] : memref<1x128x256xbf16, #tpu.memory_space<vmem>>, vector<1x128x256xbf16>
    %5 = vector.shape_cast %4 : vector<1x128x256xbf16> to vector<128x256xbf16>
    %c0_5 = arith.constant 0 : index
    %c0_6 = arith.constant 0 : index
    %c0_7 = arith.constant 0 : index
    %6 = vector.load %arg4[%c0_5, %c0_6, %c0_7] : memref<1x256x128xbf16, #tpu.memory_space<vmem>>, vector<1x256x128xbf16>
    %7 = vector.shape_cast %6 : vector<1x256x128xbf16> to vector<256x128xbf16>
    %cst = arith.constant dense<0.000000e+00> : vector<128x128xf32>
    %8 = tpu.matmul %5, %7, %cst {dimension_numbers = #tpu.dot_dimension_numbers<[1], [0], [0], [1], [0, 0, 1, 1], [], []>} : vector<128x256xbf16>, vector<256x128xbf16>, vector<128x128xf32> -> vector<128x128xf32>
    %9 = arith.addf %3, %8 : vector<128x128xf32>
    %c0_8 = arith.constant 0 : index
    %c0_9 = arith.constant 0 : index
    %10 = vector.load %arg6[%c0_8, %c0_9] : memref<128x128xf32, #tpu.memory_space<vmem>>, vector<128x128xf32>
    tpu.vector_store %arg6[%c0_8, %c0_9], %9 {strides = array<i32>} : memref<128x128xf32, #tpu.memory_space<vmem>>, vector<128x128xf32>,
    %c0_i32_10 = arith.constant 0 : i32
    %11 = arith.cmpi eq, %arg2, %c0_i32_10 : i32
    %12 = arith.extui %11 : i1 to i32
    %c0_i32_11 = arith.constant 0 : i32
    %13 = arith.cmpi ne, %12, %c0_i32_11 : i32
    scf.if %13 {
      %c0_12 = arith.constant 0 : index
      %c0_13 = arith.constant 0 : index
      %14 = vector.load %arg6[%c0_12, %c0_13] : memref<128x128xf32, #tpu.memory_space<vmem>>, vector<128x128xf32>
      %cst_14 = arith.constant 0.000000e+00 : f32
      %15 = vector.broadcast %cst_14 : f32 to vector<128x128xf32>
      %16 = arith.cmpf oge, %14, %15 : vector<128x128xf32>
      %cst_15 = arith.constant 0.229166672 : f32
      %17 = vector.broadcast %cst_15 : f32 to vector<128x128xf32>
      %18 = arith.mulf %17, %14 : vector<128x128xf32>
      %19 = arith.select %16, %14, %18 : vector<128x128xi1>, vector<128x128xf32>
      %c0_16 = arith.constant 0 : index
      %c0_17 = arith.constant 0 : index
      %c0_18 = arith.constant 0 : index
      %20 = vector.load %arg5[%c0_16, %c0_17, %c0_18] : memref<1x128x128xf32, #tpu.memory_space<vmem>>, vector<1x128x128xf32>
      %21 = vector.shape_cast %20 : vector<1x128x128xf32> to vector<128x128xf32>
      %22 = vector.shape_cast %19 : vector<128x128xf32> to vector<1x128x128xf32>
      tpu.vector_store %arg5[%c0_16, %c0_17, %c0_18], %22 {strides = array<i32>} : memref<1x128x128xf32, #tpu.memory_space<vmem>>, vector<1x128x128xf32>,
    } else {
    }
    return
  }
  func.func @transform_0(%arg0: i32, %arg1: i32, %arg2: i32) -> (i32, i32, i32) {
    %c0_i32 = arith.constant 0 : i32
    return %arg0, %arg1, %arg2 : i32, i32, i32
  }
  func.func @transform_1(%arg0: i32, %arg1: i32, %arg2: i32) -> (i32, i32, i32) {
    %c0_i32 = arith.constant 0 : i32
    %c0_i32_0 = arith.constant 0 : i32
    return %arg0, %arg2, %c0_i32 : i32, i32, i32
  }
  func.func @transform_2(%arg0: i32, %arg1: i32, %arg2: i32) -> (i32, i32, i32) {
    %c0_i32 = arith.constant 0 : i32
    %c0_i32_0 = arith.constant 0 : i32
    return %arg0, %arg1, %c0_i32 : i32, i32, i32
  }
}

</mosaic_0001>

<bundles_post_ra>
// kernel: evolvegcnh_forward.7
= control target key start
LH: loop header
LB: loop body
LE: loop exit
PB: predicated region body
PF: predicated region fallthrough
CT: control target
= control target key end

     0   :  { %s582_s9 = smov 0   ;;  %s584_s10 = smov 0   ;;  %s622_s0 = inlined_call_operand.vmem [shape: bf16[1,128], index: 0, kind: input, shape index: {}]   ;;  %s623_s1 = inlined_call_operand.vmem [shape: bf16[3,256,128], index: 1, kind: input, shape index: {}]   ;;  %s624_s2 = inlined_call_operand.vmem [shape: f32[3,1,256], index: 2, kind: output, shape index: {}]  }
   0x1   :  { %s586_s11 = smov 0  }
   0x2 LB: > { %s24_s12 = sadd.s32 1, %s561_s10  ;;  %p432_p0 = scmp.ge.s32.totalorder %s565_s11, 1  ;;  %s565_s11 = sphi %s586_s11, %s12_s11   ;;  %s561_s10 = sphi %s584_s10, %s626_s10   ;;  %s557_s9 = sphi %s582_s9, %s625_s9  }
   0x3   : > { %p26_p1 = scmp.ge.s32.totalorder %s24_s12, 3  ;;  %p133_p2 = scmp.lt.s32.totalorder %s565_s11, 4 }
   0x5   : > { %s628_s12 = smov (%p26_p1, %s24_s12), 0  ;;  %p134_p3 = pnand %p432_p0, %p133_p2 }
   0x6   : > { %p163_p4 = scmp.lt.s32.totalorder (!%p134_p3), %s557_s9, 2 }
   0x7   : > { %137 = sbr.rel (%p134_p3) target bundleno = 214 (0xd6), region = 28 }
   0xc   : > { %s630_s9 = smov (!%p163_p4, %s557_s9), 2  ;;  %v181_v16 = vld [vmem:[%s622_s0] sm:$0x1]  ;;  %v342_v17 = vlaneseq  ;;  %vm339_vm0 = vcmask 1040384  }
   0xd   : > { %s502_s13 = sshll.u32 %s630_s9, 7  ;;  %s435_s19 = sshll.u32 %s630_s9, 1 }
   0xe   : > { %s170_s16 = scalar_lea.vmem %s623_s1, %s502_s13  ;;  %s179_s22 = scalar_lea.vmem %s624_s2, %s435_s19  ;;  %vm344_vm1 = vcmp.lt.s32.totalorder %v342_v17, 256 }
   0xf   : > { %v510_v0 = vld [vmem:[%s170_s16 + $0x38] sm:$0xff]  ;;  %v509_v2 = vld [vmem:[%s170_s16 + $0x30] sm:$0xff]  ;;  %v508_v4 = vld [vmem:[%s170_s16 + $0x28] sm:$0xff] }
  0x10   : > { %v518_v1 = vld [vmem:[%s170_s16 + $0x78] sm:$0xff]  ;;  %310 = vmatpush.bf16.xpose.msra.mxu0 %v510_v0  ;;  %v517_v3 = vld [vmem:[%s170_s16 + $0x70] sm:$0xff]  ;;  %v516_v5 = vld [vmem:[%s170_s16 + $0x68] sm:$0xff] }
  0x11   : > { %323 = vmatpush.bf16.xpose.msra.mxu1 %v518_v1  ;;  %v507_v6 = vld [vmem:[%s170_s16 + $0x20] sm:$0xff]  ;;  %v506_v8 = vld [vmem:[%s170_s16 + $0x18] sm:$0xff]  ;;  %v505_v10 = vld [vmem:[%s170_s16 + $0x10] sm:$0xff] }
  0x12   : > { %v515_v7 = vld [vmem:[%s170_s16 + $0x60] sm:$0xff]  ;;  %v514_v9 = vld [vmem:[%s170_s16 + $0x58] sm:$0xff]  ;;  %v513_v11 = vld [vmem:[%s170_s16 + $0x50] sm:$0xff] }
  0x13   : > { %v504_v12 = vld [vmem:[%s170_s16 + $0x8] sm:$0xff]  ;;  %v503_v14 = vld [vmem:[%s170_s16] sm:$0xff] }
  0x14   : > { %v512_v13 = vld [vmem:[%s170_s16 + $0x48] sm:$0xff]  ;;  %v511_v15 = vld [vmem:[%s170_s16 + $0x40] sm:$0xff] }
  0x18   : > { %311 = vmatpush.bf16.xpose.msra.mxu0 %v509_v2 }
  0x19   : > { %324 = vmatpush.bf16.xpose.msra.mxu1 %v517_v3 }
  0x20   : > { %312 = vmatpush.bf16.xpose.msra.mxu0 %v508_v4 }
  0x21   : > { %325 = vmatpush.bf16.xpose.msra.mxu1 %v516_v5 }
  0x28   : > { %313 = vmatpush.bf16.xpose.msra.mxu0 %v507_v6 }
  0x29   : > { %326 = vmatpush.bf16.xpose.msra.mxu1 %v515_v7 }
  0x30   : > { %314 = vmatpush.bf16.xpose.msra.mxu0 %v506_v8 }
  0x31   : > { %327 = vmatpush.bf16.xpose.msra.mxu1 %v514_v9 }
  0x38   : > { %315 = vmatpush.bf16.xpose.msra.mxu0 %v505_v10 }
  0x39   : > { %328 = vmatpush.bf16.xpose.msra.mxu1 %v513_v11 }
  0x40   : > { %316 = vmatpush.bf16.xpose.msra.mxu0 %v504_v12 }
  0x41   : > { %329 = vmatpush.bf16.xpose.msra.mxu1 %v512_v13 }
  0x48   : > { %317 = vmatpush.bf16.xpose.msra.mxu0 %v503_v14 }
  0x49   : > { %330 = vmatpush.bf16.xpose.msra.mxu1 %v511_v15 }
  0x4f   : > { %318 = vmatmul.bf16.vlgmr.msra.gmra.mxu0 %v181_v16 }
  0x50   : > { %331 = vmatmul.bf16.vlgmr.msra.gmra.mxu1 %v181_v16 }
  0xcc   : > { %v319_v18 = vpop.f32.mrf.mxu0 }
  0xcd   : > { %v332_v19 = vpop.f32.mrf.mxu1 }
  0xce   : > { %v338_v20 = vrot.slane %v332_v19, 7 }
  0xd0   : > { %v340_v21 = vsel %vm339_vm0, %v319_v18, %v338_v20 }
  0xd1   : > { %346 = vst.msk [vmem:[%s179_s22] sm:$0x3] %vm344_vm1, %v340_v21 }
  0xd4   : > { %v321_v22 = vpop.f32.mrf.mxu0 }
  0xd5   : > { %v334_v23 = vpop.f32.mrf.mxu1 }
  0xd6 PF: > { %s12_s11 = sadd.s32 1, %s565_s11   ;;  %s625_s9 = smov %s561_s10 }
  0xd7   : > { %p9_p5 = scmp.ge.s32.totalorder %s12_s11, 5   ;;  %s626_s10 = smov %s628_s12 }
  0xd9   :  { %11 = sbr.rel (!%p9_p5) target bundleno = 2 (0x2), region = 58 }

// kernel: evolvegcnh_forward.9
= control target key start
LH: loop header
LB: loop body
LE: loop exit
PB: predicated region body
PF: predicated region fallthrough
CT: control target
= control target key end

     0   :  { %s776_s9 = smov 0   ;;  %s778_s10 = smov 0   ;;  %s854_s0 = inlined_call_operand.vmem [shape: bf16[3,256,128], index: 0, kind: input, shape index: {}]   ;;  %s855_s1 = inlined_call_operand.vmem [shape: bf16[3,128,128], index: 1, kind: input, shape index: {}]   ;;  %s856_s2 = inlined_call_operand.vmem [shape: bf16[3,256,128], index: 2, kind: output, shape index: {}]  }
   0x1   :  { %s780_s11 = smov 0   ;;  %s782_s12 = smov 0  }
   0x2   :  { %s784_s13 = smov 0  }
   0x3 LB: > { %s21_s14 = sadd.s32 1, %s751_s11  ;;  %s24_s15 = sadd.s32 1, %s755_s12  ;;  %s759_s13 = sphi %s784_s13, %s12_s13   ;;  %s755_s12 = sphi %s782_s12, %s860_s12   ;;  %s751_s11 = sphi %s780_s11, %s859_s11   ;;  %s747_s10 = sphi %s778_s10, %s858_s10   ;;  %s743_s9 = sphi %s776_s9, %s857_s9  }
   0x4   : > { %p22_p0 = scmp.ge.s32.totalorder %s21_s14, 2  ;;  %p518_p1 = scmp.ge.s32.totalorder %s759_s13, 1 }
   0x5   : > { %p143_p2 = scmp.lt.s32.totalorder %s759_s13, 7 }
   0x6   : > { %s862_s14 = smov (%p22_p0, %s21_s14), 0  ;;  %s864_s15 = smov (!%p22_p0, %s24_s15), %s755_s12 }
   0x7   : > { %p144_p3 = pnand %p518_p1, %p143_p2  ;;  %p26_p4 = scmp.ge.s32.totalorder %s864_s15, 3 }
   0x8   : > { %p179_p5 = scmp.lt.s32.totalorder (!%p144_p3), %s747_s10, 2  ;;  %s519_s20 = sshll.u32 (!%p144_p3), %s743_s9, 4 }
   0x9   : > { %s866_s15 = smov (%p26_p4, %s864_s15), 0  ;;  %147 = sbr.rel (%p144_p3) target bundleno = 210 (0xd2), region = 28 }
   0xa   : > { %p181_p6 = scmp.lt.s32.totalorder (!%p144_p3), %s519_s20, 31 }
   0xe   : > { %s868_s10 = smov (!%p179_p5, %s747_s10), 2  ;;  %s870_s20 = smov (!%p181_p6, %s519_s20), 31 }
   0xf   : > { %s593_s16 = sshll.u32 %s868_s10, 6  ;;  %s520_s21 = sshll.u32 %s868_s10, 5 }
  0x10   : > { %s814_s19 = scalar_lea.vmem %s855_s1, %s593_s16  ;;  %s824_s22 = sadd.s32 %s520_s21, %s870_s20 }
  0x11   : > { %v609_v0 = vld [vmem:[%s814_s19 + $0x38] sm:$0xff]  ;;  %v608_v1 = vld [vmem:[%s814_s19 + $0x30] sm:$0xff]  ;;  %v607_v2 = vld [vmem:[%s814_s19 + $0x28] sm:$0xff]  ;;  %s521_s23 = sshll.u32 %s824_s22, 2 }
  0x12   : > { %331 = vmatpush.bf16.msra.mxu0 %v609_v0  ;;  %657 = vmatpush.bf16.msra.mxu1 %v609_v0  ;;  %v606_v3 = vld [vmem:[%s814_s19 + $0x20] sm:$0xff]  ;;  %v605_v4 = vld [vmem:[%s814_s19 + $0x18] sm:$0xff]  ;;  %v604_v5 = vld [vmem:[%s814_s19 + $0x10] sm:$0xff]  ;;  %s186_s26 = scalar_lea.vmem %s854_s0, %s521_s23  ;;  %s201_s29 = scalar_lea.vmem %s856_s2, %s521_s23 }
  0x13   : > { %658 = vmatpush.bf16.msra.mxu2 %v609_v0  ;;  %659 = vmatpush.bf16.msra.mxu3 %v609_v0  ;;  %v603_v6 = vld [vmem:[%s814_s19 + $0x8] sm:$0xff]  ;;  %v602_v7 = vld [vmem:[%s814_s19] sm:$0xff]  ;;  %v596_v9 = vld [vmem:[%s186_s26 + $0x10] sm:$0xff] }
  0x14   : > { %v594_v8 = vld [vmem:[%s186_s26] sm:$0xff]  ;;  %v600_v11 = vld [vmem:[%s186_s26 + $0x30] sm:$0xff]  ;;  %v595_v12 = vld [vmem:[%s186_s26 + $0x8] sm:$0xff] }
  0x15   : > { %v598_v10 = vld [vmem:[%s186_s26 + $0x20] sm:$0xff]  ;;  %v597_v13 = vld [vmem:[%s186_s26 + $0x18] sm:$0xff]  ;;  %v599_v14 = vld [vmem:[%s186_s26 + $0x28] sm:$0xff] }
  0x16   : > { %332 = vmatpush.bf16.msra.mxu0 %v608_v1  ;;  %660 = vmatpush.bf16.msra.mxu1 %v608_v1  ;;  %v601_v15 = vld [vmem:[%s186_s26 + $0x38] sm:$0xff] }
  0x17   : > { %661 = vmatpush.bf16.msra.mxu2 %v608_v1  ;;  %662 = vmatpush.bf16.msra.mxu3 %v608_v1 }
  0x1a   : > { %333 = vmatpush.bf16.msra.mxu0 %v607_v2  ;;  %663 = vmatpush.bf16.msra.mxu1 %v607_v2 }
  0x1b   : > { %664 = vmatpush.bf16.msra.mxu2 %v607_v2  ;;  %665 = vmatpush.bf16.msra.mxu3 %v607_v2 }
  0x1e   : > { %334 = vmatpush.bf16.msra.mxu0 %v606_v3  ;;  %666 = vmatpush.bf16.msra.mxu1 %v606_v3 }
  0x1f   : > { %667 = vmatpush.bf16.msra.mxu2 %v606_v3  ;;  %668 = vmatpush.bf16.msra.mxu3 %v606_v3 }
  0x22   : > { %335 = vmatpush.bf16.msra.mxu0 %v605_v4  ;;  %669 = vmatpush.bf16.msra.mxu1 %v605_v4 }
  0x23   : > { %670 = vmatpush.bf16.msra.mxu2 %v605_v4  ;;  %671 = vmatpush.bf16.msra.mxu3 %v605_v4 }
  0x26   : > { %336 = vmatpush.bf16.msra.mxu0 %v604_v5  ;;  %672 = vmatpush.bf16.msra.mxu1 %v604_v5 }
  0x27   : > { %673 = vmatpush.bf16.msra.mxu2 %v604_v5  ;;  %674 = vmatpush.bf16.msra.mxu3 %v604_v5 }
  0x2a   : > { %337 = vmatpush.bf16.msra.mxu0 %v603_v6  ;;  %675 = vmatpush.bf16.msra.mxu1 %v603_v6 }
  0x2b   : > { %676 = vmatpush.bf16.msra.mxu2 %v603_v6  ;;  %677 = vmatpush.bf16.msra.mxu3 %v603_v6 }
  0x2e   : > { %338 = vmatpush.bf16.msra.mxu0 %v602_v7  ;;  %678 = vmatpush.bf16.msra.mxu1 %v602_v7 }
  0x2f   : > { %679 = vmatpush.bf16.msra.mxu2 %v602_v7  ;;  %680 = vmatpush.bf16.msra.mxu3 %v602_v7 }
  0x31   : > { %339 = vmatmul.bf16.vlgmr.msra.gmra.mxu0 %v594_v8  ;;  %349 = vmatmul.bf16.vlgmr.msra.gmra.mxu1 %v596_v9 }
  0x32   : > { %359 = vmatmul.bf16.vlgmr.msra.gmra.mxu2 %v598_v10  ;;  %369 = vmatmul.bf16.vlgmr.msra.gmra.mxu3 %v600_v11 }
  0x41   : > { %344 = vmatmul.bf16.gmra.mxu0 %v595_v12  ;;  %354 = vmatmul.bf16.gmra.mxu1 %v597_v13 }
  0x42   : > { %364 = vmatmul.bf16.gmra.mxu2 %v599_v14  ;;  %374 = vmatmul.bf16.gmra.mxu3 %v601_v15 }
  0xae   : > { %v340_v16 = vpop.f32.mrf.mxu0  ;;  %v350_v17 = vpop.f32.mrf.mxu1 }
  0xb5   : > { %v360_v18 = vpop.f32.mrf.mxu2  ;;  %v370_v19 = vpop.f32.mrf.mxu3 }
  0xb6   : > { %v342_v20 = vpop.f32.mrf.mxu0  ;;  %v352_v21 = vpop.f32.mrf.mxu1 }
  0xb7   : > { %v613_v22 = vpack.c.bf16 %v342_v20, %v340_v16  ;;  %v623_v23 = vpack.c.bf16 %v352_v21, %v350_v17 }
  0xb9   : > { %614 = vst [vmem:[%s201_s29] sm:$0xff] %v613_v22  }
  0xba   : > { %651 = vst [vmem:[%s201_s29 + $0x10] sm:$0xff] %v623_v23  }
  0xbd   : > { %v362_v24 = vpop.f32.mrf.mxu2  ;;  %v372_v25 = vpop.f32.mrf.mxu3 }
  0xbe   : > { %v633_v26 = vpack.c.bf16 %v362_v24, %v360_v18  ;;  %v643_v27 = vpack.c.bf16 %v372_v25, %v370_v19  ;;  %v345_v28 = vpop.f32.mrf.mxu0  ;;  %v355_v29 = vpop.f32.mrf.mxu1 }
  0xc0   : > { %653 = vst [vmem:[%s201_s29 + $0x20] sm:$0xff] %v633_v26  }
  0xc1   : > { %655 = vst [vmem:[%s201_s29 + $0x30] sm:$0xff] %v643_v27  }
  0xc5   : > { %v365_v30 = vpop.f32.mrf.mxu2  ;;  %v375_v31 = vpop.f32.mrf.mxu3 }
  0xc6   : > { %v347_v32 = vpop.f32.mrf.mxu0  ;;  %v357_v33 = vpop.f32.mrf.mxu1 }
  0xc7   : > { %v618_v34 = vpack.c.bf16 %v347_v32, %v345_v28  ;;  %v628_v35 = vpack.c.bf16 %v357_v33, %v355_v29 }
  0xc9   : > { %650 = vst [vmem:[%s201_s29 + $0x8] sm:$0xff] %v618_v34  }
  0xca   : > { %652 = vst [vmem:[%s201_s29 + $0x18] sm:$0xff] %v628_v35  }
  0xcd   : > { %v367_v36 = vpop.f32.mrf.mxu2  ;;  %v377_v37 = vpop.f32.mrf.mxu3 }
  0xce   : > { %v638_v38 = vpack.c.bf16 %v367_v36, %v365_v30  ;;  %v648_v39 = vpack.c.bf16 %v377_v37, %v375_v31 }
  0xd0   : > { %654 = vst [vmem:[%s201_s29 + $0x28] sm:$0xff] %v638_v38  }
  0xd1   : > { %656 = vst [vmem:[%s201_s29 + $0x38] sm:$0xff] %v648_v39  }
  0xd2 PF: > { %s12_s13 = sadd.s32 1, %s759_s13   ;;  %s857_s9 = smov %s751_s11 }
  0xd3   : > { %p9_p7 = scmp.ge.s32.totalorder %s12_s13, 8   ;;  %s858_s10 = smov %s755_s12 }
  0xd4   : > { %s859_s11 = smov %s862_s14  ;;  %s860_s12 = smov %s866_s15 }
  0xd5   :  { %11 = sbr.rel (!%p9_p7) target bundleno = 3 (0x3), region = 61 }

// kernel: evolvegcnh_forward.8
= control target key start
LH: loop header
LB: loop body
LE: loop exit
PB: predicated region body
PF: predicated region fallthrough
CT: control target
= control target key end

     0   :  { %s2809_s24 = smov 0   ;;  %s4051_s0 = inlined_call_operand.vmem [shape: f32[128,128], index: 0, kind: input, shape index: {}]   ;;  %s4052_s1 = inlined_call_operand.vmem [shape: bf16[384,128], index: 1, kind: input, shape index: {}]   ;;  %s4053_s2 = inlined_call_operand.vmem [shape: bf16[256,128], index: 2, kind: input, shape index: {}]   ;;  %s4054_s3 = inlined_call_operand.vmem [shape: bf16[128,128], index: 3, kind: input, shape index: {}]   ;;  %s4055_s4 = inlined_call_operand.vmem [shape: f32[384,128], index: 4, kind: input, shape index: {}]   ;;  %s4056_s5 = inlined_call_operand.vmem [shape: bf16[3,128,128], index: 5, kind: input, shape index: {}]   ;;  %s4057_s6 = inlined_call_operand.vmem [shape: f32[3,128,1], index: 6, kind: input, shape index: {}]   ;;  %s4058_s7 = inlined_call_operand.vmem [shape: bf16[3,128,128], index: 7, kind: output, shape index: {}]  }
   0x1 LB: > { %s2149_s25 = sadd.s32 4294967295, %s2766_s24   ;;  %p2153_p0 = scmp.ge.s32.totalorder %s2766_s24, 1  ;;  %s2766_s24 = sphi %s2809_s24, %s17_s24  }
   0x2   : > { %p247_p1 = scmp.lt.s32.totalorder %s2766_s24, 4 }
   0x4   : > { %p248_p2 = pnand %p2153_p0, %p247_p1 }
   0x6   : > { %251 = sbr.rel (%p248_p2) target bundleno = 845 (0x34d), region = 48 }
   0xb   : > { %p284_p3 = scmp.lt.s32.totalorder %s2149_s25, 2  ;;  %p2160_p4 = scmp.ne.s32.totalorder %s2149_s25, 0 }
   0xd   : > { %s285_s26 = scalar_select %p284_p3, %s2149_s25, 2 }
   0xe   : > { %302 = sbr.rel (%p2160_p4) target bundleno = 36 (0x24), region = 52 }
   0xf   : > { %s2387_s27 = sshll.u32 %s285_s26, 6  ;;  %s2388_s28 = sshll.u32 %s285_s26, 7 }
  0x10   : > { %s2820_s8 = scalar_lea.vmem %s4056_s5, %s2387_s27  ;;  %s2825_s11 = scalar_lea.vmem %s4057_s6, %s2388_s28 }
  0x11   : > { %s2830_s14 = scalar_lea.vmem %s4058_s7, %s2387_s27 }
  0x13   : > { %v303_v0 = vld [vmem:[%s4051_s0] sm:$0xff]  ;;  %v304_v1 = vld [vmem:[%s4051_s0 + $0x8] sm:$0xff]  ;;  %v305_v2 = vld [vmem:[%s4051_s0 + $0x10] sm:$0xff] }
  0x14   : > { %319 = vst [vmem:[#allocation2 + $0x30] sm:$0xff] %v303_v0  ;;  %v306_v3 = vld [vmem:[%s4051_s0 + $0x18] sm:$0xff]  ;;  %v307_v4 = vld [vmem:[%s4051_s0 + $0x20] sm:$0xff]  ;;  %v308_v5 = vld [vmem:[%s4051_s0 + $0x28] sm:$0xff] }
  0x15   : > { %320 = vst [vmem:[#allocation2] sm:$0xff] %v304_v1  ;;  %v309_v6 = vld [vmem:[%s4051_s0 + $0x30] sm:$0xff]  ;;  %v310_v7 = vld [vmem:[%s4051_s0 + $0x38] sm:$0xff]  ;;  %v311_v8 = vld [vmem:[%s4051_s0 + $0x40] sm:$0xff] }
  0x16   : > { %321 = vst [vmem:[#allocation2 + $0x58] sm:$0xff] %v305_v2  ;;  %v312_v9 = vld [vmem:[%s4051_s0 + $0x48] sm:$0xff]  ;;  %v313_v10 = vld [vmem:[%s4051_s0 + $0x50] sm:$0xff]  ;;  %v314_v11 = vld [vmem:[%s4051_s0 + $0x58] sm:$0xff] }
  0x17   : > { %322 = vst [vmem:[#allocation2 + $0x18] sm:$0xff] %v306_v3  ;;  %v315_v12 = vld [vmem:[%s4051_s0 + $0x60] sm:$0xff]  ;;  %v316_v13 = vld [vmem:[%s4051_s0 + $0x68] sm:$0xff]  ;;  %v317_v14 = vld [vmem:[%s4051_s0 + $0x70] sm:$0xff] }
  0x18   : > { %323 = vst [vmem:[#allocation2 + $0x50] sm:$0xff] %v307_v4  ;;  %v318_v15 = vld [vmem:[%s4051_s0 + $0x78] sm:$0xff] }
  0x19   : > { %324 = vst [vmem:[#allocation2 + $0x68] sm:$0xff] %v308_v5 }
  0x1a   : > { %325 = vst [vmem:[#allocation2 + $0x8] sm:$0xff] %v309_v6 }
  0x1b   : > { %326 = vst [vmem:[#allocation2 + $0x48] sm:$0xff] %v310_v7 }
  0x1c   : > { %327 = vst [vmem:[#allocation2 + $0x40] sm:$0xff] %v311_v8 }
  0x1d   : > { %328 = vst [vmem:[#allocation2 + $0x20] sm:$0xff] %v312_v9 }
  0x1e   : > { %329 = vst [vmem:[#allocation2 + $0x10] sm:$0xff] %v313_v10 }
  0x1f   : > { %330 = vst [vmem:[#allocation2 + $0x38] sm:$0xff] %v314_v11 }
  0x20   : > { %331 = vst [vmem:[#allocation2 + $0x60] sm:$0xff] %v315_v12 }
  0x21   : > { %332 = vst [vmem:[#allocation2 + $0x70] sm:$0xff] %v316_v13 }
  0x22   : > { %333 = vst [vmem:[#allocation2 + $0x78] sm:$0xff] %v317_v14 }
  0x23   : > { %334 = vst [vmem:[#allocation2 + $0x28] sm:$0xff] %v318_v15 }
  0x24 PF: > { %v405_v16 = vld [vmem:[%s2825_s11 + $0x70] sm:$0xff]  ;;  %v403_v17 = vld [vmem:[%s2825_s11 + $0x60] sm:$0xff]  ;;  %v2768_v18 = vmov 0   ;;  %v406_v21 = vld [vmem:[%s2825_s11 + $0x78] sm:$0xff] }
  0x25   : > { %2550 = vset.pattern.permute.xlu1 %v2768_v18  ;;  %2549 = vset.pattern.permute.xlu0 %v2768_v18  ;;  %2552 = vtanh.f32 %v405_v16  ;;  %v401_v19 = vld [vmem:[%s2825_s11 + $0x50] sm:$0xff]  ;;  %v404_v23 = vld [vmem:[%s2825_s11 + $0x68] sm:$0xff]  ;;  %v402_v27 = vld [vmem:[%s2825_s11 + $0x58] sm:$0xff] }
  0x26   : > { %2554 = vtanh.f32 %v403_v17  ;;  %2551 = vset.pattern.permute.xlu2 %v2768_v18  ;;  %v2896_v30 = vld [vmem:[#allocation2 + $0x10] sm:$0xff]  ;;  %v2900_v32 = vld [vmem:[#allocation2 + $0x38] sm:$0xff]  ;;  %v399_v34 = vld [vmem:[%s2825_s11 + $0x40] sm:$0xff] }
  0x27   : > { %2556 = vtanh.f32 %v401_v19  ;;  %v2892_v28 = vld [vmem:[#allocation2 + $0x60] sm:$0xff]  ;;  %v356_v35 = vpack.c.bf16 %v2900_v32, %v2896_v30  ;;  %v400_v37 = vld [vmem:[%s2825_s11 + $0x48] sm:$0xff]  ;;  %v397_v39 = vld [vmem:[%s2825_s11 + $0x30] sm:$0xff] }
  0x28   : > { %2558 = vtanh.f32 %v406_v21  ;;  %v2894_v29 = vld [vmem:[#allocation2 + $0x70] sm:$0xff]  ;;  %v2907_v40 = vld [vmem:[#allocation2 + $0x40] sm:$0xff]  ;;  %v2913_v44 = vld [vmem:[#allocation2 + $0x8] sm:$0xff] }
  0x29   : > { %v2883_v20 = vld [vmem:[#allocation2 + $0x78] sm:$0xff]  ;;  %2560 = vtanh.f32 %v404_v23  ;;  %v357_v31 = vpack.c.bf16 %v2894_v29, %v2892_v28  ;;  %v2909_v41 = vld [vmem:[#allocation2 + $0x20] sm:$0xff]  ;;  %v2915_v45 = vld [vmem:[#allocation2 + $0x48] sm:$0xff] }
  0x2a   : > { %v2886_v22 = vld [vmem:[#allocation2 + $0x28] sm:$0xff]  ;;  %2562 = vtanh.f32 %v402_v27  ;;  %v355_v43 = vpack.c.bf16 %v2909_v41, %v2907_v40  ;;  %v398_v46 = vld [vmem:[%s2825_s11 + $0x38] sm:$0xff]  ;;  %v354_v47 = vpack.c.bf16 %v2915_v45, %v2913_v44  ;;  %v395_v49 = vld [vmem:[%s2825_s11 + $0x20] sm:$0xff] }
  0x2b   : > { %v358_v24 = vpack.c.bf16 %v2886_v22, %v2883_v20  ;;  %v2553_v25 = vpop.eup %2552  ;;  %2564 = vtanh.f32 %v399_v34  ;;  %v339_v50 = vld [vmem:[#allocation2 + $0x50] sm:$0xff]  ;;  %v340_v51 = vld [vmem:[#allocation2 + $0x68] sm:$0xff]  ;;  %v337_v56 = vld [vmem:[#allocation2 + $0x58] sm:$0xff] }
  0x2c   : > { %v2555_v26 = vpop.eup %2554  ;;  %495 = vperm.xlu0 %2549, %v2553_v25   ;;  %2566 = vtanh.f32 %v400_v37  ;;  %v396_v53 = vld [vmem:[%s2825_s11 + $0x28] sm:$0xff]  ;;  %v353_v54 = vpack.c.bf16 %v340_v51, %v339_v50  ;;  %v338_v57 = vld [vmem:[#allocation2 + $0x18] sm:$0xff]  ;;  %v393_v58 = vld [vmem:[%s2825_s11 + $0x10] sm:$0xff] }
  0x2d   : > { %976 = vmatpush.bf16.msra.mxu1 %v358_v24  ;;  %2532 = vmatpush.bf16.msra.mxu2 %v358_v24  ;;  %v2557_v33 = vpop.eup %2556  ;;  %2568 = vtanh.f32 %v397_v39  ;;  %v352_v59 = vpack.c.bf16 %v338_v57, %v337_v56  ;;  %v394_v61 = vld [vmem:[%s2825_s11 + $0x18] sm:$0xff]  ;;  %v335_v62 = vld [vmem:[#allocation2 + $0x30] sm:$0xff]  ;;  %v336_v63 = vld [vmem:[#allocation2] sm:$0xff] }
  0x2e   : > { %485 = vperm.xlu1 %2550, %v2555_v26   ;;  %475 = vperm.xlu2 %2551, %v2557_v33   ;;  %v2559_v36 = vpop.eup %2558  ;;  %2570 = vtanh.f32 %v398_v46  ;;  %v391_v1 = vld [vmem:[%s2825_s11] sm:$0xff]  ;;  %v351_v2 = vpack.c.bf16 %v336_v63, %v335_v62  ;;  %v392_v5 = vld [vmem:[%s2825_s11 + $0x8] sm:$0xff]  ;;  %v2416_v11 = vld [vmem:[%s4053_s2 + $0x10] sm:$0xff] }
  0x2f   : > { %v2561_v38 = vpop.eup %2560  ;;  %2572 = vtanh.f32 %v395_v49  ;;  %v2414_v4 = vld [vmem:[%s4053_s2] sm:$0xff]  ;;  %v2415_v10 = vld [vmem:[%s4053_s2 + $0x8] sm:$0xff]  ;;  %v2417_v12 = vld [vmem:[%s4053_s2 + $0x18] sm:$0xff] }
  0x30   : > { %v2563_v42 = vpop.eup %2562  ;;  %2574 = vtanh.f32 %v396_v53  ;;  %v2418_v13 = vld [vmem:[%s4053_s2 + $0x20] sm:$0xff]  ;;  %v2419_v14 = vld [vmem:[%s4053_s2 + $0x28] sm:$0xff]  ;;  %v2516_v16 = vld [vmem:[%s2820_s8 + $0x38] sm:$0xff]  }
  0x31   : > { %977 = vmatpush.bf16.msra.mxu1 %v357_v31  ;;  %2533 = vmatpush.bf16.msra.mxu2 %v357_v31  ;;  %v2565_v48 = vpop.eup %2564  ;;  %2576 = vtanh.f32 %v393_v58  ;;  %v2468_v18 = vunpack.c.l.bf16 %v2516_v16  ;;  %v2469_v19 = vunpack.c.h.bf16 %v2516_v16  ;;  %v2515_v21 = vld [vmem:[%s2820_s8 + $0x30] sm:$0xff]   ;;  %v2513_v49 = vld [vmem:[%s2820_s8 + $0x20] sm:$0xff]   ;;  %v2421_v51 = vld [vmem:[%s4053_s2 + $0x38] sm:$0xff] }
  0x32   : > { %v2567_v52 = vpop.eup %2566  ;;  %2578 = vtanh.f32 %v394_v61  ;;  %v2420_v26 = vld [vmem:[%s4053_s2 + $0x30] sm:$0xff]  ;;  %v2464_v27 = vunpack.c.l.bf16 %v2515_v21  ;;  %v2465_v31 = vunpack.c.h.bf16 %v2515_v21  ;;  %v2456_v53 = vunpack.c.l.bf16 %v2513_v49  ;;  %v2512_v58 = vld [vmem:[%s2820_s8 + $0x18] sm:$0xff]  }
  0x33   : > { %v2569_v55 = vpop.eup %2568  ;;  %2580 = vtanh.f32 %v391_v1  ;;  %v2452_v62 = vunpack.c.l.bf16 %v2512_v58 }
  0x34   : > { %500 = vperm.xlu0 %2549, %v2559_v36   ;;  %v2571_v60 = vpop.eup %2570  ;;  %2582 = vtanh.f32 %v392_v5  ;;  %v2422_v5 = vld [vmem:[%s4053_s2 + $0x40] sm:$0xff] }
  0x35   : > { %978 = vmatpush.bf16.msra.mxu1 %v356_v35  ;;  %2534 = vmatpush.bf16.msra.mxu2 %v356_v35  ;;  %v2573_v0 = vpop.eup %2572 }
  0x36   : > { %490 = vperm.xlu1 %2550, %v2561_v38   ;;  %480 = vperm.xlu2 %2551, %v2563_v42   ;;  %v2575_v3 = vpop.eup %2574  ;;  %v2514_v38 = vld [vmem:[%s2820_s8 + $0x28] sm:$0xff]  }
  0x37   : > { %v2577_v6 = vpop.eup %2576  ;;  %v2460_v39 = vunpack.c.l.bf16 %v2514_v38  ;;  %v2461_v42 = vunpack.c.h.bf16 %v2514_v38 }
  0x38   : > { %v2579_v7 = vpop.eup %2578 }
  0x39   : > { %979 = vmatpush.bf16.msra.mxu1 %v355_v43  ;;  %2535 = vmatpush.bf16.msra.mxu2 %v355_v43  ;;  %v2581_v8 = vpop.eup %2580 }
  0x3a   : > { %v2583_v9 = vpop.eup %2582 }
  0x3c   : > { %465 = vperm.xlu0 %2549, %v2565_v48  }
  0x3d   : > { %980 = vmatpush.bf16.msra.mxu1 %v354_v47  ;;  %2536 = vmatpush.bf16.msra.mxu2 %v354_v47 }
  0x3e   : > { %470 = vperm.xlu1 %2550, %v2567_v52   ;;  %455 = vperm.xlu2 %2551, %v2569_v55   ;;  %v2457_v52 = vunpack.c.h.bf16 %v2513_v49  ;;  %v2391_v49 = vld [vmem:[%s4052_s1 + $0x8] sm:$0xff] }
  0x41   : > { %981 = vmatpush.bf16.msra.mxu1 %v353_v54  ;;  %2537 = vmatpush.bf16.msra.mxu2 %v353_v54 }
  0x44   : > { %460 = vperm.xlu0 %2549, %v2571_v60  }
  0x45   : > { %982 = vmatpush.bf16.msra.mxu1 %v352_v59  ;;  %2538 = vmatpush.bf16.msra.mxu2 %v352_v59  ;;  %v2453_v59 = vunpack.c.h.bf16 %v2512_v58  ;;  %v2426_v58 = vld [vmem:[%s4053_s2 + $0x60] sm:$0xff] }
  0x46   : > { %445 = vperm.xlu1 %2550, %v2573_v0   ;;  %450 = vperm.xlu2 %2551, %v2575_v3  }
  0x49   : > { %983 = vmatpush.bf16.msra.mxu1 %v351_v2  ;;  %2539 = vmatpush.bf16.msra.mxu2 %v351_v2  ;;  %v2511_v2 = vld [vmem:[%s2820_s8 + $0x10] sm:$0xff]  }
  0x4c   : > { %984 = vmatmul.bf16.vlgmr.msra.gmra.mxu1 %v2414_v4  ;;  %435 = vperm.xlu0 %2549, %v2577_v6   ;;  %v2448_v6 = vunpack.c.l.bf16 %v2511_v2 }
  0x4e   : > { %440 = vperm.xlu1 %2550, %v2579_v7   ;;  %425 = vperm.xlu2 %2551, %v2581_v8   ;;  %v2449_v8 = vunpack.c.h.bf16 %v2511_v2  ;;  %v2405_v2 = vld [vmem:[%s4052_s1 + $0x78] sm:$0xff] }
  0x54   : > { %430 = vperm.xlu0 %2549, %v2583_v9  }
  0x5c   : > { %989 = vmatmul.bf16.gmra.mxu1 %v2415_v10 }
  0x6c   : > { %994 = vmatmul.bf16.gmra.mxu1 %v2416_v11  ;;  %v2510_v11 = vld [vmem:[%s2820_s8 + $0x8] sm:$0xff]  }
  0x6d   : > { %v2444_v16 = vunpack.c.l.bf16 %v2510_v11 }
  0x7c   : > { %999 = vmatmul.bf16.gmra.mxu1 %v2417_v12 }
  0x88   : > { %v476_v34 = vpop.permute.xlu2 %475 }
  0x89   : > { %v513_v47 = vmul.f32 %v2460_v39, %v476_v34  ;;  %v2390_v39 = vld [vmem:[%s4052_s1] sm:$0xff] }
  0x8c   : > { %1004 = vmatmul.bf16.gmra.mxu1 %v2418_v13 }
  0x90   : > { %v481_v46 = vpop.permute.xlu2 %480 }
  0x91   : > { %v514_v48 = vmul.f32 %v2461_v42, %v481_v46  ;;  %v2401_v42 = vld [vmem:[%s4052_s1 + $0x58] sm:$0xff]  ;;  %v2424_v46 = vld [vmem:[%s4053_s2 + $0x50] sm:$0xff] }
  0x93   : > { %v524_v54 = vpack.c.bf16 %v514_v48, %v513_v47  ;;  %v2427_v47 = vld [vmem:[%s4053_s2 + $0x68] sm:$0xff] }
  0x94   : > { %1049 = vmatmul.bf16.vlgmr.msra.gmra.mxu2 %v2427_v47 }
  0x98   : > { %v456_v63 = vpop.permute.xlu2 %455 }
  0x99   : > { %v509_v1 = vmul.f32 %v2452_v62, %v456_v63  ;;  %v2404_v62 = vld [vmem:[%s4052_s1 + $0x70] sm:$0xff] }
  0x9c   : > { %1009 = vmatmul.bf16.gmra.mxu1 %v2419_v14 }
  0x9e   : > { %v496_v15 = vpop.permute.xlu0 %495 }
  0x9f   : > { %v517_v24 = vmul.f32 %v2468_v18, %v496_v15  ;;  %v2445_v15 = vunpack.c.h.bf16 %v2510_v11  ;;  %v2397_v11 = vld [vmem:[%s4052_s1 + $0x38] sm:$0xff] }
  0xa0   : > { %v486_v17 = vpop.permute.xlu1 %485  ;;  %v451_v10 = vpop.permute.xlu2 %450 }
  0xa1   : > { %v515_v36 = vmul.f32 %v2464_v27, %v486_v17  ;;  %v508_v12 = vmul.f32 %v2449_v8, %v451_v10 }
  0xa6   : > { %v501_v23 = vpop.permute.xlu0 %500 }
  0xa7   : > { %v518_v25 = vmul.f32 %v2469_v19, %v501_v23  ;;  %v2439_v23 = vld [vmem:[%s2820_s8] sm:$0xff]  }
  0xa8   : > { %v491_v35 = vpop.permute.xlu1 %490  ;;  %v426_v34 = vpop.permute.xlu2 %425 }
  0xa9   : > { %v526_v33 = vpack.c.bf16 %v518_v25, %v517_v24  ;;  %v516_v37 = vmul.f32 %v2465_v31, %v491_v35  ;;  %v2423_v25 = vld [vmem:[%s4053_s2 + $0x48] sm:$0xff] }
  0xab   : > { %719 = vmatpush.bf16.xpose.msra.mxu0 %v526_v33  ;;  %2524 = vmatpush.bf16.xpose.msra.mxu3 %v526_v33  ;;  %v525_v43 = vpack.c.bf16 %v516_v37, %v515_v36  ;;  %v2440_v33 = vunpack.c.l.bf16 %v2439_v23 }
  0xac   : > { %1014 = vmatmul.bf16.gmra.mxu1 %v2420_v26  ;;  %v2441_v26 = vunpack.c.h.bf16 %v2439_v23 }
  0xad   : > { %v503_v36 = vmul.f32 %v2440_v33, %v426_v34 }
  0xae   : > { %v466_v50 = vpop.permute.xlu0 %465 }
  0xaf   : > { %v511_v57 = vmul.f32 %v2456_v53, %v466_v50  ;;  %v2402_v50 = vld [vmem:[%s4052_s1 + $0x60] sm:$0xff]  ;;  %v2428_v53 = vld [vmem:[%s4053_s2 + $0x70] sm:$0xff] }
  0xb0   : > { %v471_v55 = vpop.permute.xlu1 %470  ;;  %1054 = vmatmul.bf16.gmra.mxu2 %v2428_v53 }
  0xb1   : > { %v512_v56 = vmul.f32 %v2457_v52, %v471_v55  ;;  %v2425_v52 = vld [vmem:[%s4053_s2 + $0x58] sm:$0xff]  ;;  %v2392_v55 = vld [vmem:[%s4052_s1 + $0x10] sm:$0xff] }
  0xb3   : > { %720 = vmatpush.bf16.xpose.msra.mxu0 %v525_v43  ;;  %2525 = vmatpush.bf16.xpose.msra.mxu3 %v525_v43  ;;  %v523_v60 = vpack.c.bf16 %v512_v56, %v511_v57  ;;  %v2403_v56 = vld [vmem:[%s4052_s1 + $0x68] sm:$0xff] }
  0xb6   : > { %v461_v61 = vpop.permute.xlu0 %460 }
  0xb7   : > { %v510_v0 = vmul.f32 %v2453_v59, %v461_v61  ;;  %v2429_v59 = vld [vmem:[%s4053_s2 + $0x78] sm:$0xff] }
  0xb8   : > { %v446_v3 = vpop.permute.xlu1 %445  ;;  %v2393_v61 = vld [vmem:[%s4052_s1 + $0x18] sm:$0xff] }
  0xb9   : > { %v522_v7 = vpack.c.bf16 %v510_v0, %v509_v1  ;;  %v507_v9 = vmul.f32 %v2448_v6, %v446_v3  ;;  %v2394_v1 = vld [vmem:[%s4052_s1 + $0x20] sm:$0xff]  ;;  %v2395_v6 = vld [vmem:[%s4052_s1 + $0x28] sm:$0xff] }
  0xbb   : > { %721 = vmatpush.bf16.xpose.msra.mxu0 %v524_v54  ;;  %2526 = vmatpush.bf16.xpose.msra.mxu3 %v524_v54  ;;  %v521_v17 = vpack.c.bf16 %v508_v12, %v507_v9  ;;  %v2396_v9 = vld [vmem:[%s4052_s1 + $0x30] sm:$0xff] }
  0xbc   : > { %1019 = vmatmul.bf16.gmra.mxu1 %v2421_v51 }
  0xbe   : > { %v436_v13 = vpop.permute.xlu0 %435 }
  0xbf   : > { %v505_v21 = vmul.f32 %v2444_v16, %v436_v13 }
  0xc0   : > { %v441_v18 = vpop.permute.xlu1 %440  ;;  %1059 = vmatmul.bf16.gmra.mxu2 %v2429_v59 }
  0xc1   : > { %v506_v19 = vmul.f32 %v2445_v15, %v441_v18  ;;  %v2398_v15 = vld [vmem:[%s4052_s1 + $0x40] sm:$0xff] }
  0xc3   : > { %722 = vmatpush.bf16.xpose.msra.mxu0 %v523_v60  ;;  %2527 = vmatpush.bf16.xpose.msra.mxu3 %v523_v60  ;;  %v520_v27 = vpack.c.bf16 %v506_v19, %v505_v21 }
  0xc6   : > { %v431_v31 = vpop.permute.xlu0 %430 }
  0xc7   : > { %v504_v35 = vmul.f32 %v2441_v26, %v431_v31 }
  0xc9   : > { %v2956_v4 = vpop.f32.mrf.mxu1  ;;  %v519_v38 = vpack.c.bf16 %v504_v35, %v503_v36 }
  0xcb   : > { %723 = vmatpush.bf16.xpose.msra.mxu0 %v522_v7  ;;  %2528 = vmatpush.bf16.xpose.msra.mxu3 %v522_v7 }
  0xcc   : > { %1024 = vmatmul.bf16.gmra.mxu1 %v2422_v5 }
  0xd1   : > { %v2962_v14 = vpop.f32.mrf.mxu1 }
  0xd3   : > { %724 = vmatpush.bf16.xpose.msra.mxu0 %v521_v17  ;;  %2529 = vmatpush.bf16.xpose.msra.mxu3 %v521_v17 }
  0xd9   : > { %v2965_v24 = vpop.f32.mrf.mxu1 }
  0xdb   : > { %725 = vmatpush.bf16.xpose.msra.mxu0 %v520_v27  ;;  %2530 = vmatpush.bf16.xpose.msra.mxu3 %v520_v27 }
  0xdc   : > { %1029 = vmatmul.bf16.gmra.mxu1 %v2423_v25  ;;  %v2399_v25 = vld [vmem:[%s4052_s1 + $0x48] sm:$0xff] }
  0xe1   : > { %v2970_v37 = vpop.f32.mrf.mxu1 }
  0xe2   : > { %4059 = vst [vmem:[#allocation3_spill] sm:$0xff] %v2970_v37 }
  0xe3   : > { %726 = vmatpush.bf16.xpose.msra.mxu0 %v519_v38  ;;  %2531 = vmatpush.bf16.xpose.msra.mxu3 %v519_v38  ;;  %v2400_v38 = vld [vmem:[%s4052_s1 + $0x50] sm:$0xff] }
  0xe9   : > { %v2978_v43 = vpop.f32.mrf.mxu1 }
  0xea   : > { %4060 = vst [vmem:[#allocation4_spill] sm:$0xff] %v2978_v43  ;;  %727 = vmatmul.bf16.vlgmr.msra.gmra.mxu0 %v2390_v39  ;;  %782 = vmatmul.bf16.vlgmr.msra.gmra.mxu3 %v2401_v42 }
  0xec   : > { %1034 = vmatmul.bf16.gmra.mxu1 %v2424_v46 }
  0xf1   : > { %v2986_v48 = vpop.f32.mrf.mxu1 }
  0xf2   : > { %4061 = vst [vmem:[#allocation5_spill] sm:$0xff] %v2986_v48 }
  0xf9   : > { %v2994_v51 = vpop.f32.mrf.mxu1 }
  0xfa   : > { %4062 = vst [vmem:[#allocation6_spill] sm:$0xff] %v2994_v51  ;;  %732 = vmatmul.bf16.gmra.mxu0 %v2391_v49  ;;  %787 = vmatmul.bf16.gmra.mxu3 %v2402_v50 }
  0xfc   : > { %1039 = vmatmul.bf16.gmra.mxu1 %v2425_v52  ;;  %v1087_v52 = vld [vmem:[%s4055_s4 + $0xb0] sm:$0xff] }
 0x101   : > { %v3002_v54 = vpop.f32.mrf.mxu1 }
 0x102   : > { %4063 = vst [vmem:[#allocation7_spill] sm:$0xff] %v3002_v54 }
 0x109   : > { %v3010_v57 = vpop.f32.mrf.mxu1 }
 0x10a   : > { %4064 = vst [vmem:[#allocation8_spill] sm:$0xff] %v3010_v57  ;;  %737 = vmatmul.bf16.gmra.mxu0 %v2392_v55  ;;  %792 = vmatmul.bf16.gmra.mxu3 %v2403_v56 }
 0x10c   : > { %1044 = vmatmul.bf16.gmra.mxu1 %v2426_v58 }
 0x111   : > { %v3018_v60 = vpop.f32.mrf.mxu1 }
 0x112   : > { %4065 = vst [vmem:[#allocation9_spill] sm:$0xff] %v3018_v60 }
 0x117   : > { %v1050_v34 = vpop.f32.mrf.mxu2 }
 0x119   : > { %v3026_v63 = vpop.f32.mrf.mxu1 }
 0x11a   : > { %4066 = vst [vmem:[#allocation10_spill] sm:$0xff] %v3026_v63  ;;  %742 = vmatmul.bf16.gmra.mxu0 %v2393_v61  ;;  %797 = vmatmul.bf16.gmra.mxu3 %v2404_v62 }
 0x11f   : > { %v1052_v42 = vpop.f32.mrf.mxu2 }
 0x121   : > { %v3028_v0 = vpop.f32.mrf.mxu1 }
 0x122   : > { %4067 = vst [vmem:[#allocation11_spill] sm:$0xff] %v3028_v0 }
 0x129   : > { %v3036_v3 = vpop.f32.mrf.mxu1 }
 0x12a   : > { %4068 = vst [vmem:[#allocation12_spill] sm:$0xff] %v3036_v3  ;;  %747 = vmatmul.bf16.gmra.mxu0 %v2394_v1  ;;  %802 = vmatmul.bf16.gmra.mxu3 %v2405_v2  ;;  %v1088_v1 = vld [vmem:[%s4055_s4 + $0xb8] sm:$0xff] }
 0x131   : > { %v3038_v5 = vpop.f32.mrf.mxu1 }
 0x132   : > { %4069 = vst [vmem:[#allocation13_spill] sm:$0xff] %v3038_v5 }
 0x133   : > { %v1055_v55 = vpop.f32.mrf.mxu2 }
 0x139   : > { %v3043_v7 = vpop.f32.mrf.mxu1 }
 0x13a   : > { %4070 = vst [vmem:[#allocation14_spill] sm:$0xff] %v3043_v7  ;;  %752 = vmatmul.bf16.gmra.mxu0 %v2395_v6 }
 0x141   : > { %v3045_v8 = vpop.f32.mrf.mxu1 }
 0x142   : > { %4071 = vst [vmem:[#allocation15_spill] sm:$0xff] %v3045_v8 }
 0x149   : > { %v3050_v10 = vpop.f32.mrf.mxu1 }
 0x14a   : > { %757 = vmatmul.bf16.gmra.mxu0 %v2396_v9  ;;  %v1091_v9 = vld [vmem:[%s4055_s4 + $0xd0] sm:$0xff] }
 0x151   : > { %v3055_v12 = vpop.f32.mrf.mxu1 }
 0x159   : > { %v3057_v13 = vpop.f32.mrf.mxu1 }
 0x15a   : > { %762 = vmatmul.bf16.gmra.mxu0 %v2397_v11 }
 0x161   : > { %v3064_v17 = vpop.f32.mrf.mxu1 }
 0x167   : > { %v3062_v16 = vpop.f32.mrf.mxu0 }
 0x169   : > { %v3068_v21 = vpop.f32.mrf.mxu1 }
 0x16a   : > { %767 = vmatmul.bf16.gmra.mxu0 %v2398_v15  ;;  %v1093_v15 = vld [vmem:[%s4055_s4 + $0xe0] sm:$0xff] }
 0x16d   : > { %v783_v18 = vpop.f32.mrf.mxu3 }
 0x16f   : > { %v3066_v19 = vpop.f32.mrf.mxu0 }
 0x171   : > { %v3075_v27 = vpop.f32.mrf.mxu1 }
 0x175   : > { %v785_v23 = vpop.f32.mrf.mxu3 }
 0x177   : > { %v3073_v26 = vpop.f32.mrf.mxu0 }
 0x179   : > { %v1040_v35 = vpop.f32.mrf.mxu1 }
 0x17a   : > { %772 = vmatmul.bf16.gmra.mxu0 %v2399_v25  ;;  %v1455_v50 = vadd.f32 %v1040_v35, %v783_v18  ;;  %v1092_v35 = vld [vmem:[%s4055_s4 + $0xd8] sm:$0xff] }
 0x17c   : > { %v1471_v53 = vadd.f32 %v1455_v50, %v1087_v52 }
 0x17d   : > { %v788_v31 = vpop.f32.mrf.mxu3 }
 0x17e   : > { %v2343_v62 = vmul.f32 -1.442695, %v1471_v53  ;;  %v1089_v53 = vld [vmem:[%s4055_s4 + $0xc0] sm:$0xff] }
 0x17f   : > { %v3077_v33 = vpop.f32.mrf.mxu0 }
 0x180   : > { %4072 = vst [vmem:[#allocation16_spill] sm:$0xff] %v3077_v33  ;;  %2584 = vpow2.f32 %v2343_v62 }
 0x181   : > { %v1042_v46 = vpop.f32.mrf.mxu1 }
 0x182   : > { %v1456_v61 = vadd.f32 %v1042_v46, %v785_v23  ;;  %v1057_v23 = vpop.f32.mrf.mxu2 }
 0x184   : > { %v1472_v2 = vadd.f32 %v1456_v61, %v1088_v1  ;;  %v1090_v1 = vld [vmem:[%s4055_s4 + $0xc8] sm:$0xff] }
 0x185   : > { %v790_v36 = vpop.f32.mrf.mxu3 }
 0x186   : > { %v2585_v61 = vpop.eup %2584 }
 0x187   : > { %v3082_v39 = vpop.f32.mrf.mxu0 }
 0x188   : > { %4073 = vst [vmem:[#allocation17_spill] sm:$0xff] %v3082_v39 }
 0x189   : > { %v1045_v58 = vpop.f32.mrf.mxu1 }
 0x18a   : > { %777 = vmatmul.bf16.gmra.mxu0 %v2400_v38  ;;  %v2344_v38 = vmul.f32 -1.442695, %v1472_v2 }
 0x18c   : > { %2586 = vpow2.f32 %v2344_v38  ;;  %v1060_v38 = vpop.f32.mrf.mxu2 }
 0x18d   : > { %v793_v47 = vpop.f32.mrf.mxu3 }
 0x18e   : > { %v1459_v6 = vadd.f32 %v1050_v34, %v793_v47  ;;  %v1457_v34 = vadd.f32 %v1045_v58, %v788_v31  ;;  %v3111_v31 = vadd.f32 1.0, %v2585_v61  ;;  %v1095_v61 = vld [vmem:[%s4055_s4 + $0xf0] sm:$0xff] }
 0x18f   : > { %v3084_v49 = vpop.f32.mrf.mxu0 }
 0x190   : > { %4074 = vst [vmem:[#allocation18_spill] sm:$0xff] %v3084_v49  ;;  %v1475_v50 = vadd.f32 %v1459_v6, %v1091_v9  ;;  %v1094_v6 = vld [vmem:[%s4055_s4 + $0xe8] sm:$0xff] }
 0x191   : > { %v1047_v47 = vpop.f32.mrf.mxu1 }
 0x192   : > { %v2347_v2 = vmul.f32 -1.442695, %v1475_v50 }
 0x195   : > { %v795_v56 = vpop.f32.mrf.mxu3 }
 0x196   : > { %v1460_v18 = vadd.f32 %v1052_v42, %v795_v56  ;;  %v1473_v56 = vadd.f32 %v1457_v34, %v1089_v53 }
 0x197   : > { %v3089_v59 = vpop.f32.mrf.mxu0 }
 0x198   : > { %4075 = vst [vmem:[#allocation19_spill] sm:$0xff] %v3089_v59  ;;  %v1476_v62 = vadd.f32 %v1460_v18, %v1092_v35  ;;  %v2345_v18 = vmul.f32 -1.442695, %v1473_v56  ;;  %v2587_v35 = vpop.eup %2586 }
 0x199   : > { %v3121_v53 = vadd.f32 1.0, %v2587_v35 }
 0x19a   : > { %v2348_v9 = vmul.f32 -1.442695, %v1476_v62 }
 0x19d   : > { %v798_v11 = vpop.f32.mrf.mxu3 }
 0x19e   : > { %v1461_v25 = vadd.f32 %v1055_v55, %v798_v11  ;;  %v1458_v55 = vadd.f32 %v1047_v47, %v790_v36 }
 0x19f   : > { %v3103_v46 = vpop.f32.mrf.mxu0 }
 0x1a0   : > { %4076 = vst [vmem:[#allocation20_spill] sm:$0xff] %v3103_v46  ;;  %v1477_v52 = vadd.f32 %v1461_v25, %v1093_v15  ;;  %v1474_v15 = vadd.f32 %v1458_v55, %v1090_v1 }
 0x1a2   : > { %v2349_v42 = vmul.f32 -1.442695, %v1477_v52  ;;  %v2346_v50 = vmul.f32 -1.442695, %v1474_v15 }
 0x1a4   : > { %2588 = vpow2.f32 %v2349_v42 }
 0x1a5   : > { %v800_v58 = vpop.f32.mrf.mxu3  ;;  %2590 = vpow2.f32 %v2347_v2 }
 0x1a6   : > { %v1462_v11 = vadd.f32 %v1057_v23, %v800_v58  ;;  %2592 = vrcp.f32 %v3111_v31 }
 0x1a7   : > { %v3116_v36 = vpop.f32.mrf.mxu0  ;;  %2594 = vpow2.f32 %v2348_v9 }
 0x1a8   : > { %4077 = vst [vmem:[#allocation21_spill] sm:$0xff] %v3116_v36  ;;  %v1478_v25 = vadd.f32 %v1462_v11, %v1094_v6  ;;  %2596 = vpow2.f32 %v2345_v18 }
 0x1aa   : > { %v2589_v34 = vpop.eup %2588  ;;  %v2350_v47 = vmul.f32 -1.442695, %v1478_v25  ;;  %v1062_v25 = vpop.f32.mrf.mxu2 }
 0x1ab   : > { %v3119_v52 = vadd.f32 1.0, %v2589_v34  ;;  %v2591_v62 = vpop.eup %2590 }
 0x1ac   : > { %2598 = vpow2.f32 %v2350_v47  ;;  %v3127_v55 = vpop.eup %2592  ;;  %v3132_v9 = vadd.f32 1.0, %v2591_v62 }
 0x1ad   : > { %2600 = vrcp.f32 %v3119_v52  ;;  %v803_v23 = vpop.f32.mrf.mxu3  ;;  %v2595_v1 = vpop.eup %2594  ;;  %v1636_v62 = vmul.f32 %v3127_v55, %v3111_v31  ;;  %vm1730_vm0 = vweird.f32 %v3119_v52  ;;  %v1736_v63 = vand.u32 2147483648, %v3119_v52 }
 0x1ae   : > { %2602 = vpow2.f32 %v2346_v50  ;;  %v1463_v42 = vadd.f32 %v1060_v38, %v803_v23  ;;  %v2597_v58 = vpop.eup %2596  ;;  %v3138_v38 = vadd.f32 1.0, %v2595_v1  ;;  %v1096_v23 = vld [vmem:[%s4055_s4 + $0xf8] sm:$0xff]  ;;  %vm1700_vm11 = vweird.f32 %v3132_v9 }
 0x1af   : > { %v3129_v56 = vpop.f32.mrf.mxu0  ;;  %2604 = vrcp.f32 %v3121_v53  ;;  %v3142_v47 = vadd.f32 1.0, %v2597_v58  ;;  %v1637_v7 = vsub.f32 1.0, %v1636_v62 }
 0x1b0   : > { %4078 = vst [vmem:[#allocation22_spill] sm:$0xff] %v3129_v56  ;;  %v1479_v2 = vadd.f32 %v1463_v42, %v1095_v61  ;;  %vm1715_vm15 = vweird.f32 %v3138_v38 }
 0x1b1   : > { %v1638_v62 = vmul.f32 %v3127_v55, %v1637_v7 }
 0x1b2   : > { %v2599_v6 = vpop.eup %2598  ;;  %v2351_v11 = vmul.f32 -1.442695, %v1479_v2 }
 0x1b3   : > { %v3134_v15 = vpop.eup %2600  ;;  %v3136_v18 = vadd.f32 1.0, %v2599_v6 }
 0x1b4   : > { %v2603_v35 = vpop.eup %2602  ;;  %2606 = vpow2.f32 %v2351_v11  ;;  %v1726_v34 = vmul.f32 %v3134_v15, %v3119_v52  ;;  %vm1731_vm1 = vweird.f32 %v3134_v15 }
 0x1b5   : > { %2608 = vrcp.f32 %v3136_v18  ;;  %v805_v50 = vpop.f32.mrf.mxu3  ;;  %v3151_v42 = vpop.eup %2604  ;;  %v3153_v1 = vadd.f32 1.0, %v2603_v35  ;;  %vm3188_vm2 = vmor %vm1730_vm0, %vm1731_vm1  ;;  %vm1745_vm4 = vweird.f32 %v3136_v18 }
 0x1b6   : > { %2610 = vrcp.f32 %v3132_v9  ;;  %v1464_v61 = vadd.f32 %v1062_v25, %v805_v50  ;;  %v1727_v6 = vsub.f32 1.0, %v1726_v34  ;;  %v1651_v25 = vmul.f32 %v3151_v42, %v3121_v53 }
 0x1b7   : > { %v3155_v2 = vpop.f32.mrf.mxu0  ;;  %2612 = vrcp.f32 %v3138_v38 }
 0x1b8   : > { %4079 = vst [vmem:[#allocation23_spill] sm:$0xff] %v3155_v2  ;;  %v1480_v58 = vadd.f32 %v1464_v61, %v1096_v23  ;;  %2614 = vrcp.f32 %v3142_v47  ;;  %v1728_v23 = vmul.f32 %v3134_v15, %v1727_v6 }
 0x1b9   : > { %2616 = vrcp.f32 %v3153_v1 }
 0x1ba   : > { %v2607_v11 = vpop.eup %2606  ;;  %v2352_v8 = vmul.f32 -1.442695, %v1480_v58  ;;  %v1652_v58 = vsub.f32 1.0, %v1651_v25  ;;  %v1729_v0 = vadd.f32 %v3134_v15, %v1728_v23  ;;  %v3200_v23 = vadd.f32 %v3127_v55, %v1638_v62 }
 0x1bb   : > { %v3161_v50 = vpop.eup %2608  ;;  %v3164_v35 = vadd.f32 1.0, %v2607_v11 }
 0x1bc   : > { %v3166_v5 = vpop.eup %2610  ;;  %2618 = vpow2.f32 %v2352_v8  ;;  %v1741_v34 = vmul.f32 %v3161_v50, %v3136_v18  ;;  %v1734_v8 = vand.u32 2147483647, %v3119_v52  ;;  %v3204_v36 = vmul.f32 %v3151_v42, %v1652_v58 }
 0x1bd   : > { %2620 = vrcp.f32 %v3164_v35  ;;  %v3172_v61 = vpop.eup %2612  ;;  %v1696_v6 = vmul.f32 %v3166_v5, %v3132_v9  ;;  %v1764_v59 = vand.u32 2147483647, %v3164_v35  ;;  %v1733_v58 = vsel %vm3188_vm2, %v3134_v15, %v1729_v0 }
 0x1be   : > { %v3177_v11 = vpop.eup %2614  ;;  %v1742_v7 = vsub.f32 1.0, %v1741_v34  ;;  %v1711_v25 = vmul.f32 %v3172_v61, %v3138_v38  ;;  %vm3210_vm3 = vcmp.eq.f32.partialorder %v1734_v8, 8.507059e+37  ;;  %v1737_v52 = vor.u32 1.1754944e-38, %v1736_v63 }
 0x1bf   : > { %v3179_v3 = vpop.f32.mrf.mxu0  ;;  %v3186_v2 = vpop.eup %2616  ;;  %v3197_v57 = vmul.f32 %v3177_v11, %v3142_v47  ;;  %v1697_v51 = vsub.f32 1.0, %v1696_v6  ;;  %v1751_v6 = vand.u32 2147483648, %v3136_v18  ;;  %vm1746_vm5 = vweird.f32 %v3161_v50 }
 0x1c0   : > { %4080 = vst [vmem:[#allocation24_spill] sm:$0xff] %v3179_v3  ;;  %v1749_v3 = vand.u32 2147483647, %v3136_v18  ;;  %v1743_v8 = vmul.f32 %v3161_v50, %v1742_v7  ;;  %v1712_v48 = vsub.f32 1.0, %v1711_v25  ;;  %v3228_v39 = vmul.f32 %v3186_v2, %v3153_v1  ;;  %vm3251_vm10 = vmor %vm1745_vm4, %vm1746_vm5 }
 0x1c1   : > { %v1667_v43 = vsub.f32 1.0, %v3197_v57  ;;  %v1698_v63 = vmul.f32 %v3166_v5, %v1697_v51  ;;  %vm1760_vm7 = vweird.f32 %v3164_v35  ;;  %v1738_v57 = vsel %vm3210_vm3, %v1737_v52, %v1733_v58 }
 0x1c2   : > { %v2619_v56 = vpop.eup %2618  ;;  %vm3234_vm6 = vcmp.eq.f32.partialorder %v1749_v3, 8.507059e+37  ;;  %vm3244_vm9 = vcmp.eq.f32.partialorder %v1764_v59, 8.507059e+37  ;;  %v1744_v3 = vadd.f32 %v3161_v50, %v1743_v8  ;;  %v1713_v7 = vmul.f32 %v3172_v61, %v1712_v48 }
 0x1c3   : > { %v3206_v54 = vpop.eup %2620  ;;  %v3208_v34 = vadd.f32 1.0, %v2619_v56  ;;  %v1766_v56 = vand.u32 2147483648, %v3164_v35  ;;  %vm1701_vm12 = vweird.f32 %v3166_v5  ;;  %v1699_v48 = vadd.f32 %v3166_v5, %v1698_v63 }
 0x1c4   : > { %v1756_v62 = vmul.f32 %v3206_v54, %v3164_v35  ;;  %vm1761_vm8 = vweird.f32 %v3206_v54  ;;  %v1752_v35 = vor.u32 1.1754944e-38, %v1751_v6  ;;  %v1704_v25 = vand.u32 2147483647, %v3132_v9  ;;  %vm3282_vm2 = vmor %vm1700_vm11, %vm1701_vm12 }
 0x1c5   : > { %2622 = vrcp.f32 %v3208_v34  ;;  %v1767_v18 = vor.u32 1.1754944e-38, %v1766_v56  ;;  %vm3257_vm13 = vmor %vm1760_vm7, %vm1761_vm8  ;;  %vm1775_vm14 = vweird.f32 %v3208_v34  ;;  %v1706_v52 = vand.u32 2147483648, %v3132_v9 }
 0x1c6   : > { %v1757_v49 = vsub.f32 1.0, %v1756_v62  ;;  %v1779_v58 = vand.u32 2147483647, %v3208_v34  ;;  %vm1716_vm0 = vweird.f32 %v3172_v61  ;;  %v1781_v56 = vand.u32 2147483648, %v3208_v34 }
 0x1c7   : > { %v3230_v37 = vpop.f32.mrf.mxu0  ;;  %v1748_v8 = vsel %vm3251_vm10, %v3161_v50, %v1744_v3  ;;  %v1714_v6 = vadd.f32 %v3172_v61, %v1713_v7  ;;  %v1721_v63 = vand.u32 2147483648, %v3138_v38  ;;  %v1719_v50 = vand.u32 2147483647, %v3138_v38  ;;  %vm3294_vm5 = vmor %vm1715_vm15, %vm1716_vm0 }
 0x1c8   : > { %4085 = vst [vmem:[#allocation25_spill] sm:$0xff] %v3230_v37  ;;  %v1758_v0 = vmul.f32 %v3206_v54, %v1757_v49  ;;  %vm1640_vm3 = vweird.f32 %v3111_v31  ;;  %vm1641_vm4 = vweird.f32 %v3127_v55  ;;  %v1668_v9 = vmul.f32 %v3177_v11, %v1667_v43 }
 0x1c9   : > { %v1682_v49 = vsub.f32 1.0, %v3228_v39  ;;  %vm3303_vm7 = vcmp.eq.f32.partialorder %v1704_v25, 8.507059e+37  ;;  %v1782_v39 = vor.u32 1.1754944e-38, %v1781_v56  ;;  %v1722_v60 = vor.u32 1.1754944e-38, %v1721_v63 }
 0x1ca   : > { %v1759_v51 = vadd.f32 %v3206_v54, %v1758_v0  ;;  %v1718_v15 = vsel %vm3294_vm5, %v3172_v61, %v1714_v6  ;;  %vm1670_vm10 = vweird.f32 %v3142_v47  ;;  %vm1671_vm11 = vweird.f32 %v3177_v11 }
 0x1cb   : > { %v2623_v59 = vpop.eup %2622  ;;  %vm1685_vm12 = vweird.f32 %v3153_v1  ;;  %v1691_v6 = vand.u32 2147483648, %v3153_v1  ;;  %vm1655_vm0 = vweird.f32 %v3121_v53 }
 0x1cc   : > { %v1771_v62 = vmul.f32 %v2623_v59, %v3208_v34  ;;  %v1763_v0 = vsel %vm3257_vm13, %v3206_v54, %v1759_v51  ;;  %vm1776_vm1 = vweird.f32 %v2623_v59  ;;  %v1797_v54 = vmul.f32 %v1738_v57, %v2892_v28 }
 0x1cd   : > { %v1676_v51 = vand.u32 2147483648, %v3142_v47  ;;  %v1707_v28 = vor.u32 1.1754944e-38, %v1706_v52  ;;  %v1768_v38 = vsel %vm3244_vm9, %v1767_v18, %v1763_v0  ;;  %vm3312_vm8 = vmor %vm1775_vm14, %vm1776_vm1  ;;  %vm1720_vm9 = vcmp.eq.f32.partialorder %v1719_v50, 8.507059e+37 }
 0x1ce   : > { %v1772_v37 = vsub.f32 1.0, %v1771_v62  ;;  %v1753_v62 = vsel %vm3234_vm6, %v1752_v35, %v1748_v8  ;;  %vm1780_vm6 = vcmp.eq.f32.partialorder %v1779_v58, 8.507059e+37  ;;  %v1683_v34 = vmul.f32 %v3186_v2, %v1682_v49  ;;  %vm3335_vm14 = vmor %vm1670_vm10, %vm1671_vm11  ;;  %v1085_v8 = vld [vmem:[%s4055_s4 + $0xa0] sm:$0xff] }
 0x1cf   : > { %v3289_v3 = vpop.f32.mrf.mxu0  ;;  %v1798_v18 = vmul.f32 %v1753_v62, %v2894_v29  ;;  %v1669_v29 = vadd.f32 %v3177_v11, %v1668_v9  ;;  %vm1686_vm13 = vweird.f32 %v3186_v2  ;;  %v1689_v58 = vand.u32 2147483647, %v3153_v1 }
 0x1d0   : > { %4096 = vst [vmem:[#allocation26_spill] sm:$0xff] %v3289_v3  ;;  %v1773_v46 = vmul.f32 %v2623_v59, %v1772_v37  ;;  %v1703_v37 = vsel %vm3282_vm2, %v3166_v5, %v1699_v48  ;;  %v1799_v5 = vmul.f32 %v1768_v38, %v2883_v20  ;;  %v1723_v48 = vsel %vm1720_vm9, %v1722_v60, %v1718_v15  ;;  %vm3344_vm15 = vmor %vm1685_vm12, %vm1686_vm13 }
 0x1d1   : > { %v1708_v35 = vsel %vm3303_vm7, %v1707_v28, %v1703_v37  ;;  %v1684_v20 = vadd.f32 %v3186_v2, %v1683_v34  ;;  %vm1656_vm1 = vweird.f32 %v3151_v42  ;;  %v1807_v63 = vpack.c.bf16 %v1798_v18, %v1797_v54  ;;  %vm3361_vm2 = vmor %vm1640_vm3, %vm1641_vm4 }
 0x1d2   : > { %v1774_v57 = vadd.f32 %v2623_v59, %v1773_v46  ;;  %v1659_v0 = vand.u32 2147483647, %v3121_v53  ;;  %v1661_v50 = vand.u32 2147483648, %v3121_v53  ;;  %v1795_v3 = vmul.f32 %v1708_v35, %v2896_v30  ;;  %v1082_v35 = vld [vmem:[%s4055_s4 + $0x88] sm:$0xff] }
 0x1d3   : > { %v1796_v7 = vmul.f32 %v1723_v48, %v2900_v32  ;;  %v1677_v9 = vor.u32 1.1754944e-38, %v1676_v51  ;;  %v1692_v49 = vor.u32 1.1754944e-38, %v1691_v6  ;;  %v1673_v1 = vsel %vm3335_vm14, %v3177_v11, %v1669_v29 }
 0x1d4   : > { %v1778_v33 = vsel %vm3312_vm8, %v2623_v59, %v1774_v57  ;;  %v1674_v59 = vand.u32 2147483647, %v3142_v47  ;;  %v1688_v30 = vsel %vm3344_vm15, %v3186_v2, %v1684_v20  ;;  %vm1690_vm7 = vcmp.eq.f32.partialorder %v1689_v58, 8.507059e+37  ;;  %vm3375_vm8 = vmor %vm1655_vm0, %vm1656_vm1 }
 0x1d5   : > { %v1783_v61 = vsel %vm1780_vm6, %v1782_v39, %v1778_v33  ;;  %v1643_v54 = vsel %vm3361_vm2, %v3127_v55, %v3200_v23  ;;  %v1693_v51 = vsel %vm1690_vm7, %v1692_v49, %v1688_v30  ;;  %v4111_v46 = vand.u32 2147483648, %v3111_v31  ;;  %v1086_v49 = vld [vmem:[%s4055_s4 + $0xa8] sm:$0xff] }
 0x1d6   : > { %v1800_v25 = vmul.f32 %v1783_v61, %v2886_v22  ;;  %v1654_v22 = vadd.f32 %v3151_v42, %v3204_v36  ;;  %vm1675_vm5 = vcmp.eq.f32.partialorder %v1674_v59, 8.507059e+37  ;;  %v1662_v2 = vor.u32 1.1754944e-38, %v1661_v50 }
 0x1d7   : > { %v3342_v56 = vpop.f32.mrf.mxu0  ;;  %v1678_v11 = vsel %vm1675_vm5, %v1677_v9, %v1673_v1  ;;  %v1647_v62 = vor.u32 1.1754944e-38, %v4111_v46  ;;  %v1806_v28 = vpack.c.bf16 %v1796_v7, %v1795_v3  ;;  %v4112_v38 = vand.u32 2147483647, %v3111_v31 }
 0x1d8   : > { %v1808_v47 = vpack.c.bf16 %v1800_v25, %v1799_v5  ;;  %v1658_v53 = vsel %vm3375_vm8, %v3151_v42, %v1654_v22  ;;  %vm1660_vm4 = vcmp.eq.f32.partialorder %v1659_v0, 8.507059e+37  ;;  %v1793_v55 = vmul.f32 %v1678_v11, %v2907_v40  ;;  %v1081_v40 = vld [vmem:[%s4055_s4 + $0x80] sm:$0xff] }
 0x1d9   : > { %vm1645_vm3 = vcmp.eq.f32.partialorder %v4112_v38, 8.507059e+37  ;;  %v1794_v23 = vmul.f32 %v1693_v51, %v2909_v41  ;;  %v1663_v37 = vsel %vm1660_vm4, %v1662_v2, %v1658_v53  ;;  %v2406_v38 = vld [vmem:[%s4052_s1 + $0x80] sm:$0xff] }
 0x1da   : > { %1873 = vmatpush.bf16.msrb.mxu2 %v1808_v47  ;;  %v1648_v39 = vsel %vm1645_vm3, %v1647_v62, %v1643_v54  ;;  %v1792_v31 = vmul.f32 %v1663_v37, %v2915_v45  ;;  %807 = vmatmul.bf16.gmra.mxu3 %v2406_v38 }
 0x1db   : > { %v1805_v60 = vpack.c.bf16 %v1794_v23, %v1793_v55  ;;  %v1791_v57 = vmul.f32 %v1648_v39, %v2913_v44  ;;  %v1083_v44 = vld [vmem:[%s4055_s4 + $0x90] sm:$0xff] }
 0x1dd   : > { %v1804_v18 = vpack.c.bf16 %v1792_v31, %v1791_v57 }
 0x1de   : > { %1874 = vmatpush.bf16.msrb.mxu2 %v1807_v63 }
 0x1df   : > { %v3390_v43 = vpop.f32.mrf.mxu0 }
 0x1e2   : > { %1875 = vmatpush.bf16.msrb.mxu2 %v1806_v28 }
 0x1e6   : > { %1876 = vmatpush.bf16.msrb.mxu2 %v1805_v60 }
 0x1e7   : > { %v768_v15 = vpop.f32.mrf.mxu0 }
 0x1e8   : > { %v1449_v33 = vadd.f32 %v3050_v10, %v768_v15  ;;  %v1084_v10 = vld [vmem:[%s4055_s4 + $0x98] sm:$0xff] }
 0x1ea   : > { %1877 = vmatpush.bf16.msrb.mxu2 %v1804_v18  ;;  %v1465_v45 = vadd.f32 %v1449_v33, %v1081_v40 }
 0x1ec   : > { %v2337_v25 = vmul.f32 -1.442695, %v1465_v45 }
 0x1ee   : > { %2624 = vpow2.f32 %v2337_v25 }
 0x1ef   : > { %v770_v42 = vpop.f32.mrf.mxu0 }
 0x1f0   : > { %v1450_v5 = vadd.f32 %v3055_v12, %v770_v42 }
 0x1f2   : > { %v1466_v29 = vadd.f32 %v1450_v5, %v1082_v35 }
 0x1f4   : > { %v2338_v59 = vmul.f32 -1.442695, %v1466_v29  ;;  %v2625_v47 = vpop.eup %2624 }
 0x1f5   : > { %v3416_v3 = vadd.f32 1.0, %v2625_v47 }
 0x1f7   : > { %v773_v34 = vpop.f32.mrf.mxu0  ;;  %v1554_v40 = vand.u32 2147483647, %v3416_v3  ;;  %vm1550_vm1 = vweird.f32 %v3416_v3 }
 0x1f8   : > { %v1451_v41 = vadd.f32 %v3057_v13, %v773_v34 }
 0x1fa   : > { %v1467_v61 = vadd.f32 %v1451_v41, %v1083_v44 }
 0x1fc   : > { %v2339_v52 = vmul.f32 -1.442695, %v1467_v61 }
 0x1ff   : > { %v775_v48 = vpop.f32.mrf.mxu0 }
 0x200   : > { %v1452_v13 = vadd.f32 %v3064_v17, %v775_v48 }
 0x202   : > { %v1468_v12 = vadd.f32 %v1452_v13, %v1084_v10 }
 0x204   : > { %v2340_v20 = vmul.f32 -1.442695, %v1468_v12 }
 0x206   : > { %2626 = vpow2.f32 %v2340_v20 }
 0x207   : > { %2628 = vpow2.f32 %v2339_v52  ;;  %v778_v58 = vpop.f32.mrf.mxu0  ;;  %v2411_v52 = vld [vmem:[%s4052_s1 + $0xa8] sm:$0xff] }
 0x208   : > { %2630 = vpow2.f32 %v2338_v59  ;;  %v1453_v6 = vadd.f32 %v3068_v21, %v778_v58 }
 0x20a   : > { %v1469_v22 = vadd.f32 %v1453_v6, %v1085_v8 }
 0x20c   : > { %v2627_v63 = vpop.eup %2626  ;;  %v2341_v17 = vmul.f32 -1.442695, %v1469_v22 }
 0x20d   : > { %v2629_v0 = vpop.eup %2628  ;;  %v3418_v7 = vadd.f32 1.0, %v2627_v63  ;;  %v2407_v63 = vld [vmem:[%s4052_s1 + $0x88] sm:$0xff] }
 0x20e   : > { %v2631_v50 = vpop.eup %2630  ;;  %2632 = vpow2.f32 %v2341_v17  ;;  %v3423_v36 = vadd.f32 1.0, %v2629_v0  ;;  %812 = vmatmul.bf16.gmra.mxu3 %v2407_v63 }
 0x20f   : > { %v780_v9 = vpop.f32.mrf.mxu0  ;;  %v3426_v1 = vadd.f32 1.0, %v2631_v50  ;;  %2634 = vrcp.f32 %v3416_v3  ;;  %vm1595_vm14 = vweird.f32 %v3418_v7  ;;  %v1599_v58 = vand.u32 2147483647, %v3418_v7 }
 0x210   : > { %v1454_v21 = vadd.f32 %v3075_v27, %v780_v9  ;;  %2636 = vrcp.f32 %v3418_v7  ;;  %vm1580_vm6 = vweird.f32 %v3423_v36  ;;  %v1601_v8 = vand.u32 2147483648, %v3418_v7  ;;  %v2436_v9 = vld [vmem:[%s4054_s3 + $0x30] sm:$0xff] }
 0x211   : > { %2638 = vrcp.f32 %v3423_v36  ;;  %v1569_v41 = vand.u32 2147483647, %v3426_v1  ;;  %v1571_v5 = vand.u32 2147483648, %v3426_v1  ;;  %vm1565_vm12 = vweird.f32 %v3426_v1 }
 0x212   : > { %v1470_v30 = vadd.f32 %v1454_v21, %v1086_v49  ;;  %2640 = vrcp.f32 %v3426_v1  ;;  %v1584_v0 = vand.u32 2147483647, %v3423_v36  ;;  %v1586_v50 = vand.u32 2147483648, %v3423_v36 }
 0x214   : > { %v2633_v32 = vpop.eup %2632  ;;  %v2342_v54 = vmul.f32 -1.442695, %v1470_v30 }
 0x215   : > { %v3432_v11 = vadd.f32 1.0, %v2633_v32  ;;  %v3435_v51 = vpop.eup %2634 }
 0x216   : > { %2642 = vpow2.f32 %v2342_v54  ;;  %v3437_v27 = vpop.eup %2636  ;;  %v1546_v39 = vmul.f32 %v3435_v51, %v3416_v3  ;;  %vm1551_vm11 = vweird.f32 %v3435_v51 }
 0x217   : > { %2644 = vrcp.f32 %v3432_v11  ;;  %v3439_v46 = vpop.eup %2638  ;;  %v1591_v28 = vmul.f32 %v3437_v27, %v3418_v7  ;;  %v1616_v29 = vand.u32 2147483648, %v3432_v11  ;;  %vm1596_vm15 = vweird.f32 %v3437_v27 }
 0x218   : > { %v3441_v62 = vpop.eup %2640  ;;  %v1576_v23 = vmul.f32 %v3439_v46, %v3423_v36  ;;  %v1547_v18 = vsub.f32 1.0, %v1546_v39  ;;  %vm1581_vm13 = vweird.f32 %v3439_v46  ;;  %vm1610_vm0 = vweird.f32 %v3432_v11  ;;  %vm3498_vm7 = vmor %vm1595_vm14, %vm1596_vm15  ;;  %v3528_v39 = vld [vmem:[#allocation2 + $0x50] sm:$0xff] }
 0x219   : > { %v1561_v60 = vmul.f32 %v3441_v62, %v3426_v1  ;;  %v1592_v31 = vsub.f32 1.0, %v1591_v28  ;;  %vm1566_vm9 = vweird.f32 %v3441_v62  ;;  %v1614_v13 = vand.u32 2147483647, %v3432_v11  ;;  %vm3508_vm4 = vmor %vm1580_vm6, %vm1581_vm13 }
 0x21a   : > { %v1577_v15 = vsub.f32 1.0, %v1576_v23  ;;  %v1548_v35 = vmul.f32 %v3435_v51, %v1547_v18  ;;  %v1617_v17 = vor.u32 1.1754944e-38, %v1616_v29  ;;  %vm1600_vm6 = vcmp.eq.f32.partialorder %v1599_v58, 8.507059e+37  ;;  %vm3524_vm13 = vmor %vm1565_vm12, %vm1566_vm9  ;;  %v2408_v29 = vld [vmem:[%s4052_s1 + $0x90] sm:$0xff]  ;;  %v2434_v58 = vld [vmem:[%s4054_s3 + $0x20] sm:$0xff] }
 0x21b   : > { %v1562_v34 = vsub.f32 1.0, %v1561_v60  ;;  %v1593_v33 = vmul.f32 %v3437_v27, %v1592_v31  ;;  %vm1615_vm8 = vcmp.eq.f32.partialorder %v1614_v13, 8.507059e+37  ;;  %v1556_v23 = vand.u32 2147483648, %v3416_v3  ;;  %vm1552_vm9 = vmor %vm1550_vm1, %vm1551_vm11  ;;  %v2430_v3 = vld [vmem:[%s4054_s3] sm:$0xff]  ;;  %v2431_v13 = vld [vmem:[%s4054_s3 + $0x8] sm:$0xff] }
 0x21c   : > { %v2643_v2 = vpop.eup %2642  ;;  %v1578_v45 = vmul.f32 %v3439_v46, %v1577_v15  ;;  %vm1585_vm15 = vcmp.eq.f32.partialorder %v1584_v0, 8.507059e+37  ;;  %v1572_v15 = vor.u32 1.1754944e-38, %v1571_v5  ;;  %vm1570_vm12 = vcmp.eq.f32.partialorder %v1569_v41, 8.507059e+37 }
 0x21d   : > { %v2645_v53 = vpop.eup %2644  ;;  %v3448_v55 = vadd.f32 1.0, %v2643_v2  ;;  %v1563_v10 = vmul.f32 %v3441_v62, %v1562_v34  ;;  %v1594_v12 = vadd.f32 %v3437_v27, %v1593_v33  ;;  %v1549_v2 = vadd.f32 %v3435_v51, %v1548_v35 }
 0x21e   : > { %v1606_v37 = vmul.f32 %v2645_v53, %v3432_v11  ;;  %vm1611_vm10 = vweird.f32 %v2645_v53  ;;  %v1579_v20 = vadd.f32 %v3439_v46, %v1578_v45  ;;  %v1602_v11 = vor.u32 1.1754944e-38, %v1601_v8  ;;  %v3549_v45 = vld [vmem:[#allocation2 + $0x58] sm:$0xff]  ;;  %817 = vmatmul.bf16.gmra.mxu3 %v2408_v29 }
 0x21f   : > { %2646 = vrcp.f32 %v3448_v55  ;;  %vm3478_vm2 = vmor %vm1610_vm0, %vm1611_vm10  ;;  %v1631_v59 = vand.u32 2147483648, %v3448_v55  ;;  %v1629_v47 = vand.u32 2147483647, %v3448_v55  ;;  %v1564_v49 = vadd.f32 %v3441_v62, %v1563_v10  ;;  %v2413_v8 = vld [vmem:[%s4052_s1 + $0xb8] sm:$0xff] }
 0x220   : > { %v1607_v57 = vsub.f32 1.0, %v1606_v37  ;;  %vm1625_vm3 = vweird.f32 %v3448_v55  ;;  %v1598_v7 = vsel %vm3498_vm7, %v3437_v27, %v1594_v12  ;;  %v1583_v36 = vsel %vm3508_vm4, %v3439_v46, %v1579_v20  ;;  %v3531_v46 = vld [vmem:[#allocation2 + $0x68] sm:$0xff]  ;;  %v2432_v12 = vld [vmem:[%s4054_s3 + $0x10] sm:$0xff] }
 0x221   : > { %v1632_v54 = vor.u32 1.1754944e-38, %v1631_v59  ;;  %vm1630_vm14 = vcmp.eq.f32.partialorder %v1629_v47, 8.507059e+37  ;;  %v1553_v33 = vsel %vm1552_vm9, %v3435_v51, %v1549_v2  ;;  %vm1555_vm11 = vcmp.eq.f32.partialorder %v1554_v40, 8.507059e+37  ;;  %v3557_v51 = vld [vmem:[#allocation2 + $0x30] sm:$0xff]  ;;  %v2409_v40 = vld [vmem:[%s4052_s1 + $0x98] sm:$0xff]  ;;  %v1065_v47 = vld [vmem:[%s4055_s4] sm:$0xff] }
 0x222   : > { %v1608_v42 = vmul.f32 %v2645_v53, %v1607_v57  ;;  %v1568_v57 = vsel %vm3524_vm13, %v3441_v62, %v1564_v49  ;;  %v1557_v62 = vor.u32 1.1754944e-38, %v1556_v23  ;;  %v2433_v59 = vld [vmem:[%s4054_s3 + $0x18] sm:$0xff]  ;;  %v2412_v20 = vld [vmem:[%s4052_s1 + $0xb0] sm:$0xff]  ;;  %v1114_v0 = vadd.f32 %v2962_v14, %v3066_v19  ;;  %v4124_v27 = vld [vmem:[#allocation4_spill] sm:$0xff] }
 0x223   : > { %v4123_v23 = vld [vmem:[#allocation17_spill] sm:$0xff] }
 0x224   : > { %v1609_v61 = vadd.f32 %v2645_v53, %v1608_v42  ;;  %v3543_v42 = vld [vmem:[#allocation2 + $0x18] sm:$0xff]  ;;  %v1558_v5 = vsel %vm1555_vm11, %v1557_v62, %v1553_v33 }
 0x225   : > { %v2647_v44 = vpop.eup %2646  ;;  %v1785_v1 = vmul.f32 %v3557_v51, %v1558_v5  ;;  %v4126_v5 = vld [vmem:[#allocation5_spill] sm:$0xff] }
 0x226   : > { %v1621_v48 = vmul.f32 %v2647_v44, %v3448_v55  ;;  %v1613_v6 = vsel %vm3478_vm2, %v2645_v53, %v1609_v61  ;;  %vm1626_vm5 = vweird.f32 %v2647_v44  ;;  %v1587_v53 = vor.u32 1.1754944e-38, %v1586_v50  ;;  %v1066_v50 = vld [vmem:[%s4055_s4 + $0x8] sm:$0xff] }
 0x227   : > { %v1618_v32 = vsel %vm1615_vm8, %v1617_v17, %v1613_v6  ;;  %vm1627_vm10 = vmor %vm1625_vm3, %vm1626_vm5  ;;  %v1603_v55 = vsel %vm1600_vm6, %v1602_v11, %v1598_v7  ;;  %v2435_v6 = vld [vmem:[%s4054_s3 + $0x28] sm:$0xff]  ;;  %v1130_v49 = vadd.f32 %v1114_v0, %v1066_v50  ;;  %v4122_v11 = vld [vmem:[#allocation3_spill] sm:$0xff] }
 0x228   : > { %v1622_v25 = vsub.f32 1.0, %v1621_v48  ;;  %v1789_v37 = vmul.f32 %v3528_v39, %v1618_v32  ;;  %v1588_v31 = vsel %vm1585_vm15, %v1587_v53, %v1583_v36  ;;  %v1788_v34 = vmul.f32 %v3543_v42, %v1603_v55  ;;  %v3554_v48 = vld [vmem:[#allocation2] sm:$0xff] }
 0x229   : > { %v1787_v35 = vmul.f32 %v3549_v45, %v1588_v31 }
 0x22a   : > { %v1623_v22 = vmul.f32 %v2647_v44, %v1622_v25  ;;  %v2410_v25 = vld [vmem:[%s4052_s1 + $0xa0] sm:$0xff] }
 0x22b   : > { %v1802_v61 = vpack.c.bf16 %v1788_v34, %v1787_v35  ;;  %v4125_v35 = vld [vmem:[#allocation18_spill] sm:$0xff] }
 0x22c   : > { %v1624_v21 = vadd.f32 %v2647_v44, %v1623_v22  ;;  %v1113_v22 = vadd.f32 %v2956_v4, %v3062_v16  ;;  %v2322_v4 = vmul.f32 -1.442695, %v1130_v49  ;;  %v1115_v16 = vadd.f32 %v2965_v24, %v3073_v26  ;;  %v2437_v24 = vld [vmem:[%s4054_s3 + $0x38] sm:$0xff] }
 0x22e   : > { %v1628_v28 = vsel %vm1627_vm10, %v2647_v44, %v1624_v21  ;;  %v1573_v44 = vsel %vm1570_vm12, %v1572_v15, %v1568_v57  ;;  %822 = vmatmul.bf16.gmra.mxu3 %v2409_v40  ;;  %v1129_v63 = vadd.f32 %v1113_v22, %v1065_v47  ;;  %v1067_v21 = vld [vmem:[%s4055_s4 + $0x10] sm:$0xff]  ;;  %v1069_v57 = vld [vmem:[%s4055_s4 + $0x20] sm:$0xff] }
 0x22f   : > { %v1633_v38 = vsel %vm1630_vm14, %v1632_v54, %v1628_v28  ;;  %v1786_v10 = vmul.f32 %v3554_v48, %v1573_v44  ;;  %v1131_v19 = vadd.f32 %v1115_v16, %v1067_v21  ;;  %v4121_v54 = vld [vmem:[#allocation16_spill] sm:$0xff]  ;;  %v1068_v28 = vld [vmem:[%s4055_s4 + $0x18] sm:$0xff]  ;;  %v1097_v22 = vld [vmem:[%s4055_s4 + $0x100] sm:$0xff] }
 0x230   : > { %v1790_v60 = vmul.f32 %v3531_v46, %v1633_v38  ;;  %v2321_v17 = vmul.f32 -1.442695, %v1129_v63  ;;  %v1116_v2 = vadd.f32 %v4122_v11, %v4121_v54 }
 0x231   : > { %v1801_v41 = vpack.c.bf16 %v1786_v10, %v1785_v1  ;;  %v2323_v32 = vmul.f32 -1.442695, %v1131_v19  ;;  %v1070_v10 = vld [vmem:[%s4055_s4 + $0x28] sm:$0xff] }
 0x232   : > { %v1803_v18 = vpack.c.bf16 %v1790_v60, %v1789_v37  ;;  %2648 = vpow2.f32 %v2321_v17  ;;  %v1132_v36 = vadd.f32 %v1116_v2, %v1068_v28  ;;  %v1117_v37 = vadd.f32 %v4124_v27, %v4123_v23  ;;  %v1071_v17 = vld [vmem:[%s4055_s4 + $0x30] sm:$0xff]  ;;  %v1098_v23 = vld [vmem:[%s4055_s4 + $0x108] sm:$0xff] }
 0x233   : > { %2650 = vpow2.f32 %v2322_v4 }
 0x234   : > { %1878 = vmatpush.bf16.msrb.mxu2 %v1803_v18  ;;  %v2324_v55 = vmul.f32 -1.442695, %v1132_v36  ;;  %v1133_v18 = vadd.f32 %v1117_v37, %v1069_v57  ;;  %v4130_v36 = vld [vmem:[#allocation7_spill] sm:$0xff]  ;;  %v1072_v37 = vld [vmem:[%s4055_s4 + $0x38] sm:$0xff] }
 0x236   : > { %v2325_v44 = vmul.f32 -1.442695, %v1133_v18 }
 0x238   : > { %1879 = vmatpush.bf16.msrb.mxu2 %v1802_v61  ;;  %v2649_v14 = vpop.eup %2648  ;;  %v1118_v61 = vadd.f32 %v4126_v5, %v4125_v35 }
 0x239   : > { %v1193_v30 = vadd.f32 1.0, %v2649_v14  ;;  %v2651_v26 = vpop.eup %2650 }
 0x23a   : > { %v3622_v38 = vadd.f32 1.0, %v2651_v26  ;;  %v1134_v40 = vadd.f32 %v1118_v61, %v1070_v10  ;;  %v4129_v26 = vld [vmem:[#allocation20_spill] sm:$0xff] }
 0x23b   : > { %2652 = vrcp.f32 %v1193_v30  ;;  %vm1214_vm1 = vweird.f32 %v1193_v30  ;;  %v1218_v47 = vand.u32 2147483647, %v1193_v30 }
 0x23c   : > { %1880 = vmatpush.bf16.msrb.mxu2 %v1801_v41  ;;  %2654 = vpow2.f32 %v2323_v32  ;;  %v1233_v2 = vand.u32 2147483647, %v3622_v38  ;;  %v1235_v28 = vand.u32 2147483648, %v3622_v38  ;;  %vm1229_vm8 = vweird.f32 %v3622_v38 }
 0x23d   : > { %2656 = vrcp.f32 %v3622_v38  ;;  %vm1219_vm5 = vcmp.eq.f32.partialorder %v1218_v47, 8.507059e+37  ;;  %v1099_v47 = vld [vmem:[%s4055_s4 + $0x110] sm:$0xff] }
 0x23e   : > { %827 = vmatmul.bf16.gmra.mxu3 %v2410_v25  ;;  %2658 = vpow2.f32 %v2324_v55  ;;  %vm1234_vm4 = vcmp.eq.f32.partialorder %v1233_v2, 8.507059e+37  ;;  %v1236_v5 = vor.u32 1.1754944e-38, %v1235_v28 }
 0x23f   : > { %1881 = vmatmul.bf16.vlgmr.msrb.gmra.mxu2 %v2430_v3 }
 0x241   : > { %v2653_v53 = vpop.eup %2652 }
 0x242   : > { %v2655_v31 = vpop.eup %2654  ;;  %v1210_v15 = vmul.f32 %v2653_v53, %v1193_v30  ;;  %vm1215_vm0 = vweird.f32 %v2653_v53 }
 0x243   : > { %v3632_v34 = vadd.f32 1.0, %v2655_v31  ;;  %v3634_v62 = vpop.eup %2656  ;;  %vm1216_vm2 = vmor %vm1214_vm1, %vm1215_vm0 }
 0x244   : > { %v1211_v33 = vsub.f32 1.0, %v1210_v15  ;;  %v2659_v1 = vpop.eup %2658  ;;  %v1225_v41 = vmul.f32 %v3634_v62, %v3622_v38  ;;  %vm1230_vm7 = vweird.f32 %v3634_v62 }
 0x245   : > { %2660 = vrcp.f32 %v3632_v34  ;;  %vm3682_vm3 = vmor %vm1229_vm8, %vm1230_vm7  ;;  %vm1244_vm14 = vweird.f32 %v3632_v34 }
 0x246   : > { %v1212_v29 = vmul.f32 %v2653_v53, %v1211_v33  ;;  %2662 = vpow2.f32 %v2325_v44  ;;  %v1226_v25 = vsub.f32 1.0, %v1225_v41 }
 0x248   : > { %v1227_v4 = vmul.f32 %v3634_v62, %v1226_v25 }
 0x24e   : > { %832 = vmatmul.bf16.gmra.mxu3 %v2411_v52  ;;  %v3648_v52 = vpop.eup %2660 }
 0x24f   : > { %1886 = vmatmul.bf16.gmra.mxu2 %v2431_v13  ;;  %v3646_v13 = vadd.f32 1.0, %v2659_v1  ;;  %v2663_v50 = vpop.eup %2662  ;;  %vm1245_vm10 = vweird.f32 %v3648_v52 }
 0x250   : > { %vm3714_vm6 = vmor %vm1244_vm14, %vm1245_vm10 }
 0x251   : > { %2664 = vrcp.f32 %v3646_v13  ;;  %vm1259_vm9 = vweird.f32 %v3646_v13 }
 0x257   : > { %v3668_v11 = vpop.eup %2664 }
 0x258   : > { %v1255_v18 = vmul.f32 %v3668_v11, %v3646_v13  ;;  %vm1260_vm15 = vweird.f32 %v3668_v11 }
 0x259   : > { %vm3746_vm12 = vmor %vm1259_vm9, %vm1260_vm15 }
 0x25d   : > { %v808_v7 = vpop.f32.mrf.mxu3 }
 0x25e   : > { %837 = vmatmul.bf16.gmra.mxu3 %v2412_v20  ;;  %v2326_v20 = vmul.f32 -1.442695, %v1134_v40  ;;  %v1256_v40 = vsub.f32 1.0, %v1255_v18 }
 0x25f   : > { %1891 = vmatmul.bf16.gmra.mxu2 %v2432_v12  ;;  %v1213_v12 = vadd.f32 %v2653_v53, %v1212_v29 }
 0x260   : > { %2666 = vpow2.f32 %v2326_v20  ;;  %v1250_v20 = vand.u32 2147483648, %v3632_v34 }
 0x261   : > { %v1217_v49 = vsel %vm1216_vm2, %v2653_v53, %v1213_v12  ;;  %v1120_v53 = vadd.f32 %v4130_v36, %v4129_v26 }
 0x263   : > { %v1136_v10 = vadd.f32 %v1120_v53, %v1072_v37  ;;  %v1265_v53 = vand.u32 2147483648, %v3646_v13 }
 0x265   : > { %v3626_v60 = vpop.f32.mrf.mxu3 }
 0x266   : > { %v2667_v15 = vpop.eup %2666 }
 0x267   : > { %v3696_v41 = vadd.f32 1.0, %v2667_v15  ;;  %v1100_v15 = vld [vmem:[%s4055_s4 + $0x118] sm:$0xff] }
 0x269   : > { %vm1289_vm8 = vweird.f32 %v3696_v41 }
 0x26e   : > { %842 = vmatmul.bf16.gmra.mxu3 %v2413_v8  ;;  %v4128_v8 = vld [vmem:[#allocation6_spill] sm:$0xff] }
 0x26f   : > { %1896 = vmatmul.bf16.gmra.mxu2 %v2433_v59  ;;  %v1220_v59 = vand.u32 2147483648, %v1193_v30  ;;  %v3664_v30 = vadd.f32 1.0, %v2663_v50 }
 0x271   : > { %v1221_v21 = vor.u32 1.1754944e-38, %v1220_v59  ;;  %v1248_v59 = vand.u32 2147483647, %v3632_v34  ;;  %vm1274_vm1 = vweird.f32 %v3664_v30 }
 0x273   : > { %v1222_v32 = vsel %vm1219_vm5, %v1221_v21, %v1217_v49  ;;  %vm1249_vm13 = vcmp.eq.f32.partialorder %v1248_v59, 8.507059e+37 }
 0x274   : > { %v1970_v55 = vsub.f32 1.0, %v1222_v32 }
 0x27f   : > { %1901 = vmatmul.bf16.gmra.mxu2 %v2434_v58  ;;  %v4127_v58 = vld [vmem:[#allocation19_spill] sm:$0xff] }
 0x28f   : > { %1906 = vmatmul.bf16.gmra.mxu2 %v2435_v6  ;;  %v1119_v6 = vadd.f32 %v4128_v8, %v4127_v58  ;;  %v2328_v58 = vmul.f32 -1.442695, %v1136_v10  ;;  %v4133_v8 = vld [vmem:[#allocation21_spill] sm:$0xff] }
 0x291   : > { %v3644_v3 = vpop.f32.mrf.mxu3  ;;  %v1135_v19 = vadd.f32 %v1119_v6, %v1071_v17  ;;  %v1073_v17 = vld [vmem:[%s4055_s4 + $0x40] sm:$0xff] }
 0x299   : > { %v3662_v16 = vpop.f32.mrf.mxu3 }
 0x29f   : > { %1911 = vmatmul.bf16.gmra.mxu2 %v2436_v9  ;;  %v1240_v9 = vmul.f32 %v3648_v52, %v3632_v34 }
 0x2a1   : > { %v1241_v54 = vsub.f32 1.0, %v1240_v9  ;;  %v3693_v44 = vpop.f32.mrf.mxu3 }
 0x2a3   : > { %v1242_v33 = vmul.f32 %v3648_v52, %v1241_v54 }
 0x2af   : > { %1916 = vmatmul.bf16.gmra.mxu2 %v2437_v24  ;;  %v2327_v24 = vmul.f32 -1.442695, %v1135_v19 }
 0x2c2   : > { %v1882_v63 = vpop.f32.mrf.mxu2 }
 0x2c3   : > { %v1922_v0 = vadd.f32 %v1882_v63, %v808_v7  ;;  %v1228_v7 = vadd.f32 %v3634_v62, %v1227_v4  ;;  %v1257_v4 = vmul.f32 %v3668_v11, %v1256_v40 }
 0x2c5   : > { %v1938_v14 = vadd.f32 %v1922_v0, %v1097_v22  ;;  %v1232_v38 = vsel %vm3682_vm3, %v3634_v62, %v1228_v7  ;;  %v1243_v62 = vadd.f32 %v3648_v52, %v1242_v33  ;;  %v1075_v0 = vld [vmem:[%s4055_s4 + $0x50] sm:$0xff] }
 0x2c6   : > { %v1237_v29 = vsel %vm1234_vm4, %v1236_v5, %v1232_v38  ;;  %v1074_v38 = vld [vmem:[%s4055_s4 + $0x48] sm:$0xff] }
 0x2c7   : > { %2668 = vtanh.f32 %v1938_v14  ;;  %v1971_v22 = vsub.f32 1.0, %v1237_v29  ;;  %v1247_v34 = vsel %vm3714_vm6, %v3648_v52, %v1243_v62  ;;  %v1251_v14 = vor.u32 1.1754944e-38, %v1250_v20 }
 0x2c8   : > { %2670 = vrcp.f32 %v3664_v30  ;;  %v1258_v52 = vadd.f32 %v3668_v11, %v1257_v4 }
 0x2c9   : > { %2672 = vpow2.f32 %v2327_v24  ;;  %v1987_v54 = vmul.f32 %v3554_v48, %v1971_v22  ;;  %v1252_v28 = vsel %vm1249_vm13, %v1251_v14, %v1247_v34  ;;  %v1263_v48 = vand.u32 2147483647, %v3646_v13  ;;  %v4142_v22 = vld [vmem:[#allocation10_spill] sm:$0xff] }
 0x2ca   : > { %v1884_v27 = vpop.f32.mrf.mxu2  ;;  %v1293_v13 = vand.u32 2147483647, %v3696_v41 }
 0x2cb   : > { %v1923_v31 = vadd.f32 %v1884_v27, %v3626_v60  ;;  %v1986_v60 = vmul.f32 %v3557_v51, %v1970_v55  ;;  %v4134_v51 = vld [vmem:[#allocation8_spill] sm:$0xff]  ;;  %v4138_v27 = vld [vmem:[#allocation9_spill] sm:$0xff]  ;;  %vm1264_vm11 = vcmp.eq.f32.partialorder %v1263_v48, 8.507059e+37 }
 0x2cc   : > { %v1121_v6 = vadd.f32 %v4134_v51, %v4133_v8  ;;  %vm1294_vm4 = vcmp.eq.f32.partialorder %v1293_v13, 8.507059e+37 }
 0x2cd   : > { %v2669_v35 = vpop.eup %2668  ;;  %v1939_v61 = vadd.f32 %v1923_v31, %v1098_v23  ;;  %v4137_v23 = vld [vmem:[#allocation22_spill] sm:$0xff]  ;;  %v1972_v31 = vsub.f32 1.0, %v1252_v28 }
 0x2ce   : > { %v2002_v1 = vmul.f32 %v2669_v35, %v1222_v32  ;;  %v3700_v12 = vpop.eup %2670  ;;  %v1137_v32 = vadd.f32 %v1121_v6, %v1073_v17  ;;  %v1122_v37 = vadd.f32 %v4138_v27, %v4137_v23  ;;  %v4141_v6 = vld [vmem:[#allocation23_spill] sm:$0xff]  ;;  %v4145_v27 = vld [vmem:[#allocation24_spill] sm:$0xff] }
 0x2cf   : > { %2674 = vtanh.f32 %v1939_v61  ;;  %v2673_v9 = vpop.eup %2672  ;;  %v1270_v49 = vmul.f32 %v3700_v12, %v3664_v30  ;;  %v1262_v61 = vsel %vm3746_vm12, %v3668_v11, %v1258_v52  ;;  %vm1275_vm0 = vweird.f32 %v3700_v12 }
 0x2d0   : > { %v2018_v25 = vadd.f32 %v2002_v1, %v1986_v60  ;;  %2676 = vrcp.f32 %v3696_v41  ;;  %v3728_v2 = vadd.f32 1.0, %v2673_v9  ;;  %v2329_v55 = vmul.f32 -1.442695, %v1137_v32  ;;  %v1101_v9 = vld [vmem:[%s4055_s4 + $0x120] sm:$0xff]  ;;  %vm3779_vm2 = vmor %vm1274_vm1, %vm1275_vm0 }
 0x2d1   : > { %2678 = vpow2.f32 %v2328_v58  ;;  %v1271_v24 = vsub.f32 1.0, %v1270_v49  ;;  %v1266_v1 = vor.u32 1.1754944e-38, %v1265_v53  ;;  %v1138_v40 = vadd.f32 %v1122_v37, %v1074_v38  ;;  %v4146_v37 = vld [vmem:[#allocation11_spill] sm:$0xff]  ;;  %v1102_v38 = vld [vmem:[%s4055_s4 + $0x128] sm:$0xff] }
 0x2d2   : > { %2034 = vst [vmem:[#allocation2 + $0x30] sm:$0xff] %v2018_v25  ;;  %v1887_v63 = vpop.f32.mrf.mxu2  ;;  %vm1304_vm14 = vweird.f32 %v3728_v2 }
 0x2d3   : > { %v1924_v50 = vadd.f32 %v1887_v63, %v3644_v3  ;;  %v3726_v3 = vpop.f32.mrf.mxu3  ;;  %v1272_v10 = vmul.f32 %v3700_v12, %v1271_v24  ;;  %v1267_v59 = vsel %vm1264_vm11, %v1266_v1, %v1262_v61  ;;  %v1280_v63 = vand.u32 2147483648, %v3664_v30 }
 0x2d4   : > { %v2330_v17 = vmul.f32 -1.442695, %v1138_v40 }
 0x2d5   : > { %v2675_v21 = vpop.eup %2674  ;;  %v1940_v19 = vadd.f32 %v1924_v50, %v1099_v47  ;;  %v1273_v8 = vadd.f32 %v3700_v12, %v1272_v10  ;;  %v1123_v47 = vadd.f32 %v4142_v22, %v4141_v6  ;;  %v1973_v50 = vsub.f32 1.0, %v1267_v59 }
 0x2d6   : > { %v2003_v7 = vmul.f32 %v2675_v21, %v1237_v29  ;;  %v3732_v36 = vpop.eup %2676 }
 0x2d7   : > { %2680 = vtanh.f32 %v1940_v19  ;;  %v2679_v35 = vpop.eup %2678  ;;  %v1285_v5 = vmul.f32 %v3732_v36, %v3696_v41  ;;  %v1277_v19 = vsel %vm3779_vm2, %v3700_v12, %v1273_v8  ;;  %v1989_v24 = vmul.f32 %v3543_v42, %v1973_v50 }
 0x2d8   : > { %v2019_v26 = vadd.f32 %v2003_v7, %v1987_v54  ;;  %2682 = vrcp.f32 %v3728_v2  ;;  %v3759_v62 = vadd.f32 1.0, %v2679_v35  ;;  %v1139_v54 = vadd.f32 %v1123_v47, %v1075_v0  ;;  %v1077_v0 = vld [vmem:[%s4055_s4 + $0x60] sm:$0xff] }
 0x2d9   : > { %2684 = vpow2.f32 %v2329_v55  ;;  %v1286_v20 = vsub.f32 1.0, %v1285_v5  ;;  %v1281_v7 = vor.u32 1.1754944e-38, %v1280_v63  ;;  %vm1290_vm7 = vweird.f32 %v3732_v36  ;;  %v4150_v63 = vld [vmem:[#allocation12_spill] sm:$0xff] }
 0x2da   : > { %2035 = vst [vmem:[#allocation2] sm:$0xff] %v2019_v26  ;;  %v2473_v57 = vpack.c.bf16 %v2019_v26, %v2018_v25  ;;  %v1889_v18 = vpop.f32.mrf.mxu2  ;;  %v1988_v25 = vmul.f32 %v3549_v45, %v1972_v31  ;;  %v1278_v45 = vand.u32 2147483647, %v3664_v30  ;;  %v2331_v23 = vmul.f32 -1.442695, %v1139_v54  ;;  %v1076_v31 = vld [vmem:[%s4055_s4 + $0x58] sm:$0xff]  ;;  %vm3813_vm3 = vmor %vm1289_vm8, %vm1290_vm7 }
 0x2db   : > { %v1925_v33 = vadd.f32 %v1889_v18, %v3662_v16  ;;  %v3763_v11 = vpop.f32.mrf.mxu3  ;;  %v1287_v32 = vmul.f32 %v3732_v36, %v1286_v20  ;;  %v1295_v42 = vand.u32 2147483648, %v3696_v41  ;;  %vm1319_vm9 = vweird.f32 %v3759_v62 }
 0x2dc   : > { %2474 = vst [vmem:[%s2830_s14] sm:$0xff] %v2473_v57   ;;  %vm1279_vm5 = vcmp.eq.f32.partialorder %v1278_v45, 8.507059e+37  ;;  %v1124_v57 = vadd.f32 %v4146_v37, %v4145_v27  ;;  %v4149_v45 = vld [vmem:[#allocation25_spill] sm:$0xff]  ;;  %v4153_v37 = vld [vmem:[#allocation26_spill] sm:$0xff]  ;;  %v1323_v13 = vand.u32 2147483647, %v3759_v62 }
 0x2dd   : > { %v2681_v60 = vpop.eup %2680  ;;  %v1941_v29 = vadd.f32 %v1925_v33, %v1100_v15  ;;  %v1282_v52 = vsel %vm1279_vm5, %v1281_v7, %v1277_v19  ;;  %v1288_v55 = vadd.f32 %v3732_v36, %v1287_v32 }
 0x2de   : > { %v2004_v16 = vmul.f32 %v2681_v60, %v1252_v28  ;;  %v3765_v51 = vpop.eup %2682  ;;  %v1974_v18 = vsub.f32 1.0, %v1282_v52  ;;  %v1140_v40 = vadd.f32 %v1124_v57, %v1076_v31  ;;  %v4154_v57 = vld [vmem:[#allocation13_spill] sm:$0xff]  ;;  %v1078_v31 = vld [vmem:[%s4055_s4 + $0x68] sm:$0xff]  ;;  %vm1324_vm11 = vcmp.eq.f32.partialorder %v1323_v13, 8.507059e+37 }
 0x2df   : > { %2686 = vtanh.f32 %v1941_v29  ;;  %v2685_v21 = vpop.eup %2684  ;;  %v1300_v14 = vmul.f32 %v3765_v51, %v3728_v2  ;;  %v1292_v41 = vsel %vm3813_vm3, %v3732_v36, %v1288_v55  ;;  %vm1305_vm10 = vweird.f32 %v3765_v51 }
 0x2e0   : > { %v2020_v58 = vadd.f32 %v2004_v16, %v1988_v25  ;;  %2688 = vrcp.f32 %v3759_v62  ;;  %v1296_v25 = vor.u32 1.1754944e-38, %v1295_v42  ;;  %v2332_v47 = vmul.f32 -1.442695, %v1140_v40  ;;  %vm3844_vm6 = vmor %vm1304_vm14, %vm1305_vm10 }
 0x2e1   : > { %2690 = vpow2.f32 %v2330_v17  ;;  %v1301_v48 = vsub.f32 1.0, %v1300_v14  ;;  %v1125_v17 = vadd.f32 %v4150_v63, %v4149_v45  ;;  %v1126_v42 = vadd.f32 %v4154_v57, %v4153_v37  ;;  %v4157_v63 = vld [vmem:[#allocation14_spill] sm:$0xff]  ;;  %v4160_v37 = vld [vmem:[#allocation15_spill] sm:$0xff] }
 0x2e2   : > { %2036 = vst [vmem:[#allocation2 + $0x58] sm:$0xff] %v2020_v58  ;;  %v1892_v49 = vpop.f32.mrf.mxu2  ;;  %v1128_v57 = vadd.f32 %v4160_v37, %v3390_v43 }
 0x2e3   : > { %v1926_v4 = vadd.f32 %v1892_v49, %v3693_v44  ;;  %v3791_v44 = vadd.f32 1.0, %v2685_v21  ;;  %v3808_v35 = vpop.f32.mrf.mxu3  ;;  %v1302_v1 = vmul.f32 %v3765_v51, %v1301_v48  ;;  %v1308_v49 = vand.u32 2147483647, %v3728_v2 }
 0x2e4   : > { %v1141_v7 = vadd.f32 %v1125_v17, %v1077_v0  ;;  %v1127_v17 = vadd.f32 %v4157_v63, %v3342_v56  ;;  %v1079_v0 = vld [vmem:[%s4055_s4 + $0x70] sm:$0xff] }
 0x2e5   : > { %v2687_v30 = vpop.eup %2686  ;;  %v1942_v28 = vadd.f32 %v1926_v4, %v1101_v9  ;;  %v1303_v22 = vadd.f32 %v3765_v51, %v1302_v1  ;;  %v1103_v9 = vld [vmem:[%s4055_s4 + $0x130] sm:$0xff]  ;;  %vm1309_vm13 = vcmp.eq.f32.partialorder %v1308_v49, 8.507059e+37  ;;  %vm1334_vm1 = vweird.f32 %v3791_v44 }
 0x2e6   : > { %v2005_v26 = vmul.f32 %v2687_v30, %v1267_v59  ;;  %v3795_v12 = vpop.eup %2688  ;;  %v1990_v59 = vmul.f32 %v3528_v39, %v1974_v18  ;;  %v1310_v39 = vand.u32 2147483648, %v3728_v2  ;;  %v2333_v27 = vmul.f32 -1.442695, %v1141_v7 }
 0x2e7   : > { %2692 = vtanh.f32 %v1942_v28  ;;  %v2691_v10 = vpop.eup %2690  ;;  %v1315_v60 = vmul.f32 %v3795_v12, %v3759_v62  ;;  %v1307_v32 = vsel %vm3844_vm6, %v3765_v51, %v1303_v22  ;;  %vm1320_vm15 = vweird.f32 %v3795_v12 }
 0x2e8   : > { %v2021_v53 = vadd.f32 %v2005_v26, %v1989_v24  ;;  %2694 = vrcp.f32 %v3791_v44  ;;  %v1311_v28 = vor.u32 1.1754944e-38, %v1310_v39  ;;  %vm3876_vm12 = vmor %vm1319_vm9, %vm1320_vm15  ;;  %v1340_v39 = vand.u32 2147483648, %v3791_v44 }
 0x2e9   : > { %2696 = vpow2.f32 %v2331_v23  ;;  %v1316_v8 = vsub.f32 1.0, %v1315_v60  ;;  %v1338_v49 = vand.u32 2147483647, %v3791_v44 }
 0x2ea   : > { %2037 = vst [vmem:[#allocation2 + $0x18] sm:$0xff] %v2021_v53  ;;  %v2478_v15 = vpack.c.bf16 %v2021_v53, %v2020_v58  ;;  %v1894_v33 = vpop.f32.mrf.mxu2  ;;  %v1297_v58 = vsel %vm1294_vm4, %v1296_v25, %v1292_v41  ;;  %v1312_v48 = vsel %vm1309_vm13, %v1311_v28, %v1307_v32  ;;  %v2751_v28 = vld [vmem:[#allocation2 + $0x48] sm:$0xff] }
 0x2eb   : > { %v1927_v61 = vadd.f32 %v1894_v33, %v3726_v3  ;;  %v3826_v3 = vadd.f32 1.0, %v2691_v10  ;;  %v1975_v50 = vsub.f32 1.0, %v1297_v58  ;;  %v1317_v30 = vmul.f32 %v3795_v12, %v1316_v8  ;;  %v3855_v2 = vpop.f32.mrf.mxu3 }
 0x2ec   : > { %2517 = vst [vmem:[%s2830_s14 + $0x8] sm:$0xff] %v2478_v15   ;;  %v1976_v18 = vsub.f32 1.0, %v1312_v48  ;;  %vm1339_vm5 = vcmp.eq.f32.partialorder %v1338_v49, 8.507059e+37 }
 0x2ed   : > { %v2693_v29 = vpop.eup %2692  ;;  %v1943_v16 = vadd.f32 %v1927_v61, %v1102_v38  ;;  %v1991_v26 = vmul.f32 %v3531_v46, %v1975_v50  ;;  %v1318_v51 = vadd.f32 %v3795_v12, %v1317_v30  ;;  %v1325_v46 = vand.u32 2147483648, %v3759_v62  ;;  %v1104_v38 = vld [vmem:[%s4055_s4 + $0x138] sm:$0xff] }
 0x2ee   : > { %v2006_v20 = vmul.f32 %v2693_v29, %v1282_v52  ;;  %v3830_v36 = vpop.eup %2694  ;;  %v1142_v29 = vadd.f32 %v1126_v42, %v1078_v31  ;;  %v1143_v30 = vadd.f32 %v1127_v17, %v1079_v0  ;;  %v1355_v42 = vand.u32 2147483648, %v3826_v3 }
 0x2ef   : > { %2698 = vtanh.f32 %v1943_v16  ;;  %v2697_v14 = vpop.eup %2696  ;;  %v1330_v19 = vmul.f32 %v3830_v36, %v3791_v44  ;;  %v1322_v41 = vsel %vm3876_vm12, %v3795_v12, %v1318_v51  ;;  %v1326_v40 = vor.u32 1.1754944e-38, %v1325_v46  ;;  %v2750_v16 = vld [vmem:[#allocation2 + $0x8] sm:$0xff]  ;;  %v1080_v46 = vld [vmem:[%s4055_s4 + $0x78] sm:$0xff] }
 0x2f0   : > { %v2022_v6 = vadd.f32 %v2006_v20, %v1990_v59  ;;  %2700 = vrcp.f32 %v3826_v3  ;;  %v3858_v52 = vadd.f32 1.0, %v2697_v14  ;;  %v1992_v59 = vmul.f32 %v2750_v16, %v1976_v18  ;;  %v1106_v18 = vld [vmem:[%s4055_s4 + $0x148] sm:$0xff] }
 0x2f1   : > { %2702 = vpow2.f32 %v2332_v47  ;;  %v1331_v53 = vsub.f32 1.0, %v1330_v19  ;;  %v1327_v8 = vsel %vm1324_vm11, %v1326_v40, %v1322_v41  ;;  %vm1335_vm0 = vweird.f32 %v3830_v36 }
 0x2f2   : > { %2038 = vst [vmem:[#allocation2 + $0x50] sm:$0xff] %v2022_v6  ;;  %v1897_v34 = vpop.f32.mrf.mxu2  ;;  %v2334_v45 = vmul.f32 -1.442695, %v1142_v29  ;;  %v1977_v50 = vsub.f32 1.0, %v1327_v8  ;;  %vm3906_vm2 = vmor %vm1334_vm1, %vm1335_vm0  ;;  %vm1349_vm8 = vweird.f32 %v3826_v3  ;;  %v1144_v41 = vadd.f32 %v1128_v57, %v1080_v46  ;;  %v2752_v29 = vld [vmem:[#allocation2 + $0x40] sm:$0xff] }
 0x2f3   : > { %v1928_v21 = vadd.f32 %v1897_v34, %v3763_v11  ;;  %v1332_v62 = vmul.f32 %v3830_v36, %v1331_v53  ;;  %vm1364_vm14 = vweird.f32 %v3858_v52  ;;  %v1368_v63 = vand.u32 2147483647, %v3858_v52 }
 0x2f5   : > { %v2699_v54 = vpop.eup %2698  ;;  %v1944_v24 = vadd.f32 %v1928_v21, %v1103_v9  ;;  %v1333_v12 = vadd.f32 %v3830_v36, %v1332_v62  ;;  %v1105_v9 = vld [vmem:[%s4055_s4 + $0x140] sm:$0xff]  ;;  %v1356_v62 = vor.u32 1.1754944e-38, %v1355_v42  ;;  %vm1369_vm13 = vcmp.eq.f32.partialorder %v1368_v63, 8.507059e+37 }
 0x2f6   : > { %v2007_v11 = vmul.f32 %v2699_v54, %v1297_v58  ;;  %v3862_v23 = vpop.eup %2700  ;;  %v1341_v54 = vor.u32 1.1754944e-38, %v1340_v39 }
 0x2f7   : > { %2704 = vtanh.f32 %v1944_v24  ;;  %v2703_v10 = vpop.eup %2702  ;;  %v1345_v60 = vmul.f32 %v3862_v23, %v3826_v3  ;;  %v1337_v19 = vsel %vm3906_vm2, %v3830_v36, %v1333_v12  ;;  %v1993_v24 = vmul.f32 %v2751_v28, %v1977_v50 }
 0x2f8   : > { %v2023_v55 = vadd.f32 %v2007_v11, %v1991_v26  ;;  %2706 = vrcp.f32 %v3858_v52  ;;  %v3888_v58 = vadd.f32 1.0, %v2703_v10  ;;  %v1342_v11 = vsel %vm1339_vm5, %v1341_v54, %v1337_v19 }
 0x2f9   : > { %2708 = vpow2.f32 %v2333_v27  ;;  %vm1350_vm7 = vweird.f32 %v3862_v23  ;;  %v2335_v27 = vmul.f32 -1.442695, %v1143_v30 }
 0x2fa   : > { %2039 = vst [vmem:[#allocation2 + $0x68] sm:$0xff] %v2023_v55  ;;  %v2483_v15 = vpack.c.bf16 %v2023_v55, %v2022_v6  ;;  %v1899_v33 = vpop.f32.mrf.mxu2  ;;  %v1346_v6 = vsub.f32 1.0, %v1345_v60  ;;  %vm3937_vm3 = vmor %vm1349_vm8, %vm1350_vm7  ;;  %vm1379_vm9 = vweird.f32 %v3888_v58 }
 0x2fb   : > { %v1929_v61 = vadd.f32 %v1899_v33, %v3808_v35  ;;  %v830_v35 = vpop.f32.mrf.mxu3 }
 0x2fc   : > { %2518 = vst [vmem:[%s2830_s14 + $0x10] sm:$0xff] %v2483_v15   ;;  %v1347_v32 = vmul.f32 %v3862_v23, %v1346_v6  ;;  %v1978_v15 = vsub.f32 1.0, %v1342_v11  ;;  %v2336_v6 = vmul.f32 -1.442695, %v1144_v41 }
 0x2fd   : > { %v2705_v1 = vpop.eup %2704  ;;  %v1945_v25 = vadd.f32 %v1929_v61, %v1104_v38  ;;  %v1353_v38 = vand.u32 2147483647, %v3826_v3 }
 0x2fe   : > { %v2008_v20 = vmul.f32 %v2705_v1, %v1312_v48  ;;  %v3892_v47 = vpop.eup %2706  ;;  %v1348_v55 = vadd.f32 %v3862_v23, %v1347_v32  ;;  %v1994_v40 = vmul.f32 %v2752_v29, %v1978_v15 }
 0x2ff   : > { %2710 = vtanh.f32 %v1945_v25  ;;  %v2709_v21 = vpop.eup %2708  ;;  %v1360_v14 = vmul.f32 %v3892_v47, %v3858_v52  ;;  %vm1354_vm4 = vcmp.eq.f32.partialorder %v1353_v38, 8.507059e+37  ;;  %vm1365_vm10 = vweird.f32 %v3892_v47  ;;  %v2754_v38 = vld [vmem:[#allocation2 + $0x10] sm:$0xff] }
 0x300   : > { %v2024_v22 = vadd.f32 %v2008_v20, %v1992_v59  ;;  %2712 = vrcp.f32 %v3888_v58  ;;  %v1352_v10 = vsel %vm3937_vm3, %v3862_v23, %v1348_v55  ;;  %vm3961_vm6 = vmor %vm1364_vm14, %vm1365_vm10 }
 0x301   : > { %2714 = vpow2.f32 %v2334_v45  ;;  %v1361_v48 = vsub.f32 1.0, %v1360_v14  ;;  %v1357_v59 = vsel %vm1354_vm4, %v1356_v62, %v1352_v10  ;;  %v1107_v45 = vld [vmem:[%s4055_s4 + $0x150] sm:$0xff]  ;;  %v2753_v14 = vld [vmem:[#allocation2 + $0x20] sm:$0xff] }
 0x302   : > { %2040 = vst [vmem:[#allocation2 + $0x8] sm:$0xff] %v2024_v22  ;;  %v1902_v34 = vpop.f32.mrf.mxu2  ;;  %v1979_v12 = vsub.f32 1.0, %v1357_v59  ;;  %v1109_v62 = vld [vmem:[%s4055_s4 + $0x160] sm:$0xff] }
 0x303   : > { %v1930_v4 = vadd.f32 %v1902_v34, %v3855_v2  ;;  %v3917_v2 = vadd.f32 1.0, %v2709_v21  ;;  %v833_v36 = vpop.f32.mrf.mxu3  ;;  %v1362_v3 = vmul.f32 %v3892_v47, %v1361_v48  ;;  %v1108_v48 = vld [vmem:[%s4055_s4 + $0x158] sm:$0xff] }
 0x304   : > { %v1995_v19 = vmul.f32 %v2753_v14, %v1979_v12 }
 0x305   : > { %v2711_v44 = vpop.eup %2710  ;;  %v1946_v7 = vadd.f32 %v1930_v4, %v1105_v9  ;;  %vm1394_vm1 = vweird.f32 %v3917_v2 }
 0x306   : > { %v2009_v26 = vmul.f32 %v2711_v44, %v1327_v8  ;;  %v3921_v51 = vpop.eup %2712  ;;  %v1363_v8 = vadd.f32 %v3892_v47, %v1362_v3 }
 0x307   : > { %2716 = vtanh.f32 %v1946_v7  ;;  %v2715_v5 = vpop.eup %2714  ;;  %v1375_v61 = vmul.f32 %v3921_v51, %v3888_v58  ;;  %vm1380_vm15 = vweird.f32 %v3921_v51 }
 0x308   : > { %v2025_v53 = vadd.f32 %v2009_v26, %v1993_v24  ;;  %2718 = vrcp.f32 %v3917_v2  ;;  %v3948_v16 = vadd.f32 1.0, %v2715_v5  ;;  %v1367_v34 = vsel %vm3961_vm6, %v3892_v47, %v1363_v8  ;;  %vm3984_vm12 = vmor %vm1379_vm9, %vm1380_vm15 }
 0x309   : > { %2720 = vpow2.f32 %v2335_v27  ;;  %v1376_v20 = vsub.f32 1.0, %v1375_v61  ;;  %v1385_v24 = vand.u32 2147483648, %v3888_v58 }
 0x30a   : > { %2041 = vst [vmem:[#allocation2 + $0x48] sm:$0xff] %v2025_v53  ;;  %v2488_v31 = vpack.c.bf16 %v2025_v53, %v2024_v22  ;;  %v1904_v13 = vpop.f32.mrf.mxu2  ;;  %v1370_v22 = vand.u32 2147483648, %v3858_v52  ;;  %v1383_v53 = vand.u32 2147483647, %v3888_v58  ;;  %vm1409_vm8 = vweird.f32 %v3948_v16 }
 0x30b   : > { %v1931_v33 = vadd.f32 %v1904_v13, %v830_v35  ;;  %v835_v39 = vpop.f32.mrf.mxu3  ;;  %v1377_v56 = vmul.f32 %v3921_v51, %v1376_v20  ;;  %v1386_v15 = vor.u32 1.1754944e-38, %v1385_v24 }
 0x30c   : > { %2519 = vst [vmem:[%s2830_s14 + $0x18] sm:$0xff] %v2488_v31   ;;  %v1371_v4 = vor.u32 1.1754944e-38, %v1370_v22  ;;  %vm1384_vm11 = vcmp.eq.f32.partialorder %v1383_v53, 8.507059e+37  ;;  %v2755_v22 = vld [vmem:[#allocation2 + $0x38] sm:$0xff] }
 0x30d   : > { %v2717_v60 = vpop.eup %2716  ;;  %v1947_v1 = vadd.f32 %v1931_v33, %v1106_v18  ;;  %v1378_v28 = vadd.f32 %v3921_v51, %v1377_v56  ;;  %v1413_v56 = vand.u32 2147483647, %v3948_v16 }
 0x30e   : > { %v2010_v25 = vmul.f32 %v2717_v60, %v1342_v11  ;;  %v3952_v23 = vpop.eup %2718  ;;  %v1372_v30 = vsel %vm1369_vm13, %v1371_v4, %v1367_v34  ;;  %v1400_v60 = vand.u32 2147483648, %v3917_v2  ;;  %v1110_v34 = vld [vmem:[%s4055_s4 + $0x168] sm:$0xff] }
 0x30f   : > { %2722 = vtanh.f32 %v1947_v1  ;;  %v2721_v9 = vpop.eup %2720  ;;  %v1390_v49 = vmul.f32 %v3952_v23, %v3917_v2  ;;  %v1980_v11 = vsub.f32 1.0, %v1372_v30  ;;  %v1382_v42 = vsel %vm3984_vm12, %v3921_v51, %v1378_v28 }
 0x310   : > { %v2026_v35 = vadd.f32 %v2010_v25, %v1994_v40  ;;  %2724 = vrcp.f32 %v3948_v16  ;;  %v3971_v44 = vadd.f32 1.0, %v2721_v9  ;;  %v1387_v5 = vsel %vm1384_vm11, %v1386_v15, %v1382_v42 }
 0x311   : > { %2726 = vpow2.f32 %v2336_v6  ;;  %v1391_v54 = vsub.f32 1.0, %v1390_v49  ;;  %v1996_v13 = vmul.f32 %v2754_v38, %v1980_v11  ;;  %vm1395_vm0 = vweird.f32 %v3952_v23 }
 0x312   : > { %2042 = vst [vmem:[#allocation2 + $0x40] sm:$0xff] %v2026_v35  ;;  %v1907_v17 = vpop.f32.mrf.mxu2  ;;  %v1981_v41 = vsub.f32 1.0, %v1387_v5  ;;  %v1398_v1 = vand.u32 2147483647, %v3917_v2  ;;  %vm1396_vm2 = vmor %vm1394_vm1, %vm1395_vm0  ;;  %v1401_v8 = vor.u32 1.1754944e-38, %v1400_v60  ;;  %vm1414_vm4 = vcmp.eq.f32.partialorder %v1413_v56, 8.507059e+37 }
 0x313   : > { %v1932_v50 = vadd.f32 %v1907_v17, %v833_v36  ;;  %v838_v46 = vpop.f32.mrf.mxu3  ;;  %v1392_v58 = vmul.f32 %v3952_v23, %v1391_v54  ;;  %v1111_v36 = vld [vmem:[%s4055_s4 + $0x170] sm:$0xff]  ;;  %vm1424_vm14 = vweird.f32 %v3971_v44  ;;  %v1112_v60 = vld [vmem:[%s4055_s4 + $0x178] sm:$0xff] }
 0x314   : > { %v1997_v12 = vmul.f32 %v2755_v22, %v1981_v41  ;;  %vm1399_vm5 = vcmp.eq.f32.partialorder %v1398_v1, 8.507059e+37 }
 0x315   : > { %v2723_v52 = vpop.eup %2722  ;;  %v1948_v21 = vadd.f32 %v1932_v50, %v1107_v45  ;;  %v1393_v3 = vadd.f32 %v3952_v23, %v1392_v58  ;;  %v1415_v50 = vand.u32 2147483648, %v3948_v16 }
 0x316   : > { %v2011_v32 = vmul.f32 %v2723_v52, %v1357_v59  ;;  %v3975_v47 = vpop.eup %2724 }
 0x317   : > { %2728 = vtanh.f32 %v1948_v21  ;;  %v2727_v37 = vpop.eup %2726  ;;  %v1405_v57 = vmul.f32 %v3975_v47, %v3948_v16  ;;  %v1397_v59 = vsel %vm1396_vm2, %v3952_v23, %v1393_v3  ;;  %vm1410_vm7 = vweird.f32 %v3975_v47 }
 0x318   : > { %v2027_v7 = vadd.f32 %v2011_v32, %v1995_v19  ;;  %2730 = vrcp.f32 %v3971_v44  ;;  %v3995_v33 = vadd.f32 1.0, %v2727_v37  ;;  %v1402_v63 = vsel %vm1399_vm5, %v1401_v8, %v1397_v59  ;;  %vm1411_vm3 = vmor %vm1409_vm8, %vm1410_vm7 }
 0x319   : > { %v1406_v61 = vsub.f32 1.0, %v1405_v57  ;;  %v1982_v49 = vsub.f32 1.0, %v1402_v63 }
 0x31a   : > { %2043 = vst [vmem:[#allocation2 + $0x20] sm:$0xff] %v2027_v7  ;;  %v2493_v26 = vpack.c.bf16 %v2027_v7, %v2026_v35  ;;  %v1909_v55 = vpop.f32.mrf.mxu2  ;;  %v2756_v7 = vld [vmem:[#allocation2 + $0x60] sm:$0xff]  ;;  %vm1439_vm9 = vweird.f32 %v3995_v33  ;;  %v1443_v41 = vand.u32 2147483647, %v3995_v33 }
 0x31b   : > { %v1933_v27 = vadd.f32 %v1909_v55, %v835_v39  ;;  %v1407_v20 = vmul.f32 %v3975_v47, %v1406_v61  ;;  %v840_v2 = vpop.f32.mrf.mxu3  ;;  %v1998_v28 = vmul.f32 %v2756_v7, %v1982_v49  ;;  %v1445_v61 = vand.u32 2147483648, %v3995_v33 }
 0x31c   : > { %2520 = vst [vmem:[%s2830_s14 + $0x20] sm:$0xff] %v2493_v26   ;;  %vm1444_vm11 = vcmp.eq.f32.partialorder %v1443_v41, 8.507059e+37 }
 0x31d   : > { %v2729_v31 = vpop.eup %2728  ;;  %v1949_v18 = vadd.f32 %v1933_v27, %v1108_v48  ;;  %v1408_v0 = vadd.f32 %v3975_v47, %v1407_v20  ;;  %v1428_v27 = vand.u32 2147483647, %v3971_v44  ;;  %v2758_v20 = vld [vmem:[#allocation2 + $0x78] sm:$0xff] }
 0x31e   : > { %v2012_v43 = vmul.f32 %v2729_v31, %v1372_v30  ;;  %v3999_v51 = vpop.eup %2730  ;;  %v1416_v30 = vor.u32 1.1754944e-38, %v1415_v50 }
 0x31f   : > { %2732 = vtanh.f32 %v1949_v18  ;;  %v1420_v25 = vmul.f32 %v3999_v51, %v3971_v44  ;;  %v1412_v14 = vsel %vm1411_vm3, %v3975_v47, %v1408_v0  ;;  %vm1425_vm10 = vweird.f32 %v3999_v51  ;;  %v2757_v18 = vld [vmem:[#allocation2 + $0x70] sm:$0xff] }
 0x320   : > { %v2028_v10 = vadd.f32 %v2012_v43, %v1996_v13  ;;  %2734 = vrcp.f32 %v3995_v33  ;;  %v1417_v26 = vsel %vm1414_vm4, %v1416_v30, %v1412_v14  ;;  %v1430_v47 = vand.u32 2147483648, %v3971_v44  ;;  %vm1426_vm6 = vmor %vm1424_vm14, %vm1425_vm10 }
 0x321   : > { %v1421_v17 = vsub.f32 1.0, %v1420_v25  ;;  %v1983_v55 = vsub.f32 1.0, %v1417_v26  ;;  %vm1429_vm13 = vcmp.eq.f32.partialorder %v1428_v27, 8.507059e+37  ;;  %v1446_v25 = vor.u32 1.1754944e-38, %v1445_v61 }
 0x322   : > { %2044 = vst [vmem:[#allocation2 + $0x10] sm:$0xff] %v2028_v10  ;;  %v1912_v29 = vpop.f32.mrf.mxu2  ;;  %v1431_v31 = vor.u32 1.1754944e-38, %v1430_v47 }
 0x323   : > { %v1934_v40 = vadd.f32 %v1912_v29, %v838_v46  ;;  %v1422_v19 = vmul.f32 %v3999_v51, %v1421_v17  ;;  %v843_v48 = vpop.f32.mrf.mxu3  ;;  %v1999_v38 = vmul.f32 %v2757_v18, %v1983_v55 }
 0x325   : > { %v2733_v35 = vpop.eup %2732  ;;  %v1950_v6 = vadd.f32 %v1934_v40, %v1109_v62  ;;  %v1423_v53 = vadd.f32 %v3999_v51, %v1422_v19 }
 0x326   : > { %v2013_v45 = vmul.f32 %v2733_v35, %v1387_v5  ;;  %v4014_v23 = vpop.eup %2734 }
 0x327   : > { %2736 = vtanh.f32 %v1950_v6  ;;  %v1435_v21 = vmul.f32 %v4014_v23, %v3995_v33  ;;  %v1427_v42 = vsel %vm1426_vm6, %v3999_v51, %v1423_v53  ;;  %vm1440_vm15 = vweird.f32 %v4014_v23 }
 0x328   : > { %v2029_v39 = vadd.f32 %v2013_v45, %v1997_v12  ;;  %v1432_v43 = vsel %vm1429_vm13, %v1431_v31, %v1427_v42  ;;  %vm1441_vm12 = vmor %vm1439_vm9, %vm1440_vm15  ;;  %v2759_v45 = vld [vmem:[#allocation2 + $0x28] sm:$0xff] }
 0x329   : > { %v1436_v16 = vsub.f32 1.0, %v1435_v21  ;;  %v1984_v3 = vsub.f32 1.0, %v1432_v43 }
 0x32a   : > { %2045 = vst [vmem:[#allocation2 + $0x38] sm:$0xff] %v2029_v39  ;;  %v2498_v9 = vpack.c.bf16 %v2029_v39, %v2028_v10  ;;  %v1914_v52 = vpop.f32.mrf.mxu2 }
 0x32b   : > { %v1935_v4 = vadd.f32 %v1914_v52, %v840_v2  ;;  %v1437_v46 = vmul.f32 %v4014_v23, %v1436_v16  ;;  %v845_v51 = vpop.f32.mrf.mxu3  ;;  %v2000_v35 = vmul.f32 %v2758_v20, %v1984_v3 }
 0x32c   : > { %2521 = vst [vmem:[%s2830_s14 + $0x28] sm:$0xff] %v2498_v9  }
 0x32d   : > { %v2737_v32 = vpop.eup %2736  ;;  %v1951_v54 = vadd.f32 %v1935_v4, %v1110_v34  ;;  %v1438_v44 = vadd.f32 %v4014_v23, %v1437_v46 }
 0x32e   : > { %v2014_v24 = vmul.f32 %v2737_v32, %v1402_v63 }
 0x32f   : > { %2738 = vtanh.f32 %v1951_v54  ;;  %v1442_v29 = vsel %vm1441_vm12, %v4014_v23, %v1438_v44 }
 0x330   : > { %v2030_v11 = vadd.f32 %v2014_v24, %v1998_v28  ;;  %v1447_v6 = vsel %vm1444_vm11, %v1446_v25, %v1442_v29 }
 0x331   : > { %v1985_v12 = vsub.f32 1.0, %v1447_v6 }
 0x332   : > { %2046 = vst [vmem:[#allocation2 + $0x60] sm:$0xff] %v2030_v11  ;;  %v1917_v37 = vpop.f32.mrf.mxu2 }
 0x333   : > { %v1936_v57 = vadd.f32 %v1917_v37, %v843_v48  ;;  %v2001_v2 = vmul.f32 %v2759_v45, %v1985_v12 }
 0x335   : > { %v2739_v58 = vpop.eup %2738  ;;  %v1952_v15 = vadd.f32 %v1936_v57, %v1111_v36 }
 0x336   : > { %v2015_v13 = vmul.f32 %v2739_v58, %v1417_v26 }
 0x337   : > { %2740 = vtanh.f32 %v1952_v15 }
 0x338   : > { %v2031_v5 = vadd.f32 %v2015_v13, %v1999_v38 }
 0x33a   : > { %2047 = vst [vmem:[#allocation2 + $0x70] sm:$0xff] %v2031_v5  ;;  %v2503_v10 = vpack.c.bf16 %v2031_v5, %v2030_v11  ;;  %v1919_v62 = vpop.f32.mrf.mxu2 }
 0x33b   : > { %v1937_v1 = vadd.f32 %v1919_v62, %v845_v51 }
 0x33c   : > { %2522 = vst [vmem:[%s2830_s14 + $0x30] sm:$0xff] %v2503_v10  }
 0x33d   : > { %v2741_v40 = vpop.eup %2740  ;;  %v1953_v59 = vadd.f32 %v1937_v1, %v1112_v60 }
 0x33e   : > { %v2016_v8 = vmul.f32 %v2741_v40, %v1432_v43 }
 0x33f   : > { %2742 = vtanh.f32 %v1953_v59 }
 0x340   : > { %v2032_v22 = vadd.f32 %v2016_v8, %v2000_v35 }
 0x342   : > { %2048 = vst [vmem:[#allocation2 + $0x78] sm:$0xff] %v2032_v22 }
 0x345   : > { %v2743_v33 = vpop.eup %2742 }
 0x346   : > { %v2017_v63 = vmul.f32 %v2743_v33, %v1447_v6 }
 0x348   : > { %v2033_v17 = vadd.f32 %v2017_v63, %v2001_v2 }
 0x34a   : > { %2049 = vst [vmem:[#allocation2 + $0x28] sm:$0xff] %v2033_v17  ;;  %v2508_v39 = vpack.c.bf16 %v2033_v17, %v2032_v22 }
 0x34c   : > { %2523 = vst [vmem:[%s2830_s14 + $0x38] sm:$0xff] %v2508_v39  }
 0x34d PF: > { %s17_s24 = sadd.s32 1, %s2766_s24  }
 0x34e   : > { %p14_p5 = scmp.ge.s32.totalorder %s17_s24, 5  }
 0x350   :  { %16 = sbr.rel (!%p14_p5) target bundleno = 1 (0x1), region = 85 }

// kernel: evolvegcnh_forward.10
= control target key start
LH: loop header
LB: loop body
LE: loop exit
PB: predicated region body
PF: predicated region fallthrough
CT: control target
= control target key end

     0   :  { %s1366_s15 = smov 0   ;;  %s1368_s16 = smov 0   ;;  %s1539_s0 = inlined_call_operand.vmem [shape: bf16[1,128], index: 0, kind: input, shape index: {}]   ;;  %s1540_s1 = inlined_call_operand.vmem [shape: bf16[3,256,256], index: 1, kind: input, shape index: {}]   ;;  %s1541_s2 = inlined_call_operand.vmem [shape: bf16[3,256,128], index: 2, kind: input, shape index: {}]   ;;  %s1542_s3 = inlined_call_operand.vmem [shape: bf16[3,256,128], index: 3, kind: output, shape index: {0}]   ;;  %s1543_s4 = inlined_call_operand.vmem [shape: f32[3,1,256], index: 4, kind: output, shape index: {1}]  }
   0x1   :  { %s1370_s17 = smov 0   ;;  %s1372_s18 = smov 0  }
   0x2   :  { %s1374_s19 = smov 0  }
   0x3 LB: > { %s30_s20 = sadd.s32 1, %s1331_s17  ;;  %s34_s21 = sadd.s32 1, %s1335_s18  ;;  %s1339_s19 = sphi %s1374_s19, %s15_s19   ;;  %s1335_s18 = sphi %s1372_s18, %s1547_s18   ;;  %s1331_s17 = sphi %s1370_s17, %s1546_s17   ;;  %s1327_s16 = sphi %s1368_s16, %s1545_s16   ;;  %s1323_s15 = sphi %s1366_s15, %s1544_s15  }
   0x4   : > { %p32_p0 = scmp.ge.s32.totalorder %s30_s20, 2  ;;  %p1032_p1 = scmp.ge.s32.totalorder %s1339_s19, 1 }
   0x5   : > { %p220_p2 = scmp.lt.s32.totalorder %s1339_s19, 7 }
   0x6   : > { %s1549_s20 = smov (%p32_p0, %s30_s20), 0  ;;  %s1551_s21 = smov (!%p32_p0, %s34_s21), %s1335_s18 }
   0x7   : > { %p221_p3 = pnand %p1032_p1, %p220_p2  ;;  %p36_p4 = scmp.ge.s32.totalorder %s1551_s21, 3 }
   0x8   : > { %p277_p5 = scmp.lt.s32.totalorder (!%p221_p3), %s1327_s16, 2  ;;  %s1033_s26 = sshll.u32 (!%p221_p3), %s1323_s15, 4 }
   0x9   : > { %s1553_s21 = smov (%p36_p4, %s1551_s21), 0  ;;  %224 = sbr.rel (%p221_p3) target bundleno = 510 (0x1fe), region = 32 }
   0xa   : > { %p279_p6 = scmp.lt.s32.totalorder (!%p221_p3), %s1033_s26, 31  ;;  %p313_p7 = scmp.lt.s32.totalorder (!%p221_p3), %s1323_s15, 1 }
   0xe   : > { %s1555_s16 = smov (!%p277_p5, %s1327_s16), 2  ;;  %s1557_s26 = smov (!%p279_p6, %s1033_s26), 31 }
   0xf   : > { %s1173_s22 = sshll.u32 %s1555_s16, 7  ;;  %s1034_s27 = sshll.u32 %s1557_s26, 1 }
  0x10   : > { %s1404_s25 = scalar_lea.vmem %s1541_s2, %s1173_s22  ;;  %s1035_s28 = sshll.u32 %s1555_s16, 6 }
  0x11   : > { %v1197_v0 = vld [vmem:[%s1404_s25 + $0x38] sm:$0xff]  ;;  %v1196_v2 = vld [vmem:[%s1404_s25 + $0x30] sm:$0xff]  ;;  %v1195_v4 = vld [vmem:[%s1404_s25 + $0x28] sm:$0xff]  ;;  %s286_s29 = sadd.s32 %s1035_s28, %s1034_s27  ;;  %s1040_s8 = sshll.u32 %s1555_s16, 5 }
  0x12   : > { %v1205_v1 = vld [vmem:[%s1404_s25 + $0x78] sm:$0xff]  ;;  %578 = vmatpush.bf16.msra.mxu0 %v1197_v0  ;;  %v1204_v3 = vld [vmem:[%s1404_s25 + $0x70] sm:$0xff]  ;;  %1253 = vmatpush.bf16.msra.mxu3 %v1197_v0  ;;  %v1203_v5 = vld [vmem:[%s1404_s25 + $0x68] sm:$0xff]  ;;  %s1036_s30 = sshll.u32 %s286_s29, 2  ;;  %s307_s9 = sadd.s32 %s1040_s8, %s1557_s26 }
  0x13   : > { %627 = vmatpush.bf16.msra.mxu1 %v1205_v1  ;;  %v1194_v6 = vld [vmem:[%s1404_s25 + $0x20] sm:$0xff]  ;;  %v1193_v8 = vld [vmem:[%s1404_s25 + $0x18] sm:$0xff]  ;;  %v1192_v10 = vld [vmem:[%s1404_s25 + $0x10] sm:$0xff]  ;;  %s1428_s7 = scalar_lea.vmem %s1540_s1, %s1036_s30  ;;  %s1041_s10 = sshll.u32 %s307_s9, 2 }
  0x14   : > { %v1202_v7 = vld [vmem:[%s1404_s25 + $0x60] sm:$0xff]  ;;  %v1201_v9 = vld [vmem:[%s1404_s25 + $0x58] sm:$0xff]  ;;  %v1200_v11 = vld [vmem:[%s1404_s25 + $0x50] sm:$0xff]  ;;  %s1469_s13 = scalar_lea.vmem %s1542_s3, %s1041_s10  ;;  %s1559_s15 = smov (!%p313_p7, %s1323_s15), 1 }
  0x15   : > { %v1191_v12 = vld [vmem:[%s1404_s25 + $0x8] sm:$0xff]  ;;  %v1190_v14 = vld [vmem:[%s1404_s25] sm:$0xff]  ;;  %v1053_v22 = vld [vmem:[%s1428_s7 + $0x10] sm:$0xf]  ;;  %s1042_s23 = sshll.u32 %s1555_s16, 1 }
  0x16   : > { %579 = vmatpush.bf16.msra.mxu0 %v1196_v2  ;;  %1254 = vmatpush.bf16.msra.mxu3 %v1196_v2  ;;  %v1199_v13 = vld [vmem:[%s1404_s25 + $0x48] sm:$0xff]  ;;  %v1198_v15 = vld [vmem:[%s1404_s25 + $0x40] sm:$0xff]  ;;  %v1177_v23 = vld [vmem:[%s1428_s7 + $0x14] sm:$0xf0]  ;;  %s316_s24 = sadd.s32 %s1042_s23, %s1559_s15 }
  0x17   : > { %628 = vmatpush.bf16.msra.mxu1 %v1204_v3  ;;  %v1045_v16 = vld [vmem:[%s1428_s7] sm:$0xf]  ;;  %v1175_v17 = vld [vmem:[%s1428_s7 + $0x4] sm:$0xf0]  ;;  %v1174_v18 = vld [vmem:[%s1428_s7 + $0x4] sm:$0xf]  ;;  %v1054_v26 = vor.u32 %v1177_v23, %v1053_v22  ;;  %s317_s27 = scalar_lea.vmem %s1543_s4, %s316_s24 }
  0x18   : > { %v1047_v19 = vld [vmem:[%s1428_s7 + $0x8] sm:$0xf0]  ;;  %v1046_v20 = vor.u32 %v1175_v17, %v1045_v16  ;;  %v1176_v24 = vld [vmem:[%s1428_s7 + $0x14] sm:$0xf]  ;;  %v1055_v25 = vld [vmem:[%s1428_s7 + $0x18] sm:$0xf0] }
  0x19   : > { %v1050_v21 = vor.u32 %v1174_v18, %v1047_v19  ;;  %v1058_v27 = vor.u32 %v1176_v24, %v1055_v25  ;;  %v1061_v28 = vld [vmem:[%s1428_s7 + $0x20] sm:$0xf]  ;;  %v1179_v29 = vld [vmem:[%s1428_s7 + $0x24] sm:$0xf0]  ;;  %v1178_v30 = vld [vmem:[%s1428_s7 + $0x24] sm:$0xf] }
  0x1a   : > { %580 = vmatpush.bf16.msra.mxu0 %v1195_v4  ;;  %1255 = vmatpush.bf16.msra.mxu3 %v1195_v4  ;;  %v1063_v31 = vld [vmem:[%s1428_s7 + $0x28] sm:$0xf0]  ;;  %v1062_v32 = vor.u32 %v1179_v29, %v1061_v28  ;;  %v1085_v34 = vld [vmem:[%s1428_s7 + $0x50] sm:$0xf]  ;;  %v1185_v35 = vld [vmem:[%s1428_s7 + $0x54] sm:$0xf0] }
  0x1b   : > { %629 = vmatpush.bf16.msra.mxu1 %v1203_v5  ;;  %v1066_v33 = vor.u32 %v1178_v30, %v1063_v31  ;;  %v1086_v36 = vor.u32 %v1185_v35, %v1085_v34  ;;  %v1069_v37 = vld [vmem:[%s1428_s7 + $0x30] sm:$0xf]  ;;  %v1181_v38 = vld [vmem:[%s1428_s7 + $0x34] sm:$0xf0]  ;;  %v1180_v39 = vld [vmem:[%s1428_s7 + $0x34] sm:$0xf] }
  0x1c   : > { %v1071_v40 = vld [vmem:[%s1428_s7 + $0x38] sm:$0xf0]  ;;  %v1070_v41 = vor.u32 %v1181_v38, %v1069_v37  ;;  %v1093_v43 = vld [vmem:[%s1428_s7 + $0x60] sm:$0xf]  ;;  %v1187_v44 = vld [vmem:[%s1428_s7 + $0x64] sm:$0xf0] }
  0x1d   : > { %v1074_v42 = vor.u32 %v1180_v39, %v1071_v40  ;;  %v1094_v45 = vor.u32 %v1187_v44, %v1093_v43  ;;  %v1077_v46 = vld [vmem:[%s1428_s7 + $0x40] sm:$0xf]  ;;  %v1183_v47 = vld [vmem:[%s1428_s7 + $0x44] sm:$0xf0]  ;;  %v1182_v48 = vld [vmem:[%s1428_s7 + $0x44] sm:$0xf] }
  0x1e   : > { %581 = vmatpush.bf16.msra.mxu0 %v1194_v6  ;;  %1256 = vmatpush.bf16.msra.mxu3 %v1194_v6  ;;  %v1079_v49 = vld [vmem:[%s1428_s7 + $0x48] sm:$0xf0]  ;;  %v1078_v50 = vor.u32 %v1183_v47, %v1077_v46  ;;  %v1101_v52 = vld [vmem:[%s1428_s7 + $0x70] sm:$0xf]  ;;  %v1189_v53 = vld [vmem:[%s1428_s7 + $0x74] sm:$0xf0] }
  0x1f   : > { %630 = vmatpush.bf16.msra.mxu1 %v1202_v7  ;;  %v1082_v51 = vor.u32 %v1182_v48, %v1079_v49  ;;  %v1102_v54 = vor.u32 %v1189_v53, %v1101_v52  ;;  %v1184_v55 = vld [vmem:[%s1428_s7 + $0x54] sm:$0xf]  ;;  %v1087_v56 = vld [vmem:[%s1428_s7 + $0x58] sm:$0xf0]  ;;  %v1186_v58 = vld [vmem:[%s1428_s7 + $0x64] sm:$0xf] }
  0x20   : > { %v1090_v57 = vor.u32 %v1184_v55, %v1087_v56  ;;  %v1095_v59 = vld [vmem:[%s1428_s7 + $0x68] sm:$0xf0]  ;;  %v1188_v61 = vld [vmem:[%s1428_s7 + $0x74] sm:$0xf]  ;;  %v1103_v62 = vld [vmem:[%s1428_s7 + $0x78] sm:$0xf0] }
  0x21   : > { %v1098_v60 = vor.u32 %v1186_v58, %v1095_v59  ;;  %v1106_v63 = vor.u32 %v1188_v61, %v1103_v62 }
  0x22   : > { %582 = vmatpush.bf16.msra.mxu0 %v1193_v8  ;;  %1257 = vmatpush.bf16.msra.mxu3 %v1193_v8 }
  0x23   : > { %631 = vmatpush.bf16.msra.mxu1 %v1201_v9 }
  0x26   : > { %583 = vmatpush.bf16.msra.mxu0 %v1192_v10  ;;  %1258 = vmatpush.bf16.msra.mxu3 %v1192_v10 }
  0x27   : > { %632 = vmatpush.bf16.msra.mxu1 %v1200_v11 }
  0x2a   : > { %584 = vmatpush.bf16.msra.mxu0 %v1191_v12  ;;  %1259 = vmatpush.bf16.msra.mxu3 %v1191_v12 }
  0x2b   : > { %633 = vmatpush.bf16.msra.mxu1 %v1199_v13 }
  0x2e   : > { %585 = vmatpush.bf16.msra.mxu0 %v1190_v14  ;;  %1260 = vmatpush.bf16.msra.mxu3 %v1190_v14 }
  0x2f   : > { %634 = vmatpush.bf16.msra.mxu1 %v1198_v15 }
  0x31   : > { %586 = vmatmul.bf16.vlgmr.msra.gmra.mxu0 %v1046_v20  ;;  %611 = vmatmul.bf16.vlgmr.msra.gmra.mxu3 %v1086_v36 }
  0x32   : > { %635 = vmatmul.bf16.vlgmr.msra.gmra.mxu1 %v1050_v21 }
  0x41   : > { %591 = vmatmul.bf16.gmra.mxu0 %v1054_v26  ;;  %616 = vmatmul.bf16.gmra.mxu3 %v1094_v45 }
  0x42   : > { %640 = vmatmul.bf16.gmra.mxu1 %v1058_v27 }
  0x51   : > { %596 = vmatmul.bf16.gmra.mxu0 %v1062_v32  ;;  %621 = vmatmul.bf16.gmra.mxu3 %v1102_v54 }
  0x52   : > { %645 = vmatmul.bf16.gmra.mxu1 %v1066_v33 }
  0x61   : > { %601 = vmatmul.bf16.gmra.mxu0 %v1070_v41 }
  0x62   : > { %650 = vmatmul.bf16.gmra.mxu1 %v1074_v42 }
  0x71   : > { %606 = vmatmul.bf16.gmra.mxu0 %v1078_v50 }
  0x72   : > { %655 = vmatmul.bf16.gmra.mxu1 %v1082_v51 }
  0x82   : > { %660 = vmatmul.bf16.gmra.mxu1 %v1090_v57 }
  0x92   : > { %665 = vmatmul.bf16.gmra.mxu1 %v1098_v60 }
  0xa2   : > { %670 = vmatmul.bf16.gmra.mxu1 %v1106_v63 }
  0xae   : > { %v587_v0 = vpop.f32.mrf.mxu0 }
  0xaf   : > { %v636_v1 = vpop.f32.mrf.mxu1 }
  0xb0   : > { %v637_v2 = vadd.f32 %v636_v1, %v587_v0 }
  0xb2   : > { %v743_v3 = vmul.f32 0.22916667, %v637_v2  ;;  %vm727_vm0 = vcmp.ge.f32.partialorder %v637_v2, 0.0 }
  0xb4   : > { %v759_v7 = vsel %vm727_vm0, %v637_v2, %v743_v3 }
  0xb5   : > { %v775_v9 = vpack.c.bf16 %v759_v7, %v759_v7 }
  0xb6   : > { %v589_v4 = vpop.f32.mrf.mxu0 }
  0xb7   : > { %v638_v5 = vpop.f32.mrf.mxu1  ;;  %v1472_v15 = vunpack.c.l.b16 %v775_v9 }
  0xb8   : > { %v639_v6 = vadd.f32 %v638_v5, %v589_v4  ;;  %v612_v4 = vpop.f32.mrf.mxu3 }
  0xba   : > { %vm728_vm1 = vcmp.ge.f32.partialorder %v639_v6, 0.0  ;;  %v744_v8 = vmul.f32 0.22916667, %v639_v6 }
  0xbc   : > { %v760_v10 = vsel %vm728_vm1, %v639_v6, %v744_v8 }
  0xbd   : > { %v776_v11 = vpack.c.bf16 %v760_v10, %v760_v10  ;;  %v1209_v12 = vpack.c.bf16 %v760_v10, %v759_v7 }
  0xbe   : > { %v592_v13 = vpop.f32.mrf.mxu0 }
  0xbf   : > { %v641_v14 = vpop.f32.mrf.mxu1  ;;  %1210 = vst [vmem:[%s1469_s13] sm:$0xff] %v1209_v12   ;;  %v1474_v16 = vunpack.c.l.b16 %v776_v11 }
  0xc0   : > { %v642_v17 = vadd.f32 %v641_v14, %v592_v13  ;;  %v614_v14 = vpop.f32.mrf.mxu3 }
  0xc1   : > { %v840_v18 = vpack.c.b16 %v1474_v16, %v1472_v15 }
  0xc2   : > { %v745_v19 = vmul.f32 0.22916667, %v642_v17  ;;  %vm729_vm2 = vcmp.ge.f32.partialorder %v642_v17, 0.0 }
  0xc4   : > { %v761_v23 = vsel %vm729_vm2, %v642_v17, %v745_v19 }
  0xc5   : > { %v777_v25 = vpack.c.bf16 %v761_v23, %v761_v23 }
  0xc6   : > { %v594_v20 = vpop.f32.mrf.mxu0 }
  0xc7   : > { %v643_v21 = vpop.f32.mrf.mxu1  ;;  %v1479_v31 = vunpack.c.l.b16 %v777_v25 }
  0xc8   : > { %v644_v22 = vadd.f32 %v643_v21, %v594_v20 }
  0xca   : > { %vm730_vm3 = vcmp.ge.f32.partialorder %v644_v22, 0.0  ;;  %v746_v24 = vmul.f32 0.22916667, %v644_v22 }
  0xcc   : > { %v762_v26 = vsel %vm730_vm3, %v644_v22, %v746_v24 }
  0xcd   : > { %v778_v27 = vpack.c.bf16 %v762_v26, %v762_v26  ;;  %v1214_v28 = vpack.c.bf16 %v762_v26, %v761_v23  ;;  %v617_v26 = vpop.f32.mrf.mxu3 }
  0xce   : > { %v597_v29 = vpop.f32.mrf.mxu0 }
  0xcf   : > { %v646_v30 = vpop.f32.mrf.mxu1  ;;  %1246 = vst [vmem:[%s1469_s13 + $0x8] sm:$0xff] %v1214_v28   ;;  %v1481_v32 = vunpack.c.l.b16 %v778_v27 }
  0xd0   : > { %v647_v33 = vadd.f32 %v646_v30, %v597_v29 }
  0xd1   : > { %v841_v34 = vpack.c.b16 %v1481_v32, %v1479_v31 }
  0xd2   : > { %v747_v35 = vmul.f32 0.22916667, %v647_v33  ;;  %vm731_vm4 = vcmp.ge.f32.partialorder %v647_v33, 0.0 }
  0xd4   : > { %v763_v39 = vsel %vm731_vm4, %v647_v33, %v747_v35 }
  0xd5   : > { %v779_v41 = vpack.c.bf16 %v763_v39, %v763_v39  ;;  %v619_v35 = vpop.f32.mrf.mxu3 }
  0xd6   : > { %v599_v36 = vpop.f32.mrf.mxu0 }
  0xd7   : > { %v648_v37 = vpop.f32.mrf.mxu1  ;;  %v1486_v47 = vunpack.c.l.b16 %v779_v41 }
  0xd8   : > { %v649_v38 = vadd.f32 %v648_v37, %v599_v36 }
  0xda   : > { %vm732_vm5 = vcmp.ge.f32.partialorder %v649_v38, 0.0  ;;  %v748_v40 = vmul.f32 0.22916667, %v649_v38 }
  0xdc   : > { %v764_v42 = vsel %vm732_vm5, %v649_v38, %v748_v40 }
  0xdd   : > { %v780_v43 = vpack.c.bf16 %v764_v42, %v764_v42  ;;  %v1219_v44 = vpack.c.bf16 %v764_v42, %v763_v39 }
  0xde   : > { %v602_v45 = vpop.f32.mrf.mxu0 }
  0xdf   : > { %v651_v46 = vpop.f32.mrf.mxu1  ;;  %1247 = vst [vmem:[%s1469_s13 + $0x10] sm:$0xff] %v1219_v44   ;;  %v1488_v48 = vunpack.c.l.b16 %v780_v43  ;;  %v622_v43 = vpop.f32.mrf.mxu3 }
  0xe0   : > { %v652_v49 = vadd.f32 %v651_v46, %v602_v45 }
  0xe1   : > { %v842_v50 = vpack.c.b16 %v1488_v48, %v1486_v47 }
  0xe2   : > { %v749_v51 = vmul.f32 0.22916667, %v652_v49  ;;  %vm733_vm6 = vcmp.ge.f32.partialorder %v652_v49, 0.0 }
  0xe4   : > { %v765_v55 = vsel %vm733_vm6, %v652_v49, %v749_v51 }
  0xe5   : > { %v781_v57 = vpack.c.bf16 %v765_v55, %v765_v55 }
  0xe6   : > { %v604_v52 = vpop.f32.mrf.mxu0 }
  0xe7   : > { %v653_v53 = vpop.f32.mrf.mxu1  ;;  %v1493_v63 = vunpack.c.l.b16 %v781_v57  ;;  %v624_v51 = vpop.f32.mrf.mxu3 }
  0xe8   : > { %v654_v54 = vadd.f32 %v653_v53, %v604_v52 }
  0xea   : > { %vm734_vm7 = vcmp.ge.f32.partialorder %v654_v54, 0.0  ;;  %v750_v56 = vmul.f32 0.22916667, %v654_v54 }
  0xec   : > { %v766_v58 = vsel %vm734_vm7, %v654_v54, %v750_v56 }
  0xed   : > { %v782_v59 = vpack.c.bf16 %v766_v58, %v766_v58  ;;  %v1224_v60 = vpack.c.bf16 %v766_v58, %v765_v55 }
  0xee   : > { %v607_v61 = vpop.f32.mrf.mxu0 }
  0xef   : > { %v656_v62 = vpop.f32.mrf.mxu1  ;;  %1248 = vst [vmem:[%s1469_s13 + $0x18] sm:$0xff] %v1224_v60   ;;  %v1495_v0 = vunpack.c.l.b16 %v782_v59 }
  0xf0   : > { %v657_v1 = vadd.f32 %v656_v62, %v607_v61 }
  0xf1   : > { %v843_v2 = vpack.c.b16 %v1495_v0, %v1493_v63 }
  0xf2   : > { %v751_v3 = vmul.f32 0.22916667, %v657_v1  ;;  %vm735_vm8 = vcmp.ge.f32.partialorder %v657_v1, 0.0 }
  0xf4   : > { %v767_v8 = vsel %vm735_vm8, %v657_v1, %v751_v3 }
  0xf5   : > { %v783_v10 = vpack.c.bf16 %v767_v8, %v767_v8 }
  0xf6   : > { %v609_v5 = vpop.f32.mrf.mxu0 }
  0xf7   : > { %v658_v6 = vpop.f32.mrf.mxu1  ;;  %v832_v19 = vunpack.c.l.b16 %v783_v10 }
  0xf8   : > { %v659_v7 = vadd.f32 %v658_v6, %v609_v5 }
  0xfa   : > { %vm736_vm9 = vcmp.ge.f32.partialorder %v659_v7, 0.0  ;;  %v752_v9 = vmul.f32 0.22916667, %v659_v7 }
  0xfc   : > { %v768_v11 = vsel %vm736_vm9, %v659_v7, %v752_v9 }
  0xfd   : > { %v784_v12 = vpack.c.bf16 %v768_v11, %v768_v11  ;;  %v1229_v13 = vpack.c.bf16 %v768_v11, %v767_v8 }
  0xff   : > { %v661_v17 = vpop.f32.mrf.mxu1  ;;  %1249 = vst [vmem:[%s1469_s13 + $0x20] sm:$0xff] %v1229_v13   ;;  %v833_v20 = vunpack.c.l.b16 %v784_v12  ;;  %v807_v12 = vld [vmem:[%s1539_s0] sm:$0x1] }
 0x100   : > { %v662_v22 = vadd.f32 %v661_v17, %v612_v4 }
 0x101   : > { %v844_v21 = vpack.c.b16 %v833_v20, %v832_v19 }
 0x102   : > { %v753_v24 = vmul.f32 0.22916667, %v662_v22  ;;  %vm737_vm10 = vcmp.ge.f32.partialorder %v662_v22, 0.0 }
 0x104   : > { %v769_v28 = vsel %vm737_vm10, %v662_v22, %v753_v24 }
 0x105   : > { %v785_v8 = vpack.c.bf16 %v769_v28, %v769_v28 }
 0x107   : > { %v663_v23 = vpop.f32.mrf.mxu1  ;;  %v834_v10 = vunpack.c.l.b16 %v785_v8 }
 0x108   : > { %v664_v25 = vadd.f32 %v663_v23, %v614_v14 }
 0x10a   : > { %vm738_vm11 = vcmp.ge.f32.partialorder %v664_v25, 0.0  ;;  %v754_v27 = vmul.f32 0.22916667, %v664_v25 }
 0x10c   : > { %v770_v29 = vsel %vm738_vm11, %v664_v25, %v754_v27 }
 0x10d   : > { %v1234_v30 = vpack.c.bf16 %v770_v29, %v769_v28  ;;  %v786_v7 = vpack.c.bf16 %v770_v29, %v770_v29 }
 0x10f   : > { %v666_v33 = vpop.f32.mrf.mxu1  ;;  %1250 = vst [vmem:[%s1469_s13 + $0x28] sm:$0xff] %v1234_v30   ;;  %v835_v9 = vunpack.c.l.b16 %v786_v7 }
 0x110   : > { %v667_v36 = vadd.f32 %v666_v33, %v617_v26 }
 0x111   : > { %v845_v11 = vpack.c.b16 %v835_v9, %v834_v10 }
 0x112   : > { %v755_v38 = vmul.f32 0.22916667, %v667_v36  ;;  %vm739_vm12 = vcmp.ge.f32.partialorder %v667_v36, 0.0 }
 0x114   : > { %v771_v41 = vsel %vm739_vm12, %v667_v36, %v755_v38 }
 0x115   : > { %v787_v3 = vpack.c.bf16 %v771_v41, %v771_v41 }
 0x117   : > { %v668_v37 = vpop.f32.mrf.mxu1  ;;  %v836_v5 = vunpack.c.l.b16 %v787_v3 }
 0x118   : > { %v669_v39 = vadd.f32 %v668_v37, %v619_v35 }
 0x11a   : > { %vm740_vm13 = vcmp.ge.f32.partialorder %v669_v39, 0.0  ;;  %v756_v40 = vmul.f32 0.22916667, %v669_v39 }
 0x11c   : > { %v772_v42 = vsel %vm740_vm13, %v669_v39, %v756_v40 }
 0x11d   : > { %v1239_v44 = vpack.c.bf16 %v772_v42, %v771_v41  ;;  %v788_v1 = vpack.c.bf16 %v772_v42, %v772_v42 }
 0x11f   : > { %v671_v45 = vpop.f32.mrf.mxu1  ;;  %1251 = vst [vmem:[%s1469_s13 + $0x30] sm:$0xff] %v1239_v44   ;;  %v837_v4 = vunpack.c.l.b16 %v788_v1 }
 0x120   : > { %v672_v46 = vadd.f32 %v671_v45, %v622_v43 }
 0x121   : > { %v846_v6 = vpack.c.b16 %v837_v4, %v836_v5 }
 0x122   : > { %v757_v49 = vmul.f32 0.22916667, %v672_v46  ;;  %vm741_vm14 = vcmp.ge.f32.partialorder %v672_v46, 0.0 }
 0x124   : > { %v773_v54 = vsel %vm741_vm14, %v672_v46, %v757_v49 }
 0x125   : > { %v789_v56 = vpack.c.bf16 %v773_v54, %v773_v54 }
 0x127   : > { %v673_v52 = vpop.f32.mrf.mxu1  ;;  %v838_v60 = vunpack.c.l.b16 %v789_v56 }
 0x128   : > { %v674_v53 = vadd.f32 %v673_v52, %v624_v51 }
 0x12a   : > { %vm742_vm15 = vcmp.ge.f32.partialorder %v674_v53, 0.0  ;;  %v758_v55 = vmul.f32 0.22916667, %v674_v53 }
 0x12c   : > { %v774_v57 = vsel %vm742_vm15, %v674_v53, %v758_v55 }
 0x12d   : > { %v790_v58 = vpack.c.bf16 %v774_v57, %v774_v57  ;;  %v1244_v59 = vpack.c.bf16 %v774_v57, %v773_v54 }
 0x12f   : > { %1252 = vst [vmem:[%s1469_s13 + $0x38] sm:$0xff] %v1244_v59   ;;  %v839_v61 = vunpack.c.l.b16 %v790_v58 }
 0x131   : > { %v847_v62 = vpack.c.b16 %v839_v61, %v838_v60 }
 0x133   : > { %856 = vmatpush.bf16.xpose.msra.mxu2 %v847_v62 }
 0x13b   : > { %857 = vmatpush.bf16.xpose.msra.mxu2 %v846_v6 }
 0x143   : > { %858 = vmatpush.bf16.xpose.msra.mxu2 %v845_v11 }
 0x14b   : > { %859 = vmatpush.bf16.xpose.msra.mxu2 %v844_v21 }
 0x153   : > { %860 = vmatpush.bf16.xpose.msra.mxu2 %v843_v2 }
 0x15b   : > { %861 = vmatpush.bf16.xpose.msra.mxu2 %v842_v50 }
 0x163   : > { %862 = vmatpush.bf16.xpose.msra.mxu2 %v841_v34 }
 0x16b   : > { %863 = vmatpush.bf16.xpose.msra.mxu2 %v840_v18 }
 0x172   : > { %864 = vmatmul.bf16.vlgmr.msra.gmra.mxu2 %v807_v12 }
 0x1f5   : > { %v865_v47 = vpop.f32.mrf.mxu2 }
 0x1f6   : > { %869 = vst [vmem:[%s317_s27] sm:$0x1] %v865_v47 }
 0x1fd   : > { %v867_v31 = vpop.f32.mrf.mxu2 }
 0x1fe PF: > { %s15_s19 = sadd.s32 1, %s1339_s19   ;;  %s1544_s15 = smov %s1331_s17 }
 0x1ff   : > { %p12_p8 = scmp.ge.s32.totalorder %s15_s19, 8   ;;  %s1545_s16 = smov %s1335_s18 }
 0x200   : > { %s1546_s17 = smov %s1549_s20  ;;  %s1547_s18 = smov %s1553_s21 }
 0x201   :  { %14 = sbr.rel (!%p12_p8) target bundleno = 3 (0x3), region = 85 }

// kernel: evolvegcnh_forward.13
= control target key start
LH: loop header
LB: loop body
LE: loop exit
PB: predicated region body
PF: predicated region fallthrough
CT: control target
= control target key end

     0   :  { %s1123_s9 = smov 0   ;;  %s1125_s10 = smov 0   ;;  %s1262_s0 = inlined_call_operand.vmem [shape: bf16[3,256,256], index: 0, kind: input, shape index: {}]   ;;  %s1263_s1 = inlined_call_operand.vmem [shape: bf16[3,256,128], index: 1, kind: input, shape index: {}]   ;;  %s1264_s2 = inlined_call_operand.vmem [shape: f32[3,256,128], index: 2, kind: output, shape index: {}]  }
   0x1   :  { %s1127_s11 = smov 0   ;;  %s1129_s12 = smov 0  }
   0x2   :  { %s1131_s13 = smov 0  }
   0x3 LB: > { %s27_s14 = sadd.s32 1, %s1098_s11  ;;  %s31_s15 = sadd.s32 1, %s1102_s12  ;;  %s1106_s13 = sphi %s1131_s13, %s12_s13   ;;  %s1102_s12 = sphi %s1129_s12, %s1268_s12   ;;  %s1098_s11 = sphi %s1127_s11, %s1267_s11   ;;  %s1094_s10 = sphi %s1125_s10, %s1266_s10   ;;  %s1090_s9 = sphi %s1123_s9, %s1265_s9  }
   0x4   : > { %p29_p0 = scmp.ge.s32.totalorder %s27_s14, 2  ;;  %p839_p1 = scmp.ge.s32.totalorder %s1106_s13, 1 }
   0x5   : > { %p165_p2 = scmp.lt.s32.totalorder %s1106_s13, 7 }
   0x6   : > { %s1270_s14 = smov (%p29_p0, %s27_s14), 0  ;;  %s1272_s15 = smov (!%p29_p0, %s31_s15), %s1102_s12 }
   0x7   : > { %p166_p3 = pnand %p839_p1, %p165_p2  ;;  %p33_p4 = scmp.ge.s32.totalorder %s1272_s15, 3 }
   0x8   : > { %p211_p5 = scmp.lt.s32.totalorder (!%p166_p3), %s1094_s10, 2  ;;  %s840_s20 = sshll.u32 (!%p166_p3), %s1090_s9, 4 }
   0x9   : > { %s1274_s15 = smov (%p33_p4, %s1272_s15), 0  ;;  %169 = sbr.rel (%p166_p3) target bundleno = 244 (0xf4), region = 28 }
   0xa   : > { %p213_p6 = scmp.lt.s32.totalorder (!%p166_p3), %s840_s20, 31 }
   0xe   : > { %s1276_s10 = smov (!%p211_p5, %s1094_s10), 2  ;;  %s1278_s20 = smov (!%p213_p6, %s840_s20), 31 }
   0xf   : > { %s979_s16 = sshll.u32 %s1276_s10, 7  ;;  %s841_s21 = sshll.u32 %s1278_s20, 1 }
  0x10   : > { %s1161_s19 = scalar_lea.vmem %s1263_s1, %s979_s16  ;;  %s842_s22 = sshll.u32 %s1276_s10, 6 }
  0x11   : > { %v1003_v0 = vld [vmem:[%s1161_s19 + $0x38] sm:$0xff]  ;;  %v1002_v2 = vld [vmem:[%s1161_s19 + $0x30] sm:$0xff]  ;;  %v1001_v4 = vld [vmem:[%s1161_s19 + $0x28] sm:$0xff]  ;;  %s220_s23 = sadd.s32 %s842_s22, %s841_s21  ;;  %s847_s28 = sshll.u32 %s1276_s10, 5 }
  0x12   : > { %v1011_v1 = vld [vmem:[%s1161_s19 + $0x78] sm:$0xff]  ;;  %505 = vmatpush.bf16.msra.mxu0 %v1003_v0  ;;  %1012 = vmatpush.bf16.msra.mxu2 %v1003_v0  ;;  %v1010_v3 = vld [vmem:[%s1161_s19 + $0x70] sm:$0xff]  ;;  %v1009_v5 = vld [vmem:[%s1161_s19 + $0x68] sm:$0xff]  ;;  %s843_s24 = sshll.u32 %s220_s23, 2  ;;  %s1199_s29 = sadd.s32 %s847_s28, %s1278_s20 }
  0x13   : > { %554 = vmatpush.bf16.msra.mxu1 %v1011_v1  ;;  %1020 = vmatpush.bf16.msra.mxu3 %v1011_v1  ;;  %v1000_v6 = vld [vmem:[%s1161_s19 + $0x20] sm:$0xff]  ;;  %v999_v8 = vld [vmem:[%s1161_s19 + $0x18] sm:$0xff]  ;;  %v998_v10 = vld [vmem:[%s1161_s19 + $0x10] sm:$0xff]  ;;  %s1184_s27 = scalar_lea.vmem %s1262_s0, %s843_s24  ;;  %s848_s30 = sshll.u32 %s1199_s29, 3 }
  0x14   : > { %v1008_v7 = vld [vmem:[%s1161_s19 + $0x60] sm:$0xff]  ;;  %v1007_v9 = vld [vmem:[%s1161_s19 + $0x58] sm:$0xff]  ;;  %v1006_v11 = vld [vmem:[%s1161_s19 + $0x50] sm:$0xff]  ;;  %s1229_s5 = scalar_lea.vmem %s1264_s2, %s848_s30 }
  0x15   : > { %v997_v12 = vld [vmem:[%s1161_s19 + $0x8] sm:$0xff]  ;;  %v996_v14 = vld [vmem:[%s1161_s19] sm:$0xff]  ;;  %v859_v28 = vld [vmem:[%s1184_s27 + $0x10] sm:$0xf] }
  0x16   : > { %506 = vmatpush.bf16.msra.mxu0 %v1002_v2  ;;  %1013 = vmatpush.bf16.msra.mxu2 %v1002_v2  ;;  %v1005_v13 = vld [vmem:[%s1161_s19 + $0x48] sm:$0xff]  ;;  %v1004_v15 = vld [vmem:[%s1161_s19 + $0x40] sm:$0xff]  ;;  %v983_v29 = vld [vmem:[%s1184_s27 + $0x14] sm:$0xf0] }
  0x17   : > { %555 = vmatpush.bf16.msra.mxu1 %v1010_v3  ;;  %1021 = vmatpush.bf16.msra.mxu3 %v1010_v3  ;;  %v851_v16 = vld [vmem:[%s1184_s27] sm:$0xf]  ;;  %v981_v17 = vld [vmem:[%s1184_s27 + $0x4] sm:$0xf0]  ;;  %v980_v20 = vld [vmem:[%s1184_s27 + $0x4] sm:$0xf]  ;;  %v860_v36 = vor.u32 %v983_v29, %v859_v28 }
  0x18   : > { %v883_v18 = vld [vmem:[%s1184_s27 + $0x40] sm:$0xf]  ;;  %v989_v19 = vld [vmem:[%s1184_s27 + $0x44] sm:$0xf0]  ;;  %v853_v21 = vld [vmem:[%s1184_s27 + $0x8] sm:$0xf0]  ;;  %v852_v24 = vor.u32 %v981_v17, %v851_v16 }
  0x19   : > { %v988_v22 = vld [vmem:[%s1184_s27 + $0x44] sm:$0xf]  ;;  %v885_v23 = vld [vmem:[%s1184_s27 + $0x48] sm:$0xf0]  ;;  %v884_v25 = vor.u32 %v989_v19, %v883_v18  ;;  %v856_v26 = vor.u32 %v980_v20, %v853_v21  ;;  %v891_v30 = vld [vmem:[%s1184_s27 + $0x50] sm:$0xf] }
  0x1a   : > { %507 = vmatpush.bf16.msra.mxu0 %v1001_v4  ;;  %1014 = vmatpush.bf16.msra.mxu2 %v1001_v4  ;;  %v888_v27 = vor.u32 %v988_v22, %v885_v23  ;;  %v991_v31 = vld [vmem:[%s1184_s27 + $0x54] sm:$0xf0]  ;;  %v982_v32 = vld [vmem:[%s1184_s27 + $0x14] sm:$0xf]  ;;  %v861_v33 = vld [vmem:[%s1184_s27 + $0x18] sm:$0xf0] }
  0x1b   : > { %556 = vmatpush.bf16.msra.mxu1 %v1009_v5  ;;  %1022 = vmatpush.bf16.msra.mxu3 %v1009_v5  ;;  %v990_v34 = vld [vmem:[%s1184_s27 + $0x54] sm:$0xf]  ;;  %v893_v35 = vld [vmem:[%s1184_s27 + $0x58] sm:$0xf0]  ;;  %v892_v37 = vor.u32 %v991_v31, %v891_v30  ;;  %v864_v38 = vor.u32 %v982_v32, %v861_v33  ;;  %v867_v40 = vld [vmem:[%s1184_s27 + $0x20] sm:$0xf] }
  0x1c   : > { %v896_v39 = vor.u32 %v990_v34, %v893_v35  ;;  %v985_v41 = vld [vmem:[%s1184_s27 + $0x24] sm:$0xf0]  ;;  %v899_v42 = vld [vmem:[%s1184_s27 + $0x60] sm:$0xf]  ;;  %v984_v44 = vld [vmem:[%s1184_s27 + $0x24] sm:$0xf] }
  0x1d   : > { %v993_v43 = vld [vmem:[%s1184_s27 + $0x64] sm:$0xf0]  ;;  %v869_v45 = vld [vmem:[%s1184_s27 + $0x28] sm:$0xf0]  ;;  %v992_v46 = vld [vmem:[%s1184_s27 + $0x64] sm:$0xf]  ;;  %v868_v48 = vor.u32 %v985_v41, %v867_v40 }
  0x1e   : > { %508 = vmatpush.bf16.msra.mxu0 %v1000_v6  ;;  %1015 = vmatpush.bf16.msra.mxu2 %v1000_v6  ;;  %v901_v47 = vld [vmem:[%s1184_s27 + $0x68] sm:$0xf0]  ;;  %v900_v49 = vor.u32 %v993_v43, %v899_v42  ;;  %v872_v50 = vor.u32 %v984_v44, %v869_v45  ;;  %v875_v52 = vld [vmem:[%s1184_s27 + $0x30] sm:$0xf]  ;;  %v987_v53 = vld [vmem:[%s1184_s27 + $0x34] sm:$0xf0] }
  0x1f   : > { %557 = vmatpush.bf16.msra.mxu1 %v1008_v7  ;;  %1023 = vmatpush.bf16.msra.mxu3 %v1008_v7  ;;  %v904_v51 = vor.u32 %v992_v46, %v901_v47  ;;  %v907_v54 = vld [vmem:[%s1184_s27 + $0x70] sm:$0xf]  ;;  %v995_v55 = vld [vmem:[%s1184_s27 + $0x74] sm:$0xf0]  ;;  %v986_v56 = vld [vmem:[%s1184_s27 + $0x34] sm:$0xf]  ;;  %v876_v60 = vor.u32 %v987_v53, %v875_v52 }
  0x20   : > { %v877_v57 = vld [vmem:[%s1184_s27 + $0x38] sm:$0xf0]  ;;  %v994_v58 = vld [vmem:[%s1184_s27 + $0x74] sm:$0xf]  ;;  %v908_v61 = vor.u32 %v995_v55, %v907_v54 }
  0x21   : > { %v909_v59 = vld [vmem:[%s1184_s27 + $0x78] sm:$0xf0]  ;;  %v880_v62 = vor.u32 %v986_v56, %v877_v57 }
  0x22   : > { %509 = vmatpush.bf16.msra.mxu0 %v999_v8  ;;  %1016 = vmatpush.bf16.msra.mxu2 %v999_v8  ;;  %v912_v63 = vor.u32 %v994_v58, %v909_v59 }
  0x23   : > { %558 = vmatpush.bf16.msra.mxu1 %v1007_v9  ;;  %1024 = vmatpush.bf16.msra.mxu3 %v1007_v9 }
  0x26   : > { %510 = vmatpush.bf16.msra.mxu0 %v998_v10  ;;  %1017 = vmatpush.bf16.msra.mxu2 %v998_v10 }
  0x27   : > { %559 = vmatpush.bf16.msra.mxu1 %v1006_v11  ;;  %1025 = vmatpush.bf16.msra.mxu3 %v1006_v11 }
  0x2a   : > { %511 = vmatpush.bf16.msra.mxu0 %v997_v12  ;;  %1018 = vmatpush.bf16.msra.mxu2 %v997_v12 }
  0x2b   : > { %560 = vmatpush.bf16.msra.mxu1 %v1005_v13  ;;  %1026 = vmatpush.bf16.msra.mxu3 %v1005_v13 }
  0x2e   : > { %512 = vmatpush.bf16.msra.mxu0 %v996_v14  ;;  %1019 = vmatpush.bf16.msra.mxu2 %v996_v14 }
  0x2f   : > { %561 = vmatpush.bf16.msra.mxu1 %v1004_v15  ;;  %1027 = vmatpush.bf16.msra.mxu3 %v1004_v15 }
  0x31   : > { %513 = vmatmul.bf16.vlgmr.msra.gmra.mxu0 %v852_v24  ;;  %533 = vmatmul.bf16.vlgmr.msra.gmra.mxu2 %v884_v25 }
  0x32   : > { %562 = vmatmul.bf16.vlgmr.msra.gmra.mxu1 %v856_v26  ;;  %582 = vmatmul.bf16.vlgmr.msra.gmra.mxu3 %v888_v27 }
  0x41   : > { %518 = vmatmul.bf16.gmra.mxu0 %v860_v36  ;;  %538 = vmatmul.bf16.gmra.mxu2 %v892_v37 }
  0x42   : > { %567 = vmatmul.bf16.gmra.mxu1 %v864_v38  ;;  %587 = vmatmul.bf16.gmra.mxu3 %v896_v39 }
  0x51   : > { %523 = vmatmul.bf16.gmra.mxu0 %v868_v48  ;;  %543 = vmatmul.bf16.gmra.mxu2 %v900_v49 }
  0x52   : > { %572 = vmatmul.bf16.gmra.mxu1 %v872_v50  ;;  %592 = vmatmul.bf16.gmra.mxu3 %v904_v51 }
  0x61   : > { %528 = vmatmul.bf16.gmra.mxu0 %v876_v60  ;;  %548 = vmatmul.bf16.gmra.mxu2 %v908_v61 }
  0x62   : > { %577 = vmatmul.bf16.gmra.mxu1 %v880_v62  ;;  %597 = vmatmul.bf16.gmra.mxu3 %v912_v63 }
  0xae   : > { %v514_v0 = vpop.f32.mrf.mxu0 }
  0xaf   : > { %v563_v1 = vpop.f32.mrf.mxu1 }
  0xb0   : > { %v564_v2 = vadd.f32 %v563_v1, %v514_v0 }
  0xb2   : > { %vm654_vm0 = vcmp.ge.f32.partialorder %v564_v2, 0.0  ;;  %v670_v3 = vmul.f32 0.22916667, %v564_v2 }
  0xb4   : > { %v686_v4 = vsel %vm654_vm0, %v564_v2, %v670_v3  ;;  %v534_v5 = vpop.f32.mrf.mxu2 }
  0xb5   : > { %702 = vst [vmem:[%s1229_s5] sm:$0xff] %v686_v4  ;;  %v583_v6 = vpop.f32.mrf.mxu3 }
  0xb6   : > { %v584_v7 = vadd.f32 %v583_v6, %v534_v5  ;;  %v516_v8 = vpop.f32.mrf.mxu0 }
  0xb7   : > { %v565_v9 = vpop.f32.mrf.mxu1 }
  0xb8   : > { %vm662_vm1 = vcmp.ge.f32.partialorder %v584_v7, 0.0  ;;  %v678_v10 = vmul.f32 0.22916667, %v584_v7  ;;  %v566_v11 = vadd.f32 %v565_v9, %v516_v8 }
  0xba   : > { %v694_v12 = vsel %vm662_vm1, %v584_v7, %v678_v10  ;;  %vm655_vm2 = vcmp.ge.f32.partialorder %v566_v11, 0.0  ;;  %v671_v13 = vmul.f32 0.22916667, %v566_v11 }
  0xbb   : > { %710 = vst [vmem:[%s1229_s5 + $0x40] sm:$0xff] %v694_v12 }
  0xbc   : > { %v687_v14 = vsel %vm655_vm2, %v566_v11, %v671_v13  ;;  %v536_v15 = vpop.f32.mrf.mxu2 }
  0xbd   : > { %703 = vst [vmem:[%s1229_s5 + $0x8] sm:$0xff] %v687_v14  ;;  %v585_v16 = vpop.f32.mrf.mxu3 }
  0xbe   : > { %v586_v17 = vadd.f32 %v585_v16, %v536_v15  ;;  %v519_v18 = vpop.f32.mrf.mxu0 }
  0xbf   : > { %v568_v19 = vpop.f32.mrf.mxu1 }
  0xc0   : > { %vm663_vm3 = vcmp.ge.f32.partialorder %v586_v17, 0.0  ;;  %v679_v20 = vmul.f32 0.22916667, %v586_v17  ;;  %v569_v21 = vadd.f32 %v568_v19, %v519_v18 }
  0xc2   : > { %v695_v22 = vsel %vm663_vm3, %v586_v17, %v679_v20  ;;  %vm656_vm4 = vcmp.ge.f32.partialorder %v569_v21, 0.0  ;;  %v672_v23 = vmul.f32 0.22916667, %v569_v21 }
  0xc3   : > { %711 = vst [vmem:[%s1229_s5 + $0x48] sm:$0xff] %v695_v22 }
  0xc4   : > { %v688_v24 = vsel %vm656_vm4, %v569_v21, %v672_v23  ;;  %v539_v25 = vpop.f32.mrf.mxu2 }
  0xc5   : > { %704 = vst [vmem:[%s1229_s5 + $0x10] sm:$0xff] %v688_v24  ;;  %v588_v26 = vpop.f32.mrf.mxu3 }
  0xc6   : > { %v589_v27 = vadd.f32 %v588_v26, %v539_v25  ;;  %v521_v28 = vpop.f32.mrf.mxu0 }
  0xc7   : > { %v570_v29 = vpop.f32.mrf.mxu1 }
  0xc8   : > { %vm664_vm5 = vcmp.ge.f32.partialorder %v589_v27, 0.0  ;;  %v680_v30 = vmul.f32 0.22916667, %v589_v27  ;;  %v571_v31 = vadd.f32 %v570_v29, %v521_v28 }
  0xca   : > { %v696_v32 = vsel %vm664_vm5, %v589_v27, %v680_v30  ;;  %vm657_vm6 = vcmp.ge.f32.partialorder %v571_v31, 0.0  ;;  %v673_v33 = vmul.f32 0.22916667, %v571_v31 }
  0xcb   : > { %712 = vst [vmem:[%s1229_s5 + $0x50] sm:$0xff] %v696_v32 }
  0xcc   : > { %v689_v34 = vsel %vm657_vm6, %v571_v31, %v673_v33  ;;  %v541_v35 = vpop.f32.mrf.mxu2 }
  0xcd   : > { %705 = vst [vmem:[%s1229_s5 + $0x18] sm:$0xff] %v689_v34  ;;  %v590_v36 = vpop.f32.mrf.mxu3 }
  0xce   : > { %v591_v37 = vadd.f32 %v590_v36, %v541_v35  ;;  %v524_v38 = vpop.f32.mrf.mxu0 }
  0xcf   : > { %v573_v39 = vpop.f32.mrf.mxu1 }
  0xd0   : > { %vm665_vm7 = vcmp.ge.f32.partialorder %v591_v37, 0.0  ;;  %v681_v40 = vmul.f32 0.22916667, %v591_v37  ;;  %v574_v41 = vadd.f32 %v573_v39, %v524_v38 }
  0xd2   : > { %v697_v42 = vsel %vm665_vm7, %v591_v37, %v681_v40  ;;  %vm658_vm8 = vcmp.ge.f32.partialorder %v574_v41, 0.0  ;;  %v674_v43 = vmul.f32 0.22916667, %v574_v41 }
  0xd3   : > { %713 = vst [vmem:[%s1229_s5 + $0x58] sm:$0xff] %v697_v42 }
  0xd4   : > { %v690_v44 = vsel %vm658_vm8, %v574_v41, %v674_v43  ;;  %v544_v45 = vpop.f32.mrf.mxu2 }
  0xd5   : > { %706 = vst [vmem:[%s1229_s5 + $0x20] sm:$0xff] %v690_v44  ;;  %v593_v46 = vpop.f32.mrf.mxu3 }
  0xd6   : > { %v594_v47 = vadd.f32 %v593_v46, %v544_v45  ;;  %v526_v48 = vpop.f32.mrf.mxu0 }
  0xd7   : > { %v575_v49 = vpop.f32.mrf.mxu1 }
  0xd8   : > { %vm666_vm9 = vcmp.ge.f32.partialorder %v594_v47, 0.0  ;;  %v682_v50 = vmul.f32 0.22916667, %v594_v47  ;;  %v576_v51 = vadd.f32 %v575_v49, %v526_v48 }
  0xda   : > { %v698_v52 = vsel %vm666_vm9, %v594_v47, %v682_v50  ;;  %vm659_vm10 = vcmp.ge.f32.partialorder %v576_v51, 0.0  ;;  %v675_v53 = vmul.f32 0.22916667, %v576_v51 }
  0xdb   : > { %714 = vst [vmem:[%s1229_s5 + $0x60] sm:$0xff] %v698_v52 }
  0xdc   : > { %v691_v54 = vsel %vm659_vm10, %v576_v51, %v675_v53  ;;  %v546_v55 = vpop.f32.mrf.mxu2 }
  0xdd   : > { %707 = vst [vmem:[%s1229_s5 + $0x28] sm:$0xff] %v691_v54  ;;  %v595_v56 = vpop.f32.mrf.mxu3 }
  0xde   : > { %v596_v57 = vadd.f32 %v595_v56, %v546_v55  ;;  %v529_v58 = vpop.f32.mrf.mxu0 }
  0xdf   : > { %v578_v59 = vpop.f32.mrf.mxu1 }
  0xe0   : > { %vm667_vm11 = vcmp.ge.f32.partialorder %v596_v57, 0.0  ;;  %v683_v60 = vmul.f32 0.22916667, %v596_v57  ;;  %v579_v61 = vadd.f32 %v578_v59, %v529_v58 }
  0xe2   : > { %v699_v62 = vsel %vm667_vm11, %v596_v57, %v683_v60  ;;  %vm660_vm12 = vcmp.ge.f32.partialorder %v579_v61, 0.0  ;;  %v676_v63 = vmul.f32 0.22916667, %v579_v61 }
  0xe3   : > { %715 = vst [vmem:[%s1229_s5 + $0x68] sm:$0xff] %v699_v62 }
  0xe4   : > { %v692_v0 = vsel %vm660_vm12, %v579_v61, %v676_v63  ;;  %v549_v1 = vpop.f32.mrf.mxu2 }
  0xe5   : > { %708 = vst [vmem:[%s1229_s5 + $0x30] sm:$0xff] %v692_v0  ;;  %v598_v2 = vpop.f32.mrf.mxu3 }
  0xe6   : > { %v599_v3 = vadd.f32 %v598_v2, %v549_v1  ;;  %v531_v4 = vpop.f32.mrf.mxu0 }
  0xe7   : > { %v580_v5 = vpop.f32.mrf.mxu1 }
  0xe8   : > { %vm668_vm13 = vcmp.ge.f32.partialorder %v599_v3, 0.0  ;;  %v684_v6 = vmul.f32 0.22916667, %v599_v3  ;;  %v581_v7 = vadd.f32 %v580_v5, %v531_v4 }
  0xea   : > { %v700_v8 = vsel %vm668_vm13, %v599_v3, %v684_v6  ;;  %vm661_vm14 = vcmp.ge.f32.partialorder %v581_v7, 0.0  ;;  %v677_v9 = vmul.f32 0.22916667, %v581_v7 }
  0xeb   : > { %716 = vst [vmem:[%s1229_s5 + $0x70] sm:$0xff] %v700_v8 }
  0xec   : > { %v693_v10 = vsel %vm661_vm14, %v581_v7, %v677_v9  ;;  %v551_v11 = vpop.f32.mrf.mxu2 }
  0xed   : > { %709 = vst [vmem:[%s1229_s5 + $0x38] sm:$0xff] %v693_v10  ;;  %v600_v12 = vpop.f32.mrf.mxu3 }
  0xee   : > { %v601_v13 = vadd.f32 %v600_v12, %v551_v11 }
  0xf0   : > { %vm669_vm15 = vcmp.ge.f32.partialorder %v601_v13, 0.0  ;;  %v685_v14 = vmul.f32 0.22916667, %v601_v13 }
  0xf2   : > { %v701_v15 = vsel %vm669_vm15, %v601_v13, %v685_v14 }
  0xf3   : > { %717 = vst [vmem:[%s1229_s5 + $0x78] sm:$0xff] %v701_v15 }
  0xf4 PF: > { %s12_s13 = sadd.s32 1, %s1106_s13   ;;  %s1265_s9 = smov %s1098_s11 }
  0xf5   : > { %p9_p7 = scmp.ge.s32.totalorder %s12_s13, 8   ;;  %s1266_s10 = smov %s1102_s12 }
  0xf6   : > { %s1267_s11 = smov %s1270_s14  ;;  %s1268_s12 = smov %s1274_s15 }
  0xf7   :  { %11 = sbr.rel (!%p9_p7) target bundleno = 3 (0x3), region = 69 }

</bundles_post_ra>
